<compile_context>
chip_gen: v6e
topology: v6e:2x2x1
jax: 0.10.0
libtpu: 0.0.40
codegen_flags: <defaults>
</compile_context>

<pallas_src>
import functools

import jax
import jax.numpy as jnp
from jax.experimental import pallas as pl
from jax.experimental.pallas import tpu as pltpu


# --------------------------------------------------------------------------
# Kernel
# --------------------------------------------------------------------------
def _encoder_kernel(x_ref, w_ref, b_ref, o_ref):
    """One (tm, tn) output tile; k (in_dim reduction) is the innermost axis.

    The output block keeps the same (i, j) index for every k, so it stays
    resident in VMEM across the reduction and doubles as the f32 accumulator:
    init with the bias at k==0, accumulate MXU partial products, ReLU at the
    last k step.  No scratch accumulator, no epilogue copy.
    """
    k = pl.program_id(2)

    @pl.when(k == 0)
    def _init():
        o_ref[...] = jnp.broadcast_to(b_ref[...], o_ref.shape)

    o_ref[...] += jnp.dot(
        x_ref[...], w_ref[...], preferred_element_type=jnp.float32
    )

    @pl.when(k == pl.num_programs(2) - 1)
    def _finish():
        o_ref[...] = jnp.maximum(o_ref[...], 0.0)  # ReLU


# --------------------------------------------------------------------------
# Tiling / hardware heuristics
# --------------------------------------------------------------------------
def _round_up(v, m):
    return (v + m - 1) // m * m


def _is_v5e():
    try:
        kind = jax.devices()[0].device_kind.lower()
    except Exception:
        return False
    return ("v5 lite" in kind) or ("v5e" in kind) or ("v5litepod" in kind)


def _hw_config():
    """Generation-aware tile caps and VMEM budget."""
    vmem_cap = 128 << 20
    try:
        info = pltpu.get_tpu_info()
        v = getattr(info, "vmem_capacity_bytes", None)
        if v:
            vmem_cap = int(v)
    except Exception:
        pass

    if vmem_cap <= (64 << 20):
        # v7x-class: 64 MiB VMEM per TensorCore, 2 TCs -> tighter tiles and an
        # even number of "parallel" j blocks so the megacore split is balanced.
        return dict(tk_cap=2048, tn_cap=1280, tm_cap=1024,
                    prefer_even_j=True, w_bufs=2,
                    vmem_ceiling=min(vmem_cap - (12 << 20), 48 << 20))
    # v5e / v6e: 128 MiB VMEM, single TensorCore.  3-deep weight buffering only
    # on v5e (slow HBM); harmless elsewhere but kept conservative.
    return dict(tk_cap=4096, tn_cap=1536, tm_cap=1024,
                prefer_even_j=False, w_bufs=3 if _is_v5e() else 2,
                vmem_ceiling=min(vmem_cap - (24 << 20), 100 << 20))


def _pick_tile(dim, cap, unit=128, min_tile=256, prefer_even_blocks=False):
    """Largest tile <= cap (multiple of `unit`) that keeps padding small.

    Padding along N/K is streamed from HBM, so it dominates the score; block
    count adds a mild per-grid-step penalty; on v7x an odd block count along
    the sharded axis is penalized (one core would stream a full extra pass).
    """
    dim_r = _round_up(dim, unit)
    if dim_r <= cap:
        return dim_r
    best_t, best_score = cap, None
    t = cap
    while t >= min_tile:
        nblk = -(-dim_r // t)
        padded = nblk * t
        score = padded + nblk * 64
        if prefer_even_blocks and (nblk % 2 == 1):
            score += dim_r // 8
        if best_score is None or score < best_score:
            best_t, best_score = t, score
        t -= unit
    return best_t


def _weight_block_spec(tk, tn, n_bufs):
    idx_map = lambda i, j, k: (k, j)
    if n_bufs > 2:
        try:
            # Deeper buffering on the dominant (weight) stream hides the slow
            # HBM on v5e for the cost of one extra weight tile of VMEM.
            return pl.BlockSpec((tk, tn), idx_map,
                                pipeline_mode=pl.Buffered(n_bufs))
        except Exception:
            pass  # pipeline_mode not available in this jax version
    return pl.BlockSpec((tk, tn), idx_map)


# --------------------------------------------------------------------------
# Forward
# --------------------------------------------------------------------------
@functools.partial(
    jax.jit,
    static_argnames=("out_dim", "tk", "tn", "tm_cap", "w_bufs", "vmem_ceiling"),
)
def _encoder_forward(x, w_t, b_p, *, out_dim, tk, tn, tm_cap, w_bufs,
                     vmem_ceiling):
    """relu(x @ W.T + b) with W already prepared as padded bf16 (Kp, Np)."""
    B, K = x.shape
    Kp, Np = w_t.shape
    assert Kp % tk == 0 and Np % tn == 0

    # Spread the batch evenly over the fewest i blocks (<= tm_cap rows each).
    n_i = -(-B // tm_cap)
    tm = _round_up(-(-B // n_i), 16)
    Bp = _round_up(B, tm)
    grid = (Bp // tm, Np // tn, Kp // tk)

    # Per-call input prep: cheap (B is small) — pad + bf16 cast of x only.
    xp = jnp.zeros((Bp, Kp), jnp.bfloat16).at[:B, :K].set(
        x.astype(jnp.bfloat16))

    # VMEM budget: weight tiles (2- or 3-deep) + double-buffered x / output
    # (the output block is also the f32 accumulator) + bias.
    vmem_bytes = (w_bufs * tk * tn * 2
                  + 2 * tm * tk * 2
                  + 2 * tm * tn * 4
                  + 2 * tn * 4)
    vmem_limit = int(min(vmem_ceiling, max(32 << 20, (vmem_bytes * 3) // 2)))

    out_p = pl.pallas_call(
        _encoder_kernel,
        out_shape=jax.ShapeDtypeStruct((Bp, Np), jnp.float32),
        grid_spec=pltpu.PrefetchScalarGridSpec(
            num_scalar_prefetch=0,
            grid=grid,
            in_specs=[
                pl.BlockSpec((tm, tk), lambda i, j, k: (i, k)),   # x tile
                _weight_block_spec(tk, tn, w_bufs),               # W^T tile
                pl.BlockSpec((1, tn), lambda i, j, k: (0, j)),    # bias tile
            ],
            out_specs=pl.BlockSpec((tm, tn), lambda i, j, k: (i, j)),
        ),
        compiler_params=pltpu.CompilerParams(
            dimension_semantics=("parallel", "parallel", "arbitrary"),
            vmem_limit_bytes=vmem_limit,
        ),
    )(xp, w_t, b_p)

    return out_p[:B, :out_dim].astype(x.dtype)


class PallasEncoder:
    """Drop-in for the PyTorch Encoder: y = relu(x @ W.T + b).

    __init__ does the one-time weight preparation (transpose + bf16 cast +
    padding to tile multiples); __call__ only pads/casts x and runs the kernel.
    """

    def __init__(self, w, b):
        w = jnp.asarray(w)
        b = jnp.asarray(b)
        N, K = w.shape
        assert b.shape == (N,)
        self.in_dim, self.out_dim = K, N

        cfg = _hw_config()
        self._cfg = cfg
        self.tk = _pick_tile(K, cfg["tk_cap"])
        self.tn = _pick_tile(N, cfg["tn_cap"],
                             prefer_even_blocks=cfg["prefer_even_j"])
        Kp, Np = _round_up(K, self.tk), _round_up(N, self.tn)

        # One-time HBM prep (NOT repeated per forward call).
        self.w_t = jnp.zeros((Kp, Np), jnp.bfloat16).at[:K, :N].set(
            w.T.astype(jnp.bfloat16))
        self.b_p = jnp.zeros((1, Np), jnp.float32).at[0, :N].set(
            b.astype(jnp.float32))

    def __call__(self, x):
        return _encoder_forward(
            x, self.w_t, self.b_p,
            out_dim=self.out_dim, tk=self.tk, tn=self.tn,
            tm_cap=self._cfg["tm_cap"], w_bufs=self._cfg["w_bufs"],
            vmem_ceiling=self._cfg["vmem_ceiling"])


# --------------------------------------------------------------------------
# Demo / correctness check (small shapes consistent with Linear + ReLU).
# --------------------------------------------------------------------------
def _make_params(key, in_dim, hidden_dim):
    kw, kb = jax.random.split(key)
    bound = 1.0 / (in_dim ** 0.5)   # mimics nn.Linear uniform init
    w = jax.random.uniform(kw, (hidden_dim, in_dim), minval=-bound,
                           maxval=bound, dtype=jnp.float32)
    b = jax.random.uniform(kb, (hidden_dim,), minval=-bound, maxval=bound,
                           dtype=jnp.float32)
    return w, b


def _check(key, B, in_dim, hidden_dim):
    kx, kp = jax.random.split(key)
    x = jax.random.normal(kx, (B, in_dim), dtype=jnp.float32)
    w, b = _make_params(kp, in_dim, hidden_dim)

    enc = PallasEncoder(w, b)                 # one-time weight prep
    out = jax.block_until_ready(enc(x))
    assert out.shape == (B, hidden_dim)

    # Reference with the same bf16 input rounding, f32 accumulation.
    x_bf = x.astype(jnp.bfloat16).astype(jnp.float32)
    w_bf = w.astype(jnp.bfloat16).astype(jnp.float32)
    ref = jnp.maximum(x_bf @ w_bf.T + b, 0.0)
    assert jnp.allclose(out, ref, atol=2e-2, rtol=2e-2), \
        "mismatch vs bf16 reference"

    # Loose sanity check vs the pure-f32 PyTorch-equivalent reference.
    ref_f32 = jnp.maximum(x @ w.T + b, 0.0)
    assert jnp.allclose(out, ref_f32, atol=5e-2, rtol=5e-2), \
        "mismatch vs f32 reference"


if __name__ == "__main__":
    key = jax.random.PRNGKey(0)
    k1, k2 = jax.random.split(key)

    # Multi-K-block accumulation path (in_dim spans several tk tiles).
    _check(k1, B=16, in_dim=4608, hidden_dim=640)
    # Single-block path with ragged (non-128-multiple) dims and batch < 16.
    _check(k2, B=4, in_dim=1000, hidden_dim=300)

    print("KERNEL_OK")
</pallas_src>

<mosaic_0001>
module attributes {stable_mosaic.version = 11 : i64} {
  func.func @_encoder_kernel(%arg0: i32, %arg1: i32, %arg2: i32, %arg3: memref<16x2304xbf16, #tpu.memory_space<vmem>>, %arg4: memref<2304x640xbf16, #tpu.memory_space<vmem>>, %arg5: memref<1x640xf32, #tpu.memory_space<vmem>>, %arg6: memref<16x640xf32, #tpu.memory_space<vmem>>) attributes {dimension_semantics = [#tpu.dimension_semantics<parallel>, #tpu.dimension_semantics<parallel>, #tpu.dimension_semantics<arbitrary>], iteration_bounds = array<i64: 1, 1, 2>, scalar_prefetch = 0 : i64, scratch_operands = 0 : i64, tpu.core_type = #tpu.core_type<tc>, window_params = [{transform_indices = @transform_0, window_bounds = array<i64: 16, 2304>}, {transform_indices = @transform_1, window_bounds = array<i64: 2304, 640>}, {transform_indices = @transform_2, window_bounds = array<i64: 1, 640>}, {transform_indices = @transform_3, window_bounds = array<i64: 16, 640>}]} {
    %c0_i32 = arith.constant 0 : i32
    %0 = arith.cmpi eq, %arg2, %c0_i32 : i32
    %1 = arith.extui %0 : i1 to i32
    %c0_i32_0 = arith.constant 0 : i32
    %2 = arith.cmpi ne, %1, %c0_i32_0 : i32
    scf.if %2 {
      %c0_9 = arith.constant 0 : index
      %c0_10 = arith.constant 0 : index
      %12 = vector.load %arg5[%c0_9, %c0_10] : memref<1x640xf32, #tpu.memory_space<vmem>>, vector<1x640xf32>
      %13 = vector.shape_cast %12 : vector<1x640xf32> to vector<1x640xf32>
      %14 = vector.broadcast %13 : vector<1x640xf32> to vector<16x640xf32>
      %c0_11 = arith.constant 0 : index
      %c0_12 = arith.constant 0 : index
      %15 = vector.load %arg6[%c0_11, %c0_12] : memref<16x640xf32, #tpu.memory_space<vmem>>, vector<16x640xf32>
      tpu.vector_store %arg6[%c0_11, %c0_12], %14 {strides = array<i32>} : memref<16x640xf32, #tpu.memory_space<vmem>>, vector<16x640xf32>,
    } else {
    }
    %c0 = arith.constant 0 : index
    %c0_1 = arith.constant 0 : index
    %3 = vector.load %arg6[%c0, %c0_1] : memref<16x640xf32, #tpu.memory_space<vmem>>, vector<16x640xf32>
    %c0_2 = arith.constant 0 : index
    %c0_3 = arith.constant 0 : index
    %4 = vector.load %arg3[%c0_2, %c0_3] : memref<16x2304xbf16, #tpu.memory_space<vmem>>, vector<16x2304xbf16>
    %c0_4 = arith.constant 0 : index
    %c0_5 = arith.constant 0 : index
    %5 = vector.load %arg4[%c0_4, %c0_5] : memref<2304x640xbf16, #tpu.memory_space<vmem>>, vector<2304x640xbf16>
    %cst = arith.constant dense<0.000000e+00> : vector<16x640xf32>
    %6 = tpu.matmul %4, %5, %cst {dimension_numbers = #tpu.dot_dimension_numbers<[1], [0], [0], [1], [0, 0, 1, 1], [], []>} : vector<16x2304xbf16>, vector<2304x640xbf16>, vector<16x640xf32> -> vector<16x640xf32>
    %7 = arith.addf %3, %6 : vector<16x640xf32>
    %c0_6 = arith.constant 0 : index
    %c0_7 = arith.constant 0 : index
    %8 = vector.load %arg6[%c0_6, %c0_7] : memref<16x640xf32, #tpu.memory_space<vmem>>, vector<16x640xf32>
    tpu.vector_store %arg6[%c0_6, %c0_7], %7 {strides = array<i32>} : memref<16x640xf32, #tpu.memory_space<vmem>>, vector<16x640xf32>,
    %c1_i32 = arith.constant 1 : i32
    %9 = arith.cmpi eq, %arg2, %c1_i32 : i32
    %10 = arith.extui %9 : i1 to i32
    %c0_i32_8 = arith.constant 0 : i32
    %11 = arith.cmpi ne, %10, %c0_i32_8 : i32
    scf.if %11 {
      %c0_9 = arith.constant 0 : index
      %c0_10 = arith.constant 0 : index
      %12 = vector.load %arg6[%c0_9, %c0_10] : memref<16x640xf32, #tpu.memory_space<vmem>>, vector<16x640xf32>
      %cst_11 = arith.constant 0.000000e+00 : f32
      %13 = vector.broadcast %cst_11 : f32 to vector<16x640xf32>
      %14 = arith.maximumf %12, %13 : vector<16x640xf32>
      %c0_12 = arith.constant 0 : index
      %c0_13 = arith.constant 0 : index
      %15 = vector.load %arg6[%c0_12, %c0_13] : memref<16x640xf32, #tpu.memory_space<vmem>>, vector<16x640xf32>
      tpu.vector_store %arg6[%c0_12, %c0_13], %14 {strides = array<i32>} : memref<16x640xf32, #tpu.memory_space<vmem>>, vector<16x640xf32>,
    } else {
    }
    return
  }
  func.func @transform_0(%arg0: i32, %arg1: i32, %arg2: i32) -> (i32, i32) {
    %c0_i32 = arith.constant 0 : i32
    return %arg0, %arg2 : i32, i32
  }
  func.func @transform_1(%arg0: i32, %arg1: i32, %arg2: i32) -> (i32, i32) {
    %c0_i32 = arith.constant 0 : i32
    return %arg2, %arg1 : i32, i32
  }
  func.func @transform_2(%arg0: i32, %arg1: i32, %arg2: i32) -> (i32, i32) {
    %c0_i32 = arith.constant 0 : i32
    %c0_i32_0 = arith.constant 0 : i32
    return %c0_i32, %arg1 : i32, i32
  }
  func.func @transform_3(%arg0: i32, %arg1: i32, %arg2: i32) -> (i32, i32) {
    %c0_i32 = arith.constant 0 : i32
    return %arg0, %arg1 : i32, i32
  }
}

</mosaic_0001>

<bundles_post_ra>
// kernel: _encoder_forward.1
= control target key start
LH: loop header
LB: loop body
LE: loop exit
PB: predicated region body
PF: predicated region fallthrough
CT: control target
= control target key end

     0   :  { %8 = vsyncpa [#allocation4], 0  ;;  %s9669_s0 = inlined_call_operand.vmem [shape: bf16[16,4608], index: 0, kind: input, shape index: {}]   ;;  %s9670_s1 = inlined_call_operand.hbm [shape: bf16[4608,640], index: 1, kind: input, shape index: {}]   ;;  %s9671_s2 = inlined_call_operand.hbm [shape: f32[1,640], index: 2, kind: input, shape index: {}]   ;;  %s9672_s3 = inlined_call_operand.hbm [shape: f32[16,640], index: 3, kind: output, shape index: {}]  }
   0x1   :  { %10 = vsyncpa [#allocation4 + $0x1], 0 }
   0x2   :  { %11 = vsyncpa [#allocation7], 0 }
   0x3   :  { %12 = vsyncpa [#allocation5], 0  ;;  %s8655_s12 = smov 0   ;;  %s8657_s13 = smov 0  }
   0x4   :  { %s8659_s14 = smov 0   ;;  %s8661_s15 = smov 0  }
   0x5   :  { %s8663_s16 = smov 0   ;;  %s8665_s17 = smov 0  }
   0x6 LB: > { %s6398_s18 = sadd.s32 4294967295, %s8626_s17   ;;  %s30_s19 = sadd.s32 1, %s8622_s16  ;;  %s8626_s17 = sphi %s8665_s17, %s18_s17   ;;  %s8622_s16 = sphi %s8663_s16, %s9684_s16   ;;  %s8618_s15 = sphi %s8661_s15, %s9683_s15   ;;  %s8614_s14 = sphi %s8659_s14, %s9682_s14   ;;  %s8610_s13 = sphi %s8657_s13, %s9681_s13   ;;  %s8606_s12 = sphi %s8655_s12, %s9680_s12  }
   0x7   : > { %p31_p0 = scmp.ge.s32.totalorder %s30_s19, 2  ;;  %s46_s20 = sadd.s32 1, %s8614_s14 }
   0x8   : > { %p53_p1 = scmp.ne.s32.totalorder %s8614_s14, %s8610_s13  ;;  %p54_p2 = scmp.eq.s32.totalorder %s8626_s17, 0 }
   0x9   : > { %s9686_s19 = smov (%p31_p0, %s30_s19), 0  ;;  %p87_p4 = scmp.ne.s32.totalorder %s8610_s13, %s8606_s12 }
   0xa   : > { %p8691_p3 = por %p54_p2, %p53_p1  ;;  %s42_s22 = ssub.s32 %s8622_s16, %s9686_s19 }
   0xb   : > { %p8700_p5 = scmp.eq.s32.totalorder %s6398_s18, 0  ;;  %p44_p6 = scmp.eq.s32.totalorder %s42_s22, 0 }
   0xc   : > { %p6399_p7 = scmp.ge.s32.totalorder %s8626_s17, 1  ;;  %p152_p9 = scmp.lt.s32.totalorder %s8626_s17, 3 }
   0xd   : > { %p8707_p8 = por %p8700_p5, %p87_p4  ;;  %s8628_s27 = smov [#allocation6]  }
   0xe   : > { %s8713_s25 = scalar_select %p44_p6, %s8614_s14, %s46_s20  }
   0xf   : > { %s9676_s24 = scalar_select %p8707_p8, 1, 0 }
  0x10   : > { %p8715_p10 = pnand %p6399_p7, %p152_p9  ;;  %s168_s28 = sshll.u32 %s8628_s27, 4  ;;  %s169_s28 = int_to_ptr.vmem [resolvable:$true] %s168_s28 }
  0x11   : > { %s8503_s29 = scalar_lea.vmem %s169_s28, 80  ;;  %s8510_s30 = scalar_lea.vmem %s169_s28, 96 }
  0x12   : > { %p7364_p11 = pneg %p8715_p10  ;;  %p8504_p0 = scmp.ne.s32.totalorder %s169_s28, %s8503_s29 }
  0x13   : > { %p8511_p4 = scmp.lt.s32.totalorder %s169_s28, %s169_s28  ;;  %p8512_p6 = scmp.lt.s32.totalorder %s8510_s30, %s8503_s29 }
  0x14   : > { %p7365_p12 = pnand %p7364_p11, %p8700_p5 }
  0x15   : > { %p8513_p7 = por %p8512_p6, %p8511_p4 }
  0x16   : > { %p8494_p13 = pneg %p7365_p12 }
  0x18   : > { %p8506_p1 = pnand %p8504_p0, %p8494_p13 }
  0x1a   : > { %p8507_p2 = pneg %p8506_p1 }
  0x1c   : > { %p8514_p9 = pnand %p8513_p7, %p8507_p2 }
  0x1e   : > { %8517 = shalt.err (!%p8514_p9)
}
  0x1f   : > { %7367 = dma.hbm_to_vmem [thread:$0]  (!%p7365_p12), %s9671_s2, 80, %s169_s28, [#allocation7]  }
  0x20   : > { %p6401_p8 = scmp.ge.s32.totalorder %s8626_s17, 2 }
  0x22   : > { %175 = sbr.rel (%p6401_p8) target bundleno = 70 (0x46), region = 20 }
  0x27   : > { %178 = sbr.rel (!%p8691_p3) target bundleno = 53 (0x35), region = 24  ;;  %s180_s6 = sand.u32 (%p8691_p3), 1, %s8614_s14  }
  0x28   : > { %s7150_s7 = smul.u32 (%p8691_p3), 72, %s8622_s16 }
  0x29   : > { %s7349_s8 = smul.u32 (%p8691_p3), 144, %s180_s6 }
  0x2a   : > { %s8734_s11 = scalar_lea.vmem (%p8691_p3), %s9669_s0, %s7150_s7 }
  0x2b   : > { %v201_v0 = vld [vmem:[%s8734_s11] sm:$0xff] (%p8691_p3)  ;;  %v203_v1 = vld [vmem:[%s8734_s11 + $0x8] sm:$0xff] (%p8691_p3)  ;;  %v205_v2 = vld [vmem:[%s8734_s11 + $0x10] sm:$0xff] (%p8691_p3)  ;;  %s8739_s12 = scalar_lea.vmem (%p8691_p3), [#allocation2], %s7349_s8 }
  0x2c   : > { %202 = vst [vmem:[%s8739_s12] sm:$0xff] %v201_v0  ;;  %204 = vst [vmem:[%s8739_s12 + $0x8] sm:$0xff] %v203_v1  ;;  %v207_v3 = vld [vmem:[%s8734_s11 + $0x18] sm:$0xff]  ;;  %v209_v4 = vld [vmem:[%s8734_s11 + $0x20] sm:$0xff] }
  0x2d   : > { %206 = vst [vmem:[%s8739_s12 + $0x10] sm:$0xff] %v205_v2  ;;  %v211_v5 = vld [vmem:[%s8734_s11 + $0x28] sm:$0xff]  ;;  %208 = vst [vmem:[%s8739_s12 + $0x18] sm:$0xff] %v207_v3  ;;  %v213_v6 = vld [vmem:[%s8734_s11 + $0x30] sm:$0xff] }
  0x2e   : > { %210 = vst [vmem:[%s8739_s12 + $0x20] sm:$0xff] %v209_v4  ;;  %212 = vst [vmem:[%s8739_s12 + $0x28] sm:$0xff] %v211_v5  ;;  %v215_v7 = vld [vmem:[%s8734_s11 + $0x38] sm:$0xff]  ;;  %v217_v8 = vld [vmem:[%s8734_s11 + $0x40] sm:$0xff] }
  0x2f   : > { %214 = vst [vmem:[%s8739_s12 + $0x30] sm:$0xff] %v213_v6  ;;  %216 = vst [vmem:[%s8739_s12 + $0x38] sm:$0xff] %v215_v7  ;;  %v219_v9 = vld [vmem:[%s8734_s11 + $0x90] sm:$0xff]  ;;  %v221_v10 = vld [vmem:[%s8734_s11 + $0x98] sm:$0xff] }
  0x30   : > { %218 = vst [vmem:[%s8739_s12 + $0x40] sm:$0xff] %v217_v8  ;;  %v223_v11 = vld [vmem:[%s8734_s11 + $0xa0] sm:$0xff]  ;;  %220 = vst [vmem:[%s8739_s12 + $0x48] sm:$0xff] %v219_v9  ;;  %v225_v12 = vld [vmem:[%s8734_s11 + $0xa8] sm:$0xff] }
  0x31   : > { %222 = vst [vmem:[%s8739_s12 + $0x50] sm:$0xff] %v221_v10  ;;  %224 = vst [vmem:[%s8739_s12 + $0x58] sm:$0xff] %v223_v11  ;;  %v227_v13 = vld [vmem:[%s8734_s11 + $0xb0] sm:$0xff]  ;;  %v229_v14 = vld [vmem:[%s8734_s11 + $0xb8] sm:$0xff] }
  0x32   : > { %226 = vst [vmem:[%s8739_s12 + $0x60] sm:$0xff] %v225_v12  ;;  %228 = vst [vmem:[%s8739_s12 + $0x68] sm:$0xff] %v227_v13  ;;  %v231_v15 = vld [vmem:[%s8734_s11 + $0xc0] sm:$0xff]  ;;  %v233_v16 = vld [vmem:[%s8734_s11 + $0xc8] sm:$0xff] }
  0x33   : > { %230 = vst [vmem:[%s8739_s12 + $0x70] sm:$0xff] %v229_v14  ;;  %v235_v17 = vld [vmem:[%s8734_s11 + $0xd0] sm:$0xff]  ;;  %232 = vst [vmem:[%s8739_s12 + $0x78] sm:$0xff] %v231_v15 }
  0x34   : > { %234 = vst [vmem:[%s8739_s12 + $0x80] sm:$0xff] %v233_v16  ;;  %236 = vst [vmem:[%s8739_s12 + $0x88] sm:$0xff] %v235_v17 }
  0x35 PF: > { %s243_s20 = sand.u32 1, %s8614_s14   ;;  %s7369_s27 = smul.u32 92160, %s8622_s16 }
  0x36   : > { %s7350_s22 = smul.u32 5760, %s243_s20  ;;  %s244_s6 = scalar_lea.sflag [#allocation4], %s243_s20 }
  0x37   : > { %s256_s30 = scalar_lea.hbm %s9670_s1, %s7369_s27  ;;  %s8629_s8 = smov [#allocation3]  }
  0x38   : > { %s247_s4 = scalar_lea.vmem [#allocation3], %s7350_s22  ;;  %s8534_s9 = sshll.u32 %s8629_s8, 4  ;;  %s8535_s9 = int_to_ptr.vmem [resolvable:$false] %s8534_s9 }
  0x39   : > { %s257_s5 = sshll.u32 %s247_s4, 4  ;;  %s8536_s10 = scalar_lea.vmem %s8535_s9, 184320  ;;  %s258_s5 = int_to_ptr.vmem [resolvable:$true] %s257_s5 }
  0x3a   : > { %s8530_s7 = scalar_lea.vmem %s258_s5, 92160  ;;  %p8537_p13 = scmp.lt.s32.totalorder %s258_s5, %s8535_s9 }
  0x3b   : > { %p8531_p8 = scmp.ne.s32.totalorder %s258_s5, %s8530_s7  ;;  %p8538_p0 = scmp.lt.s32.totalorder %s8536_s10, %s8530_s7 }
  0x3d   : > { %p8532_p11 = pnand %p8531_p8, %p8691_p3  ;;  %p8539_p1 = por %p8538_p0, %p8537_p13 }
  0x3f   : > { %p8533_p12 = pneg %p8532_p11 }
  0x41   : > { %p8540_p2 = pnand %p8539_p1, %p8533_p12 }
  0x43   : > { %8543 = shalt.err (!%p8540_p2)
}
  0x44   : > { %s8630_s11 = smov 320   ;;  %s8631_s12 = smov 20  }
  0x45   : > { %7356 = dma.hbm_to_vmem [thread:$0]  (%p8691_p3), %s256_s30, 92160, %s258_s5, %s244_s6, %s8630_s11, %s8630_s11, %s8631_s12  }
  0x46 PF: > { %269 = sbr.rel (%p8715_p10) target bundleno = 1067 (0x42b), region = 51  ;;  %s272_s20 = sand.u32 (!%p8715_p10), 1, %s8610_s13  }
  0x47   : > { %s7352_s22 = smul.u32 (!%p8715_p10), 144, %s272_s20  ;;  %s279_s29 = scalar_lea.sflag (!%p8715_p10), [#allocation4], %s272_s20 }
  0x48   : > { %s7353_s27 = smul.u32 (!%p8715_p10), 5760, %s272_s20  ;;  %p9678_p4 = scmp.ne.s32.totalorder (!%p8715_p10), %s9676_s24, 0 }
  0x49   : > { %s8786_s28 = scalar_lea.vmem (!%p8715_p10), [#allocation2], %s7352_s22 }
  0x4a   : > { %s8788_s4 = scalar_lea.vmem (!%p8715_p10), [#allocation3], %s7353_s27 }
  0x4b   : > { %8593 = dma.done.wait (%p9678_p4), %s279_s29, 92160  }
  0x4c   : > { %8595 = vsyncadd (%p9678_p4), %s279_s29, 4294875136 }
  0x4d   : > { %8597 = dma.done.wait (%p8700_p5), [#allocation7], 80  }
  0x4e   : > { %8599 = vsyncadd (%p8700_p5), [#allocation7], 4294967216  ;;  %p6406_p3 = scmp.ne.s32.totalorder %s8618_s15, 0 }
  0x50   : > { %319 = sbr.rel (%p6406_p3) target bundleno = 98 (0x62), region = 67 }
  0x55   : > { %v322_v18 = vlaneseq  ;;  %v320_v20 = vld [vmem:[#allocation6] sm:$0x1f] }
  0x57   : > { %v323_v19 = vshrl.u32 %v322_v18, 7 }
  0x59   : > { %v324_v21 = vsub.s32 0, %v323_v19  ;;  %v328_v22 = vsub.s32 1, %v323_v19  ;;  %v332_v23 = vsub.s32 2, %v323_v19  ;;  %v336_v24 = vsub.s32 3, %v323_v19 }
  0x5a   : > { %v340_v25 = vsub.s32 4, %v323_v19 }
  0x5b   : > { %v325_v26 = vrot.slane %v320_v20, %v324_v21  ;;  %v329_v27 = vrot.slane %v320_v20, %v328_v22  ;;  %v333_v28 = vrot.slane %v320_v20, %v332_v23  ;;  %v337_v29 = vrot.slane %v320_v20, %v336_v24 }
  0x5c   : > { %v341_v30 = vrot.slane %v320_v20, %v340_v25 }
  0x5d   : > { %347 = vst [vmem:[#allocation8] sm:$0xff] %v325_v26  ;;  %352 = vst [vmem:[#allocation8 + $0x28] sm:$0xff] %v325_v26 }
  0x5e   : > { %348 = vst [vmem:[#allocation8 + $0x8] sm:$0xff] %v329_v27  ;;  %353 = vst [vmem:[#allocation8 + $0x30] sm:$0xff] %v329_v27 }
  0x5f   : > { %349 = vst [vmem:[#allocation8 + $0x10] sm:$0xff] %v333_v28  ;;  %354 = vst [vmem:[#allocation8 + $0x38] sm:$0xff] %v333_v28 }
  0x60   : > { %350 = vst [vmem:[#allocation8 + $0x18] sm:$0xff] %v337_v29  ;;  %355 = vst [vmem:[#allocation8 + $0x40] sm:$0xff] %v337_v29 }
  0x61   : > { %351 = vst [vmem:[#allocation8 + $0x20] sm:$0xff] %v341_v30  ;;  %356 = vst [vmem:[#allocation8 + $0x48] sm:$0xff] %v341_v30 }
  0x62 PF: > { %v7427_v31 = vld [vmem:[%s8788_s4 + $0x11c] ss:$20 sps:$4 sm:$0xff]   ;;  %v7431_v33 = vld [vmem:[%s8788_s4 + $0x118] ss:$20 sps:$4 sm:$0xff]   ;;  %v7433_v35 = vld [vmem:[%s8788_s4 + $0xf4] ss:$20 sps:$4 sm:$0xff]  }
  0x63   : > { %v7429_v32 = vld [vmem:[%s8788_s4 + $0x39c] ss:$20 sps:$4 sm:$0xff]   ;;  %5083 = vmatprep.subr.bf16.mxu0 %v7427_v31  ;;  %v7432_v34 = vld [vmem:[%s8788_s4 + $0x398] ss:$20 sps:$4 sm:$0xff]   ;;  %v7435_v36 = vld [vmem:[%s8788_s4 + $0x374] ss:$20 sps:$4 sm:$0xff]  }
  0x64   : > { %5126 = vmatprep.subr.bf16.mxu1 %v7429_v32  ;;  %5084 = vmatpush1.bf16.msra.mxu0 %v7431_v33  ;;  %v7437_v37 = vld [vmem:[%s8788_s4 + $0xf0] ss:$20 sps:$4 sm:$0xff]   ;;  %v7439_v39 = vld [vmem:[%s8788_s4 + $0xcc] ss:$20 sps:$4 sm:$0xff]   ;;  %v7443_v41 = vld [vmem:[%s8788_s4 + $0xc8] ss:$20 sps:$4 sm:$0xff]  }
  0x65   : > { %5127 = vmatpush1.bf16.msra.mxu1 %v7432_v34  ;;  %5085 = vmatprep.subr.bf16.mxu0 %v7433_v35  ;;  %v7438_v38 = vld [vmem:[%s8788_s4 + $0x370] ss:$20 sps:$4 sm:$0xff]   ;;  %v7441_v40 = vld [vmem:[%s8788_s4 + $0x34c] ss:$20 sps:$4 sm:$0xff]   ;;  %v7444_v42 = vld [vmem:[%s8788_s4 + $0x348] ss:$20 sps:$4 sm:$0xff]  }
  0x66   : > { %5128 = vmatprep.subr.bf16.mxu1 %v7435_v36  ;;  %v7445_v43 = vld [vmem:[%s8788_s4 + $0xa4] ss:$20 sps:$4 sm:$0xff]   ;;  %v7449_v45 = vld [vmem:[%s8788_s4 + $0xa0] ss:$20 sps:$4 sm:$0xff]   ;;  %v7451_v47 = vld [vmem:[%s8788_s4 + $0x7c] ss:$20 sps:$4 sm:$0xff]  }
  0x67   : > { %v7447_v44 = vld [vmem:[%s8788_s4 + $0x324] ss:$20 sps:$4 sm:$0xff]   ;;  %v7450_v46 = vld [vmem:[%s8788_s4 + $0x320] ss:$20 sps:$4 sm:$0xff]   ;;  %v7453_v48 = vld [vmem:[%s8788_s4 + $0x2fc] ss:$20 sps:$4 sm:$0xff]  }
  0x68   : > { %5086 = vmatpush1.bf16.msra.mxu0 %v7437_v37  ;;  %v7455_v49 = vld [vmem:[%s8788_s4 + $0x78] ss:$20 sps:$4 sm:$0xff]   ;;  %v7457_v51 = vld [vmem:[%s8788_s4 + $0x54] ss:$20 sps:$4 sm:$0xff]   ;;  %v7461_v53 = vld [vmem:[%s8788_s4 + $0x50] ss:$20 sps:$4 sm:$0xff]  }
  0x69   : > { %5129 = vmatpush1.bf16.msra.mxu1 %v7438_v38  ;;  %5087 = vmatprep.subr.bf16.mxu0 %v7439_v39  ;;  %v7456_v50 = vld [vmem:[%s8788_s4 + $0x2f8] ss:$20 sps:$4 sm:$0xff]   ;;  %v7459_v52 = vld [vmem:[%s8788_s4 + $0x2d4] ss:$20 sps:$4 sm:$0xff]   ;;  %v7462_v54 = vld [vmem:[%s8788_s4 + $0x2d0] ss:$20 sps:$4 sm:$0xff]  }
  0x6a   : > { %5130 = vmatprep.subr.bf16.mxu1 %v7441_v40  ;;  %v7463_v55 = vld [vmem:[%s8788_s4 + $0x2c] ss:$20 sps:$4 sm:$0xff]   ;;  %v7467_v57 = vld [vmem:[%s8788_s4 + $0x28] ss:$20 sps:$4 sm:$0xff]   ;;  %v7469_v59 = vld [vmem:[%s8788_s4 + $0x4] ss:$20 sps:$4 sm:$0xff]  }
  0x6b   : > { %v7465_v56 = vld [vmem:[%s8788_s4 + $0x2ac] ss:$20 sps:$4 sm:$0xff]   ;;  %v7468_v58 = vld [vmem:[%s8788_s4 + $0x2a8] ss:$20 sps:$4 sm:$0xff]   ;;  %v7471_v60 = vld [vmem:[%s8788_s4 + $0x284] ss:$20 sps:$4 sm:$0xff]  }
  0x6c   : > { %5088 = vmatpush1.bf16.msra.mxu0 %v7443_v41  ;;  %v7473_v61 = vld [vmem:[%s8788_s4] ss:$20 sps:$4 sm:$0xff]   ;;  %v7475_v63 = vld [vmem:[%s8788_s4 + $0x25c] ss:$20 sps:$4 sm:$0xff]   ;;  %v7479_v1 = vld [vmem:[%s8788_s4 + $0x258] ss:$20 sps:$4 sm:$0xff]  }
  0x6d   : > { %5131 = vmatpush1.bf16.msra.mxu1 %v7444_v42  ;;  %5089 = vmatprep.subr.bf16.mxu0 %v7445_v43  ;;  %v7474_v62 = vld [vmem:[%s8788_s4 + $0x280] ss:$20 sps:$4 sm:$0xff]   ;;  %v7477_v0 = vld [vmem:[%s8788_s4 + $0x4dc] ss:$20 sps:$4 sm:$0xff]   ;;  %v7480_v2 = vld [vmem:[%s8788_s4 + $0x4d8] ss:$20 sps:$4 sm:$0xff]  }
  0x6e   : > { %5132 = vmatprep.subr.bf16.mxu1 %v7447_v44  ;;  %v7481_v3 = vld [vmem:[%s8788_s4 + $0x234] ss:$20 sps:$4 sm:$0xff]   ;;  %v7485_v5 = vld [vmem:[%s8788_s4 + $0x230] ss:$20 sps:$4 sm:$0xff]   ;;  %v7487_v7 = vld [vmem:[%s8788_s4 + $0x20c] ss:$20 sps:$4 sm:$0xff]  }
  0x6f   : > { %v7483_v4 = vld [vmem:[%s8788_s4 + $0x4b4] ss:$20 sps:$4 sm:$0xff]   ;;  %v7486_v6 = vld [vmem:[%s8788_s4 + $0x4b0] ss:$20 sps:$4 sm:$0xff]   ;;  %v7489_v8 = vld [vmem:[%s8788_s4 + $0x48c] ss:$20 sps:$4 sm:$0xff]  }
  0x70   : > { %5090 = vmatpush1.bf16.msra.mxu0 %v7449_v45  ;;  %v7491_v9 = vld [vmem:[%s8788_s4 + $0x208] ss:$20 sps:$4 sm:$0xff]   ;;  %v7493_v11 = vld [vmem:[%s8788_s4 + $0x1e4] ss:$20 sps:$4 sm:$0xff]   ;;  %v7497_v13 = vld [vmem:[%s8788_s4 + $0x1e0] ss:$20 sps:$4 sm:$0xff]  }
  0x71   : > { %5133 = vmatpush1.bf16.msra.mxu1 %v7450_v46  ;;  %5091 = vmatprep.subr.bf16.mxu0 %v7451_v47  ;;  %v7492_v10 = vld [vmem:[%s8788_s4 + $0x488] ss:$20 sps:$4 sm:$0xff]   ;;  %v7495_v12 = vld [vmem:[%s8788_s4 + $0x464] ss:$20 sps:$4 sm:$0xff]   ;;  %v7498_v14 = vld [vmem:[%s8788_s4 + $0x460] ss:$20 sps:$4 sm:$0xff]  }
  0x72   : > { %5134 = vmatprep.subr.bf16.mxu1 %v7453_v48  ;;  %v7523_v15 = vld [vmem:[%s8786_s28 + $0x4] ss:$72 sps:$4 sm:$0xff]   ;;  %v7527_v35 = vld [vmem:[%s8786_s28] ss:$72 sps:$4 sm:$0xff]   ;;  %p7145_p5 = scmp.ne.s32.totalorder %s8618_s15, 1 }
  0x73   : > { %v7499_v16 = vld [vmem:[%s8788_s4 + $0x1bc] ss:$20 sps:$4 sm:$0xff]   ;;  %5115 = vmatprep.mubr.bf16.mxu0 %v7523_v15  ;;  %v7503_v19 = vld [vmem:[%s8788_s4 + $0x1b8] ss:$20 sps:$4 sm:$0xff]   ;;  %v7505_v21 = vld [vmem:[%s8788_s4 + $0x194] ss:$20 sps:$4 sm:$0xff]  }
  0x74   : > { %5092 = vmatpush1.bf16.msra.mxu0 %v7455_v49  ;;  %v7525_v17 = vld [vmem:[%s8786_s28 + $0xc] ss:$72 sps:$4 sm:$0xff]   ;;  %v7528_v36 = vld [vmem:[%s8786_s28 + $0x8] ss:$72 sps:$4 sm:$0xff]  }
  0x75   : > { %5135 = vmatpush1.bf16.msra.mxu1 %v7456_v50  ;;  %5093 = vmatprep.subr.bf16.mxu0 %v7457_v51  ;;  %v7501_v18 = vld [vmem:[%s8788_s4 + $0x43c] ss:$20 sps:$4 sm:$0xff]   ;;  %v7504_v20 = vld [vmem:[%s8788_s4 + $0x438] ss:$20 sps:$4 sm:$0xff]   ;;  %v7507_v22 = vld [vmem:[%s8788_s4 + $0x414] ss:$20 sps:$4 sm:$0xff]  }
  0x76   : > { %5136 = vmatprep.subr.bf16.mxu1 %v7459_v52  ;;  %5158 = vmatprep.mubr.bf16.mxu1 %v7525_v17  ;;  %v7509_v23 = vld [vmem:[%s8788_s4 + $0x190] ss:$20 sps:$4 sm:$0xff]   ;;  %v7511_v25 = vld [vmem:[%s8788_s4 + $0x16c] ss:$20 sps:$4 sm:$0xff]   ;;  %v7515_v27 = vld [vmem:[%s8788_s4 + $0x168] ss:$20 sps:$4 sm:$0xff]  }
  0x77   : > { %v7510_v24 = vld [vmem:[%s8788_s4 + $0x410] ss:$20 sps:$4 sm:$0xff]   ;;  %v7513_v26 = vld [vmem:[%s8788_s4 + $0x3ec] ss:$20 sps:$4 sm:$0xff]   ;;  %v7516_v28 = vld [vmem:[%s8788_s4 + $0x3e8] ss:$20 sps:$4 sm:$0xff]  }
  0x78   : > { %5094 = vmatpush1.bf16.msra.mxu0 %v7461_v53  ;;  %v7517_v29 = vld [vmem:[%s8788_s4 + $0x144] ss:$20 sps:$4 sm:$0xff]   ;;  %v7521_v31 = vld [vmem:[%s8788_s4 + $0x140] ss:$20 sps:$4 sm:$0xff]   ;;  %v7531_v33 = vld [vmem:[%s8788_s4 + $0x61c] ss:$20 sps:$4 sm:$0xff]  }
  0x79   : > { %5137 = vmatpush1.bf16.msra.mxu1 %v7462_v54  ;;  %5095 = vmatprep.subr.bf16.mxu0 %v7463_v55  ;;  %v7519_v30 = vld [vmem:[%s8788_s4 + $0x3c4] ss:$20 sps:$4 sm:$0xff]   ;;  %v7522_v32 = vld [vmem:[%s8788_s4 + $0x3c0] ss:$20 sps:$4 sm:$0xff]   ;;  %v7534_v34 = vld [vmem:[%s8788_s4 + $0x89c] ss:$20 sps:$4 sm:$0xff]  }
  0x7a   : > { %5138 = vmatprep.subr.bf16.mxu1 %v7465_v56  ;;  %v7529_v37 = vld [vmem:[%s8788_s4 + $0x618] ss:$20 sps:$4 sm:$0xff]   ;;  %v7537_v39 = vld [vmem:[%s8788_s4 + $0x5f4] ss:$20 sps:$4 sm:$0xff]   ;;  %v7535_v41 = vld [vmem:[%s8788_s4 + $0x5f0] ss:$20 sps:$4 sm:$0xff]  }
  0x7b   : > { %v7532_v38 = vld [vmem:[%s8788_s4 + $0x898] ss:$20 sps:$4 sm:$0xff]   ;;  %v7540_v40 = vld [vmem:[%s8788_s4 + $0x874] ss:$20 sps:$4 sm:$0xff]   ;;  %v7538_v42 = vld [vmem:[%s8788_s4 + $0x870] ss:$20 sps:$4 sm:$0xff]  }
  0x7c   : > { %5096 = vmatpush1.bf16.msra.mxu0 %v7467_v57  ;;  %v7543_v43 = vld [vmem:[%s8788_s4 + $0x5cc] ss:$20 sps:$4 sm:$0xff]   ;;  %v7541_v45 = vld [vmem:[%s8788_s4 + $0x5c8] ss:$20 sps:$4 sm:$0xff]   ;;  %v7549_v47 = vld [vmem:[%s8788_s4 + $0x5a4] ss:$20 sps:$4 sm:$0xff]  }
  0x7d   : > { %5139 = vmatpush1.bf16.msra.mxu1 %v7468_v58  ;;  %5097 = vmatprep.subr.bf16.mxu0 %v7469_v59  ;;  %v7546_v44 = vld [vmem:[%s8788_s4 + $0x84c] ss:$20 sps:$4 sm:$0xff]   ;;  %v7544_v46 = vld [vmem:[%s8788_s4 + $0x848] ss:$20 sps:$4 sm:$0xff]   ;;  %v7552_v48 = vld [vmem:[%s8788_s4 + $0x824] ss:$20 sps:$4 sm:$0xff]  }
  0x7e   : > { %5140 = vmatprep.subr.bf16.mxu1 %v7471_v60  ;;  %v7547_v49 = vld [vmem:[%s8788_s4 + $0x5a0] ss:$20 sps:$4 sm:$0xff]   ;;  %v7555_v51 = vld [vmem:[%s8788_s4 + $0x57c] ss:$20 sps:$4 sm:$0xff]   ;;  %v7553_v53 = vld [vmem:[%s8788_s4 + $0x578] ss:$20 sps:$4 sm:$0xff]  }
  0x7f   : > { %v7550_v50 = vld [vmem:[%s8788_s4 + $0x820] ss:$20 sps:$4 sm:$0xff]   ;;  %v7558_v52 = vld [vmem:[%s8788_s4 + $0x7fc] ss:$20 sps:$4 sm:$0xff]   ;;  %v7556_v54 = vld [vmem:[%s8788_s4 + $0x7f8] ss:$20 sps:$4 sm:$0xff]  }
  0x80   : > { %5098 = vmatpush1.bf16.msra.mxu0 %v7473_v61  ;;  %v7561_v55 = vld [vmem:[%s8788_s4 + $0x554] ss:$20 sps:$4 sm:$0xff]   ;;  %v7559_v57 = vld [vmem:[%s8788_s4 + $0x550] ss:$20 sps:$4 sm:$0xff]   ;;  %v7567_v59 = vld [vmem:[%s8788_s4 + $0x52c] ss:$20 sps:$4 sm:$0xff]  }
  0x81   : > { %5141 = vmatpush1.bf16.msra.mxu1 %v7474_v62  ;;  %5099 = vmatprep.subr.bf16.mxu0 %v7475_v63  ;;  %v7564_v56 = vld [vmem:[%s8788_s4 + $0x7d4] ss:$20 sps:$4 sm:$0xff]   ;;  %v7562_v58 = vld [vmem:[%s8788_s4 + $0x7d0] ss:$20 sps:$4 sm:$0xff]   ;;  %v7570_v60 = vld [vmem:[%s8788_s4 + $0x7ac] ss:$20 sps:$4 sm:$0xff]  }
  0x82   : > { %5142 = vmatprep.subr.bf16.mxu1 %v7477_v0  ;;  %v7565_v61 = vld [vmem:[%s8788_s4 + $0x528] ss:$20 sps:$4 sm:$0xff]   ;;  %v7573_v63 = vld [vmem:[%s8788_s4 + $0x504] ss:$20 sps:$4 sm:$0xff]  }
  0x83   : > { %v7568_v62 = vld [vmem:[%s8788_s4 + $0x7a8] ss:$20 sps:$4 sm:$0xff]   ;;  %v7576_v0 = vld [vmem:[%s8788_s4 + $0x784] ss:$20 sps:$4 sm:$0xff]  }
  0x84   : > { %5100 = vmatpush2.bf16.msra.mxu0 %v7479_v1  ;;  %v7627_v1 = vld [vmem:[%s8786_s28 + $0x14] ss:$72 sps:$4 sm:$0xff]  }
  0x85   : > { %5143 = vmatpush2.bf16.msra.mxu1 %v7480_v2  ;;  %5101 = vmatprep.subr.bf16.mxu0 %v7481_v3  ;;  %v7630_v2 = vld [vmem:[%s8786_s28 + $0x1c] ss:$72 sps:$4 sm:$0xff]  }
  0x86   : > { %5144 = vmatprep.subr.bf16.mxu1 %v7483_v4  ;;  %v7571_v3 = vld [vmem:[%s8788_s4 + $0x500] ss:$20 sps:$4 sm:$0xff]   ;;  %v7589_v15 = vld [vmem:[%s8788_s4 + $0x708] ss:$20 sps:$4 sm:$0xff]   ;;  %v7597_v17 = vld [vmem:[%s8788_s4 + $0x6e4] ss:$20 sps:$4 sm:$0xff]  }
  0x87   : > { %v7574_v4 = vld [vmem:[%s8788_s4 + $0x780] ss:$20 sps:$4 sm:$0xff]  }
  0x88   : > { %5102 = vmatpush2.bf16.msra.mxu0 %v7485_v5  ;;  %v7579_v5 = vld [vmem:[%s8788_s4 + $0x75c] ss:$20 sps:$4 sm:$0xff]  }
  0x89   : > { %5145 = vmatpush2.bf16.msra.mxu1 %v7486_v6  ;;  %5103 = vmatprep.subr.bf16.mxu0 %v7487_v7  ;;  %v7582_v6 = vld [vmem:[%s8788_s4 + $0x9dc] ss:$20 sps:$4 sm:$0xff]   ;;  %v7577_v7 = vld [vmem:[%s8788_s4 + $0x758] ss:$20 sps:$4 sm:$0xff]  }
  0x8a   : > { %5146 = vmatprep.subr.bf16.mxu1 %v7489_v8  ;;  %v7580_v8 = vld [vmem:[%s8788_s4 + $0x9d8] ss:$20 sps:$4 sm:$0xff]  }
  0x8c   : > { %5104 = vmatpush2.bf16.msra.mxu0 %v7491_v9  ;;  %v7585_v9 = vld [vmem:[%s8788_s4 + $0x734] ss:$20 sps:$4 sm:$0xff]  }
  0x8d   : > { %5147 = vmatpush2.bf16.msra.mxu1 %v7492_v10  ;;  %5105 = vmatprep.subr.bf16.mxu0 %v7493_v11  ;;  %v7588_v10 = vld [vmem:[%s8788_s4 + $0x9b4] ss:$20 sps:$4 sm:$0xff]   ;;  %v7583_v11 = vld [vmem:[%s8788_s4 + $0x730] ss:$20 sps:$4 sm:$0xff]  }
  0x8e   : > { %5148 = vmatprep.subr.bf16.mxu1 %v7495_v12  ;;  %v7586_v12 = vld [vmem:[%s8788_s4 + $0x9b0] ss:$20 sps:$4 sm:$0xff]  }
  0x90   : > { %5106 = vmatpush2.bf16.msra.mxu0 %v7497_v13  ;;  %v7591_v13 = vld [vmem:[%s8788_s4 + $0x70c] ss:$20 sps:$4 sm:$0xff]  }
  0x91   : > { %5149 = vmatpush2.bf16.msra.mxu1 %v7498_v14  ;;  %5107 = vmatprep.subr.bf16.mxu0 %v7499_v16  ;;  %v7594_v14 = vld [vmem:[%s8788_s4 + $0x98c] ss:$20 sps:$4 sm:$0xff]   ;;  %v7592_v16 = vld [vmem:[%s8788_s4 + $0x988] ss:$20 sps:$4 sm:$0xff]  }
  0x92   : > { %5150 = vmatprep.subr.bf16.mxu1 %v7501_v18  ;;  %v7600_v18 = vld [vmem:[%s8788_s4 + $0x964] ss:$20 sps:$4 sm:$0xff]  }
  0x94   : > { %5108 = vmatpush2.bf16.msra.mxu0 %v7503_v19  ;;  %v7595_v19 = vld [vmem:[%s8788_s4 + $0x6e0] ss:$20 sps:$4 sm:$0xff]  }
  0x95   : > { %5151 = vmatpush2.bf16.msra.mxu1 %v7504_v20  ;;  %5109 = vmatprep.subr.bf16.mxu0 %v7505_v21  ;;  %v7598_v20 = vld [vmem:[%s8788_s4 + $0x960] ss:$20 sps:$4 sm:$0xff]   ;;  %v7603_v21 = vld [vmem:[%s8788_s4 + $0x6bc] ss:$20 sps:$4 sm:$0xff]  }
  0x96   : > { %5152 = vmatprep.subr.bf16.mxu1 %v7507_v22  ;;  %v7606_v22 = vld [vmem:[%s8788_s4 + $0x93c] ss:$20 sps:$4 sm:$0xff]  }
  0x98   : > { %5110 = vmatpush2.bf16.msra.mxu0 %v7509_v23  ;;  %v7601_v23 = vld [vmem:[%s8788_s4 + $0x6b8] ss:$20 sps:$4 sm:$0xff]  }
  0x99   : > { %5153 = vmatpush2.bf16.msra.mxu1 %v7510_v24  ;;  %5111 = vmatprep.subr.bf16.mxu0 %v7511_v25  ;;  %v7604_v24 = vld [vmem:[%s8788_s4 + $0x938] ss:$20 sps:$4 sm:$0xff]   ;;  %v7609_v25 = vld [vmem:[%s8788_s4 + $0x694] ss:$20 sps:$4 sm:$0xff]  }
  0x9a   : > { %5154 = vmatprep.subr.bf16.mxu1 %v7513_v26  ;;  %v7612_v26 = vld [vmem:[%s8788_s4 + $0x914] ss:$20 sps:$4 sm:$0xff]  }
  0x9c   : > { %5112 = vmatpush2.bf16.msra.mxu0 %v7515_v27  ;;  %v7607_v27 = vld [vmem:[%s8788_s4 + $0x690] ss:$20 sps:$4 sm:$0xff]  }
  0x9d   : > { %5155 = vmatpush2.bf16.msra.mxu1 %v7516_v28  ;;  %5113 = vmatprep.subr.bf16.mxu0 %v7517_v29  ;;  %v7610_v28 = vld [vmem:[%s8788_s4 + $0x910] ss:$20 sps:$4 sm:$0xff]   ;;  %v7615_v29 = vld [vmem:[%s8788_s4 + $0x66c] ss:$20 sps:$4 sm:$0xff]  }
  0x9e   : > { %5156 = vmatprep.subr.bf16.mxu1 %v7519_v30  ;;  %v7618_v30 = vld [vmem:[%s8788_s4 + $0x8ec] ss:$20 sps:$4 sm:$0xff]  }
  0xa0   : > { %5114 = vmatpush2.bf16.msra.mxu0 %v7521_v31  ;;  %v7613_v31 = vld [vmem:[%s8788_s4 + $0x668] ss:$20 sps:$4 sm:$0xff]  }
  0xa1   : > { %5157 = vmatpush2.bf16.msra.mxu1 %v7522_v32  ;;  %5169 = vmatprep.subr.bf16.mxu0 %v7531_v33  ;;  %v7616_v32 = vld [vmem:[%s8788_s4 + $0x8e8] ss:$20 sps:$4 sm:$0xff]   ;;  %v7621_v33 = vld [vmem:[%s8788_s4 + $0x644] ss:$20 sps:$4 sm:$0xff]  }
  0xa2   : > { %5212 = vmatprep.subr.bf16.mxu1 %v7534_v34  ;;  %v7624_v34 = vld [vmem:[%s8788_s4 + $0x8c4] ss:$20 sps:$4 sm:$0xff]  }
  0xa3   : > { %5116 = vmatmul.mubr.bf16.vlgmr.msra.gmra.mxu0 %v7527_v35  ;;  %v7619_v35 = vld [vmem:[%s8788_s4 + $0x640] ss:$20 sps:$4 sm:$0xff]  }
  0xa4   : > { %5159 = vmatmul.mubr.bf16.vlgmr.msra.gmra.mxu1 %v7528_v36  ;;  %5170 = vmatpush1.bf16.msra.mxu0 %v7529_v37  ;;  %v7622_v36 = vld [vmem:[%s8788_s4 + $0x8c0] ss:$20 sps:$4 sm:$0xff]   ;;  %v7633_v37 = vld [vmem:[%s8788_s4 + $0xb1c] ss:$20 sps:$4 sm:$0xff]  }
  0xa5   : > { %5213 = vmatpush1.bf16.msra.mxu1 %v7532_v38  ;;  %5171 = vmatprep.subr.bf16.mxu0 %v7537_v39  ;;  %v7636_v38 = vld [vmem:[%s8788_s4 + $0xd9c] ss:$20 sps:$4 sm:$0xff]  }
  0xa6   : > { %5214 = vmatprep.subr.bf16.mxu1 %v7540_v40  ;;  %5201 = vmatprep.mubr.bf16.mxu0 %v7627_v1  ;;  %v7625_v39 = vld [vmem:[%s8786_s28 + $0x10] ss:$72 sps:$4 sm:$0xff]  }
  0xa7   : > { %5244 = vmatprep.mubr.bf16.mxu1 %v7630_v2  ;;  %v7628_v40 = vld [vmem:[%s8786_s28 + $0x18] ss:$72 sps:$4 sm:$0xff]  }
  0xa8   : > { %5172 = vmatpush1.bf16.msra.mxu0 %v7535_v41  ;;  %v7631_v41 = vld [vmem:[%s8788_s4 + $0xb18] ss:$20 sps:$4 sm:$0xff]  }
  0xa9   : > { %5215 = vmatpush1.bf16.msra.mxu1 %v7538_v42  ;;  %5173 = vmatprep.subr.bf16.mxu0 %v7543_v43  ;;  %v7634_v42 = vld [vmem:[%s8788_s4 + $0xd98] ss:$20 sps:$4 sm:$0xff]   ;;  %v7639_v43 = vld [vmem:[%s8788_s4 + $0xaf4] ss:$20 sps:$4 sm:$0xff]  }
  0xaa   : > { %5216 = vmatprep.subr.bf16.mxu1 %v7546_v44  ;;  %v7642_v44 = vld [vmem:[%s8788_s4 + $0xd74] ss:$20 sps:$4 sm:$0xff]   ;;  %v7669_v1 = vld [vmem:[%s8788_s4 + $0xa2c] ss:$20 sps:$4 sm:$0xff]  }
  0xab   : > { %v7672_v2 = vld [vmem:[%s8788_s4 + $0xcac] ss:$20 sps:$4 sm:$0xff]  }
  0xac   : > { %5174 = vmatpush1.bf16.msra.mxu0 %v7541_v45  ;;  %v7637_v45 = vld [vmem:[%s8788_s4 + $0xaf0] ss:$20 sps:$4 sm:$0xff]  }
  0xad   : > { %5217 = vmatpush1.bf16.msra.mxu1 %v7544_v46  ;;  %5175 = vmatprep.subr.bf16.mxu0 %v7549_v47  ;;  %v7640_v46 = vld [vmem:[%s8788_s4 + $0xd70] ss:$20 sps:$4 sm:$0xff]   ;;  %v7645_v47 = vld [vmem:[%s8788_s4 + $0xacc] ss:$20 sps:$4 sm:$0xff]  }
  0xae   : > { %5218 = vmatprep.subr.bf16.mxu1 %v7552_v48  ;;  %v7648_v48 = vld [vmem:[%s8788_s4 + $0xd4c] ss:$20 sps:$4 sm:$0xff]  }
  0xb0   : > { %5176 = vmatpush1.bf16.msra.mxu0 %v7547_v49  ;;  %v7643_v49 = vld [vmem:[%s8788_s4 + $0xac8] ss:$20 sps:$4 sm:$0xff]  }
  0xb1   : > { %5219 = vmatpush1.bf16.msra.mxu1 %v7550_v50  ;;  %5177 = vmatprep.subr.bf16.mxu0 %v7555_v51  ;;  %v7729_v50 = vld [vmem:[%s8786_s28 + $0x24] ss:$72 sps:$4 sm:$0xff]  }
  0xb2   : > { %5220 = vmatprep.subr.bf16.mxu1 %v7558_v52  ;;  %v7646_v51 = vld [vmem:[%s8788_s4 + $0xd48] ss:$20 sps:$4 sm:$0xff]  }
  0xb3   : > { %v7732_v52 = vld [vmem:[%s8786_s28 + $0x2c] ss:$72 sps:$4 sm:$0xff]  }
  0xb4   : > { %5178 = vmatpush1.bf16.msra.mxu0 %v7553_v53  ;;  %v7651_v53 = vld [vmem:[%s8788_s4 + $0xaa4] ss:$20 sps:$4 sm:$0xff]  }
  0xb5   : > { %5221 = vmatpush1.bf16.msra.mxu1 %v7556_v54  ;;  %5179 = vmatprep.subr.bf16.mxu0 %v7561_v55  ;;  %v7654_v54 = vld [vmem:[%s8788_s4 + $0xd24] ss:$20 sps:$4 sm:$0xff]   ;;  %v7649_v55 = vld [vmem:[%s8788_s4 + $0xaa0] ss:$20 sps:$4 sm:$0xff]  }
  0xb6   : > { %5222 = vmatprep.subr.bf16.mxu1 %v7564_v56  ;;  %v7652_v56 = vld [vmem:[%s8788_s4 + $0xd20] ss:$20 sps:$4 sm:$0xff]  }
  0xb8   : > { %5180 = vmatpush1.bf16.msra.mxu0 %v7559_v57  ;;  %v7657_v57 = vld [vmem:[%s8788_s4 + $0xa7c] ss:$20 sps:$4 sm:$0xff]  }
  0xb9   : > { %5223 = vmatpush1.bf16.msra.mxu1 %v7562_v58  ;;  %5181 = vmatprep.subr.bf16.mxu0 %v7567_v59  ;;  %v7660_v58 = vld [vmem:[%s8788_s4 + $0xcfc] ss:$20 sps:$4 sm:$0xff]   ;;  %v7655_v59 = vld [vmem:[%s8788_s4 + $0xa78] ss:$20 sps:$4 sm:$0xff]  }
  0xba   : > { %5224 = vmatprep.subr.bf16.mxu1 %v7570_v60  ;;  %v7658_v60 = vld [vmem:[%s8788_s4 + $0xcf8] ss:$20 sps:$4 sm:$0xff]  }
  0xbc   : > { %5182 = vmatpush1.bf16.msra.mxu0 %v7565_v61  ;;  %v7663_v61 = vld [vmem:[%s8788_s4 + $0xa54] ss:$20 sps:$4 sm:$0xff]  }
  0xbd   : > { %5225 = vmatpush1.bf16.msra.mxu1 %v7568_v62  ;;  %5183 = vmatprep.subr.bf16.mxu0 %v7573_v63  ;;  %v7666_v62 = vld [vmem:[%s8788_s4 + $0xcd4] ss:$20 sps:$4 sm:$0xff]   ;;  %v7661_v63 = vld [vmem:[%s8788_s4 + $0xa50] ss:$20 sps:$4 sm:$0xff]  }
  0xbe   : > { %5226 = vmatprep.subr.bf16.mxu1 %v7576_v0  ;;  %v7664_v0 = vld [vmem:[%s8788_s4 + $0xcd0] ss:$20 sps:$4 sm:$0xff]  }
  0xc0   : > { %5184 = vmatpush1.bf16.msra.mxu0 %v7571_v3  ;;  %v7667_v3 = vld [vmem:[%s8788_s4 + $0xa28] ss:$20 sps:$4 sm:$0xff]  }
  0xc1   : > { %5227 = vmatpush1.bf16.msra.mxu1 %v7574_v4  ;;  %5185 = vmatprep.subr.bf16.mxu0 %v7579_v5  ;;  %v7670_v4 = vld [vmem:[%s8788_s4 + $0xca8] ss:$20 sps:$4 sm:$0xff]   ;;  %v7675_v5 = vld [vmem:[%s8788_s4 + $0xa04] ss:$20 sps:$4 sm:$0xff]  }
  0xc2   : > { %5228 = vmatprep.subr.bf16.mxu1 %v7582_v6  ;;  %v7678_v6 = vld [vmem:[%s8788_s4 + $0xc84] ss:$20 sps:$4 sm:$0xff]  }
  0xc4   : > { %5186 = vmatpush2.bf16.msra.mxu0 %v7577_v7  ;;  %v7673_v7 = vld [vmem:[%s8788_s4 + $0xa00] ss:$20 sps:$4 sm:$0xff]  }
  0xc5   : > { %5229 = vmatpush2.bf16.msra.mxu1 %v7580_v8  ;;  %5187 = vmatprep.subr.bf16.mxu0 %v7585_v9  ;;  %v7676_v8 = vld [vmem:[%s8788_s4 + $0xc80] ss:$20 sps:$4 sm:$0xff]   ;;  %v7681_v9 = vld [vmem:[%s8788_s4 + $0xc5c] ss:$20 sps:$4 sm:$0xff]  }
  0xc6   : > { %5230 = vmatprep.subr.bf16.mxu1 %v7588_v10  ;;  %v7684_v10 = vld [vmem:[%s8788_s4 + $0xedc] ss:$20 sps:$4 sm:$0xff]  }
  0xc8   : > { %5188 = vmatpush2.bf16.msra.mxu0 %v7583_v11  ;;  %v7679_v11 = vld [vmem:[%s8788_s4 + $0xc58] ss:$20 sps:$4 sm:$0xff]  }
  0xc9   : > { %5231 = vmatpush2.bf16.msra.mxu1 %v7586_v12  ;;  %5189 = vmatprep.subr.bf16.mxu0 %v7591_v13  ;;  %v7682_v12 = vld [vmem:[%s8788_s4 + $0xed8] ss:$20 sps:$4 sm:$0xff]   ;;  %v7687_v13 = vld [vmem:[%s8788_s4 + $0xc34] ss:$20 sps:$4 sm:$0xff]  }
  0xca   : > { %5232 = vmatprep.subr.bf16.mxu1 %v7594_v14  ;;  %v7690_v14 = vld [vmem:[%s8788_s4 + $0xeb4] ss:$20 sps:$4 sm:$0xff]  }
  0xcc   : > { %5190 = vmatpush2.bf16.msra.mxu0 %v7589_v15  ;;  %v7685_v15 = vld [vmem:[%s8788_s4 + $0xc30] ss:$20 sps:$4 sm:$0xff]  }
  0xcd   : > { %5233 = vmatpush2.bf16.msra.mxu1 %v7592_v16  ;;  %5191 = vmatprep.subr.bf16.mxu0 %v7597_v17  ;;  %v7688_v16 = vld [vmem:[%s8788_s4 + $0xeb0] ss:$20 sps:$4 sm:$0xff]   ;;  %v7693_v17 = vld [vmem:[%s8788_s4 + $0xc0c] ss:$20 sps:$4 sm:$0xff]  }
  0xce   : > { %5234 = vmatprep.subr.bf16.mxu1 %v7600_v18  ;;  %v7696_v18 = vld [vmem:[%s8788_s4 + $0xe8c] ss:$20 sps:$4 sm:$0xff]  }
  0xd0   : > { %5192 = vmatpush2.bf16.msra.mxu0 %v7595_v19  ;;  %v7691_v19 = vld [vmem:[%s8788_s4 + $0xc08] ss:$20 sps:$4 sm:$0xff]  }
  0xd1   : > { %5235 = vmatpush2.bf16.msra.mxu1 %v7598_v20  ;;  %5193 = vmatprep.subr.bf16.mxu0 %v7603_v21  ;;  %v7694_v20 = vld [vmem:[%s8788_s4 + $0xe88] ss:$20 sps:$4 sm:$0xff]   ;;  %v7699_v21 = vld [vmem:[%s8788_s4 + $0xbe4] ss:$20 sps:$4 sm:$0xff]  }
  0xd2   : > { %5236 = vmatprep.subr.bf16.mxu1 %v7606_v22  ;;  %v7702_v22 = vld [vmem:[%s8788_s4 + $0xe64] ss:$20 sps:$4 sm:$0xff]  }
  0xd4   : > { %5194 = vmatpush2.bf16.msra.mxu0 %v7601_v23  ;;  %v7697_v23 = vld [vmem:[%s8788_s4 + $0xbe0] ss:$20 sps:$4 sm:$0xff]  }
  0xd5   : > { %5237 = vmatpush2.bf16.msra.mxu1 %v7604_v24  ;;  %5195 = vmatprep.subr.bf16.mxu0 %v7609_v25  ;;  %v7700_v24 = vld [vmem:[%s8788_s4 + $0xe60] ss:$20 sps:$4 sm:$0xff]   ;;  %v7705_v25 = vld [vmem:[%s8788_s4 + $0xbbc] ss:$20 sps:$4 sm:$0xff]  }
  0xd6   : > { %5238 = vmatprep.subr.bf16.mxu1 %v7612_v26  ;;  %v7708_v26 = vld [vmem:[%s8788_s4 + $0xe3c] ss:$20 sps:$4 sm:$0xff]  }
  0xd8   : > { %5196 = vmatpush2.bf16.msra.mxu0 %v7607_v27  ;;  %v7703_v27 = vld [vmem:[%s8788_s4 + $0xbb8] ss:$20 sps:$4 sm:$0xff]  }
  0xd9   : > { %5239 = vmatpush2.bf16.msra.mxu1 %v7610_v28  ;;  %5197 = vmatprep.subr.bf16.mxu0 %v7615_v29  ;;  %v7706_v28 = vld [vmem:[%s8788_s4 + $0xe38] ss:$20 sps:$4 sm:$0xff]   ;;  %v7711_v29 = vld [vmem:[%s8788_s4 + $0xb94] ss:$20 sps:$4 sm:$0xff]  }
  0xda   : > { %5240 = vmatprep.subr.bf16.mxu1 %v7618_v30  ;;  %v7714_v30 = vld [vmem:[%s8788_s4 + $0xe14] ss:$20 sps:$4 sm:$0xff]  }
  0xdc   : > { %5198 = vmatpush2.bf16.msra.mxu0 %v7613_v31  ;;  %v7709_v31 = vld [vmem:[%s8788_s4 + $0xb90] ss:$20 sps:$4 sm:$0xff]  }
  0xdd   : > { %5241 = vmatpush2.bf16.msra.mxu1 %v7616_v32  ;;  %5199 = vmatprep.subr.bf16.mxu0 %v7621_v33  ;;  %v7712_v32 = vld [vmem:[%s8788_s4 + $0xe10] ss:$20 sps:$4 sm:$0xff]   ;;  %v7717_v33 = vld [vmem:[%s8788_s4 + $0xb6c] ss:$20 sps:$4 sm:$0xff]  }
  0xde   : > { %5242 = vmatprep.subr.bf16.mxu1 %v7624_v34  ;;  %v7720_v34 = vld [vmem:[%s8788_s4 + $0xdec] ss:$20 sps:$4 sm:$0xff]  }
  0xe0   : > { %5200 = vmatpush2.bf16.msra.mxu0 %v7619_v35  ;;  %v7715_v35 = vld [vmem:[%s8788_s4 + $0xb68] ss:$20 sps:$4 sm:$0xff]  }
  0xe1   : > { %5243 = vmatpush2.bf16.msra.mxu1 %v7622_v36  ;;  %5255 = vmatprep.subr.bf16.mxu0 %v7633_v37  ;;  %v7718_v36 = vld [vmem:[%s8788_s4 + $0xde8] ss:$20 sps:$4 sm:$0xff]   ;;  %v7723_v37 = vld [vmem:[%s8788_s4 + $0xb44] ss:$20 sps:$4 sm:$0xff]  }
  0xe2   : > { %5298 = vmatprep.subr.bf16.mxu1 %v7636_v38  ;;  %v7726_v38 = vld [vmem:[%s8788_s4 + $0xdc4] ss:$20 sps:$4 sm:$0xff]  }
  0xe3   : > { %5202 = vmatmul.mubr.bf16.vlgmr.msra.gmra.mxu0 %v7625_v39  ;;  %v7721_v39 = vld [vmem:[%s8788_s4 + $0xb40] ss:$20 sps:$4 sm:$0xff]  }
  0xe4   : > { %5245 = vmatmul.mubr.bf16.vlgmr.msra.gmra.mxu1 %v7628_v40  ;;  %5256 = vmatpush1.bf16.msra.mxu0 %v7631_v41  ;;  %v7724_v40 = vld [vmem:[%s8788_s4 + $0xdc0] ss:$20 sps:$4 sm:$0xff]   ;;  %v7735_v41 = vld [vmem:[%s8788_s4 + $0x101c] ss:$20 sps:$4 sm:$0xff]  }
  0xe5   : > { %5299 = vmatpush1.bf16.msra.mxu1 %v7634_v42  ;;  %5257 = vmatprep.subr.bf16.mxu0 %v7639_v43  ;;  %v7738_v42 = vld [vmem:[%s8788_s4 + $0x129c] ss:$20 sps:$4 sm:$0xff]  }
  0xe6   : > { %5300 = vmatprep.subr.bf16.mxu1 %v7642_v44  ;;  %5287 = vmatprep.mubr.bf16.mxu0 %v7729_v50  ;;  %v7727_v43 = vld [vmem:[%s8786_s28 + $0x20] ss:$72 sps:$4 sm:$0xff]   ;;  %v7834_v50 = vld [vmem:[%s8786_s28 + $0x3c] ss:$72 sps:$4 sm:$0xff]  }
  0xe7   : > { %5330 = vmatprep.mubr.bf16.mxu1 %v7732_v52  ;;  %v7730_v44 = vld [vmem:[%s8786_s28 + $0x28] ss:$72 sps:$4 sm:$0xff]  }
  0xe8   : > { %5258 = vmatpush1.bf16.msra.mxu0 %v7637_v45  ;;  %v7733_v45 = vld [vmem:[%s8788_s4 + $0x1018] ss:$20 sps:$4 sm:$0xff]   ;;  %v7742_v52 = vld [vmem:[%s8788_s4 + $0x1270] ss:$20 sps:$4 sm:$0xff]  }
  0xe9   : > { %5301 = vmatpush1.bf16.msra.mxu1 %v7640_v46  ;;  %5259 = vmatprep.subr.bf16.mxu0 %v7645_v47  ;;  %v7736_v46 = vld [vmem:[%s8788_s4 + $0x1298] ss:$20 sps:$4 sm:$0xff]   ;;  %v7741_v47 = vld [vmem:[%s8788_s4 + $0xff4] ss:$20 sps:$4 sm:$0xff]  }
  0xea   : > { %5302 = vmatprep.subr.bf16.mxu1 %v7648_v48  ;;  %v7744_v48 = vld [vmem:[%s8788_s4 + $0x1274] ss:$20 sps:$4 sm:$0xff]  }
  0xec   : > { %5260 = vmatpush1.bf16.msra.mxu0 %v7643_v49  ;;  %v7831_v49 = vld [vmem:[%s8786_s28 + $0x34] ss:$72 sps:$4 sm:$0xff]  }
  0xed   : > { %5303 = vmatpush1.bf16.msra.mxu1 %v7646_v51  ;;  %5261 = vmatprep.subr.bf16.mxu0 %v7651_v53  ;;  %v7739_v51 = vld [vmem:[%s8788_s4 + $0xff0] ss:$20 sps:$4 sm:$0xff]   ;;  %v7747_v53 = vld [vmem:[%s8788_s4 + $0xfcc] ss:$20 sps:$4 sm:$0xff]  }
  0xee   : > { %5304 = vmatprep.subr.bf16.mxu1 %v7654_v54  ;;  %v7750_v54 = vld [vmem:[%s8788_s4 + $0x124c] ss:$20 sps:$4 sm:$0xff]  }
  0xf0   : > { %5262 = vmatpush1.bf16.msra.mxu0 %v7649_v55  ;;  %v7745_v55 = vld [vmem:[%s8788_s4 + $0xfc8] ss:$20 sps:$4 sm:$0xff]  }
  0xf1   : > { %5305 = vmatpush1.bf16.msra.mxu1 %v7652_v56  ;;  %5263 = vmatprep.subr.bf16.mxu0 %v7657_v57  ;;  %v7748_v56 = vld [vmem:[%s8788_s4 + $0x1248] ss:$20 sps:$4 sm:$0xff]   ;;  %v7753_v57 = vld [vmem:[%s8788_s4 + $0xfa4] ss:$20 sps:$4 sm:$0xff]  }
  0xf2   : > { %5306 = vmatprep.subr.bf16.mxu1 %v7660_v58  ;;  %v7756_v58 = vld [vmem:[%s8788_s4 + $0x1224] ss:$20 sps:$4 sm:$0xff]  }
  0xf4   : > { %5264 = vmatpush1.bf16.msra.mxu0 %v7655_v59  ;;  %v7751_v59 = vld [vmem:[%s8788_s4 + $0xfa0] ss:$20 sps:$4 sm:$0xff]  }
  0xf5   : > { %5307 = vmatpush1.bf16.msra.mxu1 %v7658_v60  ;;  %5265 = vmatprep.subr.bf16.mxu0 %v7663_v61  ;;  %v7754_v60 = vld [vmem:[%s8788_s4 + $0x1220] ss:$20 sps:$4 sm:$0xff]   ;;  %v7759_v61 = vld [vmem:[%s8788_s4 + $0xf7c] ss:$20 sps:$4 sm:$0xff]  }
  0xf6   : > { %5308 = vmatprep.subr.bf16.mxu1 %v7666_v62  ;;  %v7762_v62 = vld [vmem:[%s8788_s4 + $0x11fc] ss:$20 sps:$4 sm:$0xff]  }
  0xf8   : > { %5266 = vmatpush1.bf16.msra.mxu0 %v7661_v63  ;;  %v7757_v63 = vld [vmem:[%s8788_s4 + $0xf78] ss:$20 sps:$4 sm:$0xff]  }
  0xf9   : > { %5309 = vmatpush1.bf16.msra.mxu1 %v7664_v0  ;;  %5267 = vmatprep.subr.bf16.mxu0 %v7669_v1  ;;  %v7760_v0 = vld [vmem:[%s8788_s4 + $0x11f8] ss:$20 sps:$4 sm:$0xff]   ;;  %v7765_v1 = vld [vmem:[%s8788_s4 + $0xf54] ss:$20 sps:$4 sm:$0xff]  }
  0xfa   : > { %5310 = vmatprep.subr.bf16.mxu1 %v7672_v2  ;;  %v7768_v2 = vld [vmem:[%s8788_s4 + $0x11d4] ss:$20 sps:$4 sm:$0xff]  }
  0xfc   : > { %5268 = vmatpush1.bf16.msra.mxu0 %v7667_v3  ;;  %v7763_v3 = vld [vmem:[%s8788_s4 + $0xf50] ss:$20 sps:$4 sm:$0xff]  }
  0xfd   : > { %5311 = vmatpush1.bf16.msra.mxu1 %v7670_v4  ;;  %5269 = vmatprep.subr.bf16.mxu0 %v7675_v5  ;;  %v7766_v4 = vld [vmem:[%s8788_s4 + $0x11d0] ss:$20 sps:$4 sm:$0xff]   ;;  %v7771_v5 = vld [vmem:[%s8788_s4 + $0xf2c] ss:$20 sps:$4 sm:$0xff]  }
  0xfe   : > { %5312 = vmatprep.subr.bf16.mxu1 %v7678_v6  ;;  %v7774_v6 = vld [vmem:[%s8788_s4 + $0x11ac] ss:$20 sps:$4 sm:$0xff]  }
 0x100   : > { %5270 = vmatpush1.bf16.msra.mxu0 %v7673_v7  ;;  %v7769_v7 = vld [vmem:[%s8788_s4 + $0xf28] ss:$20 sps:$4 sm:$0xff]  }
 0x101   : > { %5313 = vmatpush1.bf16.msra.mxu1 %v7676_v8  ;;  %5271 = vmatprep.subr.bf16.mxu0 %v7681_v9  ;;  %v7772_v8 = vld [vmem:[%s8788_s4 + $0x11a8] ss:$20 sps:$4 sm:$0xff]   ;;  %v7777_v9 = vld [vmem:[%s8788_s4 + $0xf04] ss:$20 sps:$4 sm:$0xff]  }
 0x102   : > { %5314 = vmatprep.subr.bf16.mxu1 %v7684_v10  ;;  %v7780_v10 = vld [vmem:[%s8788_s4 + $0x1184] ss:$20 sps:$4 sm:$0xff]  }
 0x104   : > { %5272 = vmatpush2.bf16.msra.mxu0 %v7679_v11  ;;  %v7775_v11 = vld [vmem:[%s8788_s4 + $0xf00] ss:$20 sps:$4 sm:$0xff]  }
 0x105   : > { %5315 = vmatpush2.bf16.msra.mxu1 %v7682_v12  ;;  %5273 = vmatprep.subr.bf16.mxu0 %v7687_v13  ;;  %v7778_v12 = vld [vmem:[%s8788_s4 + $0x1180] ss:$20 sps:$4 sm:$0xff]   ;;  %v7783_v13 = vld [vmem:[%s8788_s4 + $0x115c] ss:$20 sps:$4 sm:$0xff]  }
 0x106   : > { %5316 = vmatprep.subr.bf16.mxu1 %v7690_v14  ;;  %v7786_v14 = vld [vmem:[%s8788_s4 + $0x13dc] ss:$20 sps:$4 sm:$0xff]  }
 0x108   : > { %5274 = vmatpush2.bf16.msra.mxu0 %v7685_v15  ;;  %v7781_v15 = vld [vmem:[%s8788_s4 + $0x1158] ss:$20 sps:$4 sm:$0xff]  }
 0x109   : > { %5317 = vmatpush2.bf16.msra.mxu1 %v7688_v16  ;;  %5275 = vmatprep.subr.bf16.mxu0 %v7693_v17  ;;  %v7784_v16 = vld [vmem:[%s8788_s4 + $0x13d8] ss:$20 sps:$4 sm:$0xff]   ;;  %v7789_v17 = vld [vmem:[%s8788_s4 + $0x1134] ss:$20 sps:$4 sm:$0xff]  }
 0x10a   : > { %5318 = vmatprep.subr.bf16.mxu1 %v7696_v18  ;;  %v7792_v18 = vld [vmem:[%s8788_s4 + $0x13b4] ss:$20 sps:$4 sm:$0xff]  }
 0x10c   : > { %5276 = vmatpush2.bf16.msra.mxu0 %v7691_v19  ;;  %v7787_v19 = vld [vmem:[%s8788_s4 + $0x1130] ss:$20 sps:$4 sm:$0xff]  }
 0x10d   : > { %5319 = vmatpush2.bf16.msra.mxu1 %v7694_v20  ;;  %5277 = vmatprep.subr.bf16.mxu0 %v7699_v21  ;;  %v7790_v20 = vld [vmem:[%s8788_s4 + $0x13b0] ss:$20 sps:$4 sm:$0xff]   ;;  %v7795_v21 = vld [vmem:[%s8788_s4 + $0x110c] ss:$20 sps:$4 sm:$0xff]  }
 0x10e   : > { %5320 = vmatprep.subr.bf16.mxu1 %v7702_v22  ;;  %v7798_v22 = vld [vmem:[%s8788_s4 + $0x138c] ss:$20 sps:$4 sm:$0xff]  }
 0x110   : > { %5278 = vmatpush2.bf16.msra.mxu0 %v7697_v23  ;;  %v7793_v23 = vld [vmem:[%s8788_s4 + $0x1108] ss:$20 sps:$4 sm:$0xff]  }
 0x111   : > { %5321 = vmatpush2.bf16.msra.mxu1 %v7700_v24  ;;  %5279 = vmatprep.subr.bf16.mxu0 %v7705_v25  ;;  %v7796_v24 = vld [vmem:[%s8788_s4 + $0x1388] ss:$20 sps:$4 sm:$0xff]   ;;  %v7801_v25 = vld [vmem:[%s8788_s4 + $0x10e4] ss:$20 sps:$4 sm:$0xff]  }
 0x112   : > { %5322 = vmatprep.subr.bf16.mxu1 %v7708_v26  ;;  %v7804_v26 = vld [vmem:[%s8788_s4 + $0x1364] ss:$20 sps:$4 sm:$0xff]  }
 0x114   : > { %5280 = vmatpush2.bf16.msra.mxu0 %v7703_v27  ;;  %v7799_v27 = vld [vmem:[%s8788_s4 + $0x10e0] ss:$20 sps:$4 sm:$0xff]  }
 0x115   : > { %5323 = vmatpush2.bf16.msra.mxu1 %v7706_v28  ;;  %5281 = vmatprep.subr.bf16.mxu0 %v7711_v29  ;;  %v7802_v28 = vld [vmem:[%s8788_s4 + $0x1360] ss:$20 sps:$4 sm:$0xff]   ;;  %v7807_v29 = vld [vmem:[%s8788_s4 + $0x10bc] ss:$20 sps:$4 sm:$0xff]  }
 0x116   : > { %5324 = vmatprep.subr.bf16.mxu1 %v7714_v30  ;;  %v7810_v30 = vld [vmem:[%s8788_s4 + $0x133c] ss:$20 sps:$4 sm:$0xff]  }
 0x118   : > { %5282 = vmatpush2.bf16.msra.mxu0 %v7709_v31  ;;  %v7805_v31 = vld [vmem:[%s8788_s4 + $0x10b8] ss:$20 sps:$4 sm:$0xff]  }
 0x119   : > { %5325 = vmatpush2.bf16.msra.mxu1 %v7712_v32  ;;  %5283 = vmatprep.subr.bf16.mxu0 %v7717_v33  ;;  %v7808_v32 = vld [vmem:[%s8788_s4 + $0x1338] ss:$20 sps:$4 sm:$0xff]   ;;  %v7813_v33 = vld [vmem:[%s8788_s4 + $0x1094] ss:$20 sps:$4 sm:$0xff]  }
 0x11a   : > { %5326 = vmatprep.subr.bf16.mxu1 %v7720_v34  ;;  %v7816_v34 = vld [vmem:[%s8788_s4 + $0x1314] ss:$20 sps:$4 sm:$0xff]  }
 0x11c   : > { %5284 = vmatpush2.bf16.msra.mxu0 %v7715_v35  ;;  %v7811_v35 = vld [vmem:[%s8788_s4 + $0x1090] ss:$20 sps:$4 sm:$0xff]  }
 0x11d   : > { %5327 = vmatpush2.bf16.msra.mxu1 %v7718_v36  ;;  %5285 = vmatprep.subr.bf16.mxu0 %v7723_v37  ;;  %v7814_v36 = vld [vmem:[%s8788_s4 + $0x1310] ss:$20 sps:$4 sm:$0xff]   ;;  %v7819_v37 = vld [vmem:[%s8788_s4 + $0x106c] ss:$20 sps:$4 sm:$0xff]  }
 0x11e   : > { %5328 = vmatprep.subr.bf16.mxu1 %v7726_v38  ;;  %v7822_v38 = vld [vmem:[%s8788_s4 + $0x12ec] ss:$20 sps:$4 sm:$0xff]  }
 0x120   : > { %5286 = vmatpush2.bf16.msra.mxu0 %v7721_v39  ;;  %v7817_v39 = vld [vmem:[%s8788_s4 + $0x1068] ss:$20 sps:$4 sm:$0xff]  }
 0x121   : > { %5329 = vmatpush2.bf16.msra.mxu1 %v7724_v40  ;;  %5341 = vmatprep.subr.bf16.mxu0 %v7735_v41  ;;  %v7820_v40 = vld [vmem:[%s8788_s4 + $0x12e8] ss:$20 sps:$4 sm:$0xff]   ;;  %v7825_v41 = vld [vmem:[%s8788_s4 + $0x1044] ss:$20 sps:$4 sm:$0xff]  }
 0x122   : > { %5384 = vmatprep.subr.bf16.mxu1 %v7738_v42  ;;  %v7828_v42 = vld [vmem:[%s8788_s4 + $0x12c4] ss:$20 sps:$4 sm:$0xff]  }
 0x123   : > { %5288 = vmatmul.mubr.bf16.vlgmr.msra.gmra.mxu0 %v7727_v43  ;;  %v7823_v43 = vld [vmem:[%s8788_s4 + $0x1040] ss:$20 sps:$4 sm:$0xff]  }
 0x124   : > { %5331 = vmatmul.mubr.bf16.vlgmr.msra.gmra.mxu1 %v7730_v44  ;;  %5342 = vmatpush1.bf16.msra.mxu0 %v7733_v45  ;;  %v7826_v44 = vld [vmem:[%s8788_s4 + $0x12c0] ss:$20 sps:$4 sm:$0xff]   ;;  %v7837_v45 = vld [vmem:[%s8788_s4 + $0x151c] ss:$20 sps:$4 sm:$0xff]  }
 0x125   : > { %5385 = vmatpush1.bf16.msra.mxu1 %v7736_v46  ;;  %5343 = vmatprep.subr.bf16.mxu0 %v7741_v47  ;;  %v7840_v46 = vld [vmem:[%s8788_s4 + $0x124] ss:$20 sps:$4 sm:$0xff]  }
 0x126   : > { %5386 = vmatprep.subr.bf16.mxu1 %v7744_v48  ;;  %5373 = vmatprep.mubr.bf16.mxu0 %v7831_v49  ;;  %v7829_v47 = vld [vmem:[%s8786_s28 + $0x30] ss:$72 sps:$4 sm:$0xff]  }
 0x127   : > { %5416 = vmatprep.mubr.bf16.mxu1 %v7834_v50  ;;  %v7832_v48 = vld [vmem:[%s8786_s28 + $0x38] ss:$72 sps:$4 sm:$0xff]  }
 0x128   : > { %5344 = vmatpush1.bf16.msra.mxu0 %v7739_v51  ;;  %v7835_v49 = vld [vmem:[%s8788_s4 + $0x1518] ss:$20 sps:$4 sm:$0xff]   ;;  %v7838_v50 = vld [vmem:[%s8788_s4 + $0x120] ss:$20 sps:$4 sm:$0xff]  }
 0x129   : > { %5387 = vmatpush1.bf16.msra.mxu1 %v7742_v52  ;;  %5345 = vmatprep.subr.bf16.mxu0 %v7747_v53  ;;  %v7843_v51 = vld [vmem:[%s8788_s4 + $0x14f4] ss:$20 sps:$4 sm:$0xff]   ;;  %v7846_v52 = vld [vmem:[%s8788_s4 + $0xfc] ss:$20 sps:$4 sm:$0xff]  }
 0x12a   : > { %5388 = vmatprep.subr.bf16.mxu1 %v7750_v54  ;;  %v7933_v53 = vld [vmem:[%s8786_s28 + $0x44] ss:$72 sps:$4 sm:$0xff]  }
 0x12b   : > { %v7841_v54 = vld [vmem:[%s8788_s4 + $0x14f0] ss:$20 sps:$4 sm:$0xff]  }
 0x12c   : > { %5346 = vmatpush1.bf16.msra.mxu0 %v7745_v55  ;;  %v7844_v55 = vld [vmem:[%s8788_s4 + $0xf8] ss:$20 sps:$4 sm:$0xff]  }
 0x12d   : > { %5389 = vmatpush1.bf16.msra.mxu1 %v7748_v56  ;;  %5347 = vmatprep.subr.bf16.mxu0 %v7753_v57  ;;  %v7849_v56 = vld [vmem:[%s8788_s4 + $0x14cc] ss:$20 sps:$4 sm:$0xff]   ;;  %v7852_v57 = vld [vmem:[%s8788_s4 + $0xd4] ss:$20 sps:$4 sm:$0xff]  }
 0x12e   : > { %5390 = vmatprep.subr.bf16.mxu1 %v7756_v58  ;;  %v8462_v58 = vld [vmem:[%s8786_s28 + $0x4] ss:$72 sps:$4 sm:$0xff]  }
 0x130   : > { %5348 = vmatpush1.bf16.msra.mxu0 %v7751_v59  ;;  %v7847_v59 = vld [vmem:[%s8788_s4 + $0x14c8] ss:$20 sps:$4 sm:$0xff]  }
 0x131   : > { %5391 = vmatpush1.bf16.msra.mxu1 %v7754_v60  ;;  %5349 = vmatprep.subr.bf16.mxu0 %v7759_v61  ;;  %v7850_v60 = vld [vmem:[%s8788_s4 + $0xd0] ss:$20 sps:$4 sm:$0xff]  }
 0x132   : > { %5392 = vmatprep.subr.bf16.mxu1 %v7762_v62  ;;  %v7855_v61 = vld [vmem:[%s8788_s4 + $0x14a4] ss:$20 sps:$4 sm:$0xff]   ;;  %v7858_v62 = vld [vmem:[%s8788_s4 + $0xac] ss:$20 sps:$4 sm:$0xff]  }
 0x134   : > { %5350 = vmatpush1.bf16.msra.mxu0 %v7757_v63  ;;  %v7853_v63 = vld [vmem:[%s8788_s4 + $0x14a0] ss:$20 sps:$4 sm:$0xff]  }
 0x135   : > { %5393 = vmatpush1.bf16.msra.mxu1 %v7760_v0  ;;  %5351 = vmatprep.subr.bf16.mxu0 %v7765_v1  ;;  %v7856_v0 = vld [vmem:[%s8788_s4 + $0xa8] ss:$20 sps:$4 sm:$0xff]  }
 0x136   : > { %5394 = vmatprep.subr.bf16.mxu1 %v7768_v2  ;;  %v7861_v1 = vld [vmem:[%s8788_s4 + $0x147c] ss:$20 sps:$4 sm:$0xff]   ;;  %v7864_v2 = vld [vmem:[%s8788_s4 + $0x84] ss:$20 sps:$4 sm:$0xff]  }
 0x138   : > { %5352 = vmatpush1.bf16.msra.mxu0 %v7763_v3  ;;  %v7859_v3 = vld [vmem:[%s8788_s4 + $0x1478] ss:$20 sps:$4 sm:$0xff]  }
 0x139   : > { %5395 = vmatpush1.bf16.msra.mxu1 %v7766_v4  ;;  %5353 = vmatprep.subr.bf16.mxu0 %v7771_v5  ;;  %v7862_v4 = vld [vmem:[%s8788_s4 + $0x80] ss:$20 sps:$4 sm:$0xff]  }
 0x13a   : > { %5396 = vmatprep.subr.bf16.mxu1 %v7774_v6  ;;  %v7867_v5 = vld [vmem:[%s8788_s4 + $0x1454] ss:$20 sps:$4 sm:$0xff]   ;;  %v7870_v6 = vld [vmem:[%s8788_s4 + $0x5c] ss:$20 sps:$4 sm:$0xff]  }
 0x13c   : > { %5354 = vmatpush1.bf16.msra.mxu0 %v7769_v7  ;;  %v7865_v7 = vld [vmem:[%s8788_s4 + $0x1450] ss:$20 sps:$4 sm:$0xff]  }
 0x13d   : > { %5397 = vmatpush1.bf16.msra.mxu1 %v7772_v8  ;;  %5355 = vmatprep.subr.bf16.mxu0 %v7777_v9  ;;  %v7868_v8 = vld [vmem:[%s8788_s4 + $0x58] ss:$20 sps:$4 sm:$0xff]  }
 0x13e   : > { %5398 = vmatprep.subr.bf16.mxu1 %v7780_v10  ;;  %v7873_v9 = vld [vmem:[%s8788_s4 + $0x142c] ss:$20 sps:$4 sm:$0xff]   ;;  %v7876_v10 = vld [vmem:[%s8788_s4 + $0x34] ss:$20 sps:$4 sm:$0xff]  }
 0x140   : > { %5356 = vmatpush1.bf16.msra.mxu0 %v7775_v11  ;;  %v7871_v11 = vld [vmem:[%s8788_s4 + $0x1428] ss:$20 sps:$4 sm:$0xff]  }
 0x141   : > { %5399 = vmatpush1.bf16.msra.mxu1 %v7778_v12  ;;  %5357 = vmatprep.subr.bf16.mxu0 %v7783_v13  ;;  %v7874_v12 = vld [vmem:[%s8788_s4 + $0x30] ss:$20 sps:$4 sm:$0xff]  }
 0x142   : > { %5400 = vmatprep.subr.bf16.mxu1 %v7786_v14  ;;  %v7879_v13 = vld [vmem:[%s8788_s4 + $0x1404] ss:$20 sps:$4 sm:$0xff]   ;;  %v7882_v14 = vld [vmem:[%s8788_s4 + $0xc] ss:$20 sps:$4 sm:$0xff]  }
 0x144   : > { %5358 = vmatpush2.bf16.msra.mxu0 %v7781_v15  ;;  %v7877_v15 = vld [vmem:[%s8788_s4 + $0x1400] ss:$20 sps:$4 sm:$0xff]  }
 0x145   : > { %5401 = vmatpush2.bf16.msra.mxu1 %v7784_v16  ;;  %5359 = vmatprep.subr.bf16.mxu0 %v7789_v17  ;;  %v7880_v16 = vld [vmem:[%s8788_s4 + $0x8] ss:$20 sps:$4 sm:$0xff]  }
 0x146   : > { %5402 = vmatprep.subr.bf16.mxu1 %v7792_v18  ;;  %v7885_v17 = vld [vmem:[%s8788_s4 + $0x165c] ss:$20 sps:$4 sm:$0xff]   ;;  %v7888_v18 = vld [vmem:[%s8788_s4 + $0x264] ss:$20 sps:$4 sm:$0xff]  }
 0x148   : > { %5360 = vmatpush2.bf16.msra.mxu0 %v7787_v19  ;;  %v7883_v19 = vld [vmem:[%s8788_s4 + $0x1658] ss:$20 sps:$4 sm:$0xff]  }
 0x149   : > { %5403 = vmatpush2.bf16.msra.mxu1 %v7790_v20  ;;  %5361 = vmatprep.subr.bf16.mxu0 %v7795_v21  ;;  %v7886_v20 = vld [vmem:[%s8788_s4 + $0x260] ss:$20 sps:$4 sm:$0xff]  }
 0x14a   : > { %5404 = vmatprep.subr.bf16.mxu1 %v7798_v22  ;;  %v7891_v21 = vld [vmem:[%s8788_s4 + $0x1634] ss:$20 sps:$4 sm:$0xff]   ;;  %v7894_v22 = vld [vmem:[%s8788_s4 + $0x23c] ss:$20 sps:$4 sm:$0xff]  }
 0x14c   : > { %5362 = vmatpush2.bf16.msra.mxu0 %v7793_v23  ;;  %v7889_v23 = vld [vmem:[%s8788_s4 + $0x1630] ss:$20 sps:$4 sm:$0xff]  }
 0x14d   : > { %5405 = vmatpush2.bf16.msra.mxu1 %v7796_v24  ;;  %5363 = vmatprep.subr.bf16.mxu0 %v7801_v25  ;;  %v7892_v24 = vld [vmem:[%s8788_s4 + $0x238] ss:$20 sps:$4 sm:$0xff]  }
 0x14e   : > { %5406 = vmatprep.subr.bf16.mxu1 %v7804_v26  ;;  %v7897_v25 = vld [vmem:[%s8788_s4 + $0x160c] ss:$20 sps:$4 sm:$0xff]   ;;  %v7900_v26 = vld [vmem:[%s8788_s4 + $0x214] ss:$20 sps:$4 sm:$0xff]  }
 0x150   : > { %5364 = vmatpush2.bf16.msra.mxu0 %v7799_v27  ;;  %v7895_v27 = vld [vmem:[%s8788_s4 + $0x1608] ss:$20 sps:$4 sm:$0xff]  }
 0x151   : > { %5407 = vmatpush2.bf16.msra.mxu1 %v7802_v28  ;;  %5365 = vmatprep.subr.bf16.mxu0 %v7807_v29  ;;  %v7898_v28 = vld [vmem:[%s8788_s4 + $0x210] ss:$20 sps:$4 sm:$0xff]  }
 0x152   : > { %5408 = vmatprep.subr.bf16.mxu1 %v7810_v30  ;;  %v7903_v29 = vld [vmem:[%s8788_s4 + $0x15e4] ss:$20 sps:$4 sm:$0xff]   ;;  %v7906_v30 = vld [vmem:[%s8788_s4 + $0x1ec] ss:$20 sps:$4 sm:$0xff]  }
 0x154   : > { %5366 = vmatpush2.bf16.msra.mxu0 %v7805_v31  ;;  %v7901_v31 = vld [vmem:[%s8788_s4 + $0x15e0] ss:$20 sps:$4 sm:$0xff]  }
 0x155   : > { %5409 = vmatpush2.bf16.msra.mxu1 %v7808_v32  ;;  %5367 = vmatprep.subr.bf16.mxu0 %v7813_v33  ;;  %v7904_v32 = vld [vmem:[%s8788_s4 + $0x1e8] ss:$20 sps:$4 sm:$0xff]  }
 0x156   : > { %5410 = vmatprep.subr.bf16.mxu1 %v7816_v34  ;;  %v7909_v33 = vld [vmem:[%s8788_s4 + $0x15bc] ss:$20 sps:$4 sm:$0xff]   ;;  %v7912_v34 = vld [vmem:[%s8788_s4 + $0x1c4] ss:$20 sps:$4 sm:$0xff]  }
 0x158   : > { %5368 = vmatpush2.bf16.msra.mxu0 %v7811_v35  ;;  %v7907_v35 = vld [vmem:[%s8788_s4 + $0x15b8] ss:$20 sps:$4 sm:$0xff]  }
 0x159   : > { %5411 = vmatpush2.bf16.msra.mxu1 %v7814_v36  ;;  %5369 = vmatprep.subr.bf16.mxu0 %v7819_v37  ;;  %v7910_v36 = vld [vmem:[%s8788_s4 + $0x1c0] ss:$20 sps:$4 sm:$0xff]  }
 0x15a   : > { %5412 = vmatprep.subr.bf16.mxu1 %v7822_v38  ;;  %v7915_v37 = vld [vmem:[%s8788_s4 + $0x1594] ss:$20 sps:$4 sm:$0xff]   ;;  %v7918_v38 = vld [vmem:[%s8788_s4 + $0x19c] ss:$20 sps:$4 sm:$0xff]  }
 0x15c   : > { %5370 = vmatpush2.bf16.msra.mxu0 %v7817_v39  ;;  %v7913_v39 = vld [vmem:[%s8788_s4 + $0x1590] ss:$20 sps:$4 sm:$0xff]  }
 0x15d   : > { %5413 = vmatpush2.bf16.msra.mxu1 %v7820_v40  ;;  %5371 = vmatprep.subr.bf16.mxu0 %v7825_v41  ;;  %v7916_v40 = vld [vmem:[%s8788_s4 + $0x198] ss:$20 sps:$4 sm:$0xff]  }
 0x15e   : > { %5414 = vmatprep.subr.bf16.mxu1 %v7828_v42  ;;  %v7921_v41 = vld [vmem:[%s8788_s4 + $0x156c] ss:$20 sps:$4 sm:$0xff]   ;;  %v7924_v42 = vld [vmem:[%s8788_s4 + $0x174] ss:$20 sps:$4 sm:$0xff]  }
 0x160   : > { %5372 = vmatpush2.bf16.msra.mxu0 %v7823_v43  ;;  %v7919_v43 = vld [vmem:[%s8788_s4 + $0x1568] ss:$20 sps:$4 sm:$0xff]  }
 0x161   : > { %5415 = vmatpush2.bf16.msra.mxu1 %v7826_v44  ;;  %5427 = vmatprep.subr.bf16.mxu0 %v7837_v45  ;;  %v7922_v44 = vld [vmem:[%s8788_s4 + $0x170] ss:$20 sps:$4 sm:$0xff]  }
 0x162   : > { %5470 = vmatprep.subr.bf16.mxu1 %v7840_v46  ;;  %v7927_v45 = vld [vmem:[%s8788_s4 + $0x1544] ss:$20 sps:$4 sm:$0xff]   ;;  %v7930_v46 = vld [vmem:[%s8788_s4 + $0x14c] ss:$20 sps:$4 sm:$0xff]  }
 0x163   : > { %5374 = vmatmul.mubr.bf16.vlgmr.msra.gmra.mxu0 %v7829_v47  ;;  %v7925_v47 = vld [vmem:[%s8788_s4 + $0x1540] ss:$20 sps:$4 sm:$0xff]  }
 0x164   : > { %5417 = vmatmul.mubr.bf16.vlgmr.msra.gmra.mxu1 %v7832_v48  ;;  %5428 = vmatpush1.bf16.msra.mxu0 %v7835_v49  ;;  %v7928_v48 = vld [vmem:[%s8788_s4 + $0x148] ss:$20 sps:$4 sm:$0xff]  }
 0x165   : > { %5471 = vmatpush1.bf16.msra.mxu1 %v7838_v50  ;;  %5429 = vmatprep.subr.bf16.mxu0 %v7843_v51  ;;  %v7931_v49 = vld [vmem:[%s8786_s28 + $0x40] ss:$72 sps:$4 sm:$0xff]  }
 0x166   : > { %5472 = vmatprep.subr.bf16.mxu1 %v7846_v52  ;;  %5459 = vmatprep.mubr.bf16.mxu0 %v7933_v53  ;;  %v7936_v50 = vld [vmem:[%s8788_s4 + $0x3a4] ss:$20 sps:$4 sm:$0xff]   ;;  %v7934_v52 = vld [vmem:[%s8788_s4 + $0x3a0] ss:$20 sps:$4 sm:$0xff]  }
 0x167   : > { %5502 = vmatprep.mubr.bf16.mxu1 %v8462_v58  ;;  %v7939_v51 = vld [vmem:[%s8788_s4 + $0x624] ss:$20 sps:$4 sm:$0xff]   ;;  %v7937_v53 = vld [vmem:[%s8788_s4 + $0x620] ss:$20 sps:$4 sm:$0xff]  }
 0x168   : > { %5430 = vmatpush1.bf16.msra.mxu0 %v7841_v54  ;;  %v7942_v54 = vld [vmem:[%s8788_s4 + $0x37c] ss:$20 sps:$4 sm:$0xff]  }
 0x169   : > { %5473 = vmatpush1.bf16.msra.mxu1 %v7844_v55  ;;  %5431 = vmatprep.subr.bf16.mxu0 %v7849_v56  ;;  %v7945_v55 = vld [vmem:[%s8788_s4 + $0x5fc] ss:$20 sps:$4 sm:$0xff]   ;;  %v7940_v56 = vld [vmem:[%s8788_s4 + $0x378] ss:$20 sps:$4 sm:$0xff]  }
 0x16a   : > { %5474 = vmatprep.subr.bf16.mxu1 %v7852_v57  ;;  %v7943_v57 = vld [vmem:[%s8788_s4 + $0x5f8] ss:$20 sps:$4 sm:$0xff]  }
 0x16b   : > { %v8463_v58 = vld [vmem:[%s8786_s28] ss:$72 sps:$4 sm:$0xff]  }
 0x16c   : > { %5432 = vmatpush1.bf16.msra.mxu0 %v7847_v59  ;;  %v7948_v59 = vld [vmem:[%s8788_s4 + $0x354] ss:$20 sps:$4 sm:$0xff]  }
 0x16d   : > { %5475 = vmatpush1.bf16.msra.mxu1 %v7850_v60  ;;  %5433 = vmatprep.subr.bf16.mxu0 %v7855_v61  ;;  %v7951_v60 = vld [vmem:[%s8788_s4 + $0x5d4] ss:$20 sps:$4 sm:$0xff]   ;;  %v7946_v61 = vld [vmem:[%s8788_s4 + $0x350] ss:$20 sps:$4 sm:$0xff]  }
 0x16e   : > { %5476 = vmatprep.subr.bf16.mxu1 %v7858_v62  ;;  %v7949_v62 = vld [vmem:[%s8788_s4 + $0x5d0] ss:$20 sps:$4 sm:$0xff]  }
 0x170   : > { %5434 = vmatpush1.bf16.msra.mxu0 %v7853_v63  ;;  %v8464_v63 = vld [vmem:[%s8786_s28 + $0xc] ss:$72 sps:$4 sm:$0xff]  }
 0x171   : > { %5477 = vmatpush1.bf16.msra.mxu1 %v7856_v0  ;;  %5435 = vmatprep.subr.bf16.mxu0 %v7861_v1  ;;  %v8465_v0 = vld [vmem:[%s8786_s28 + $0x14] ss:$72 sps:$4 sm:$0xff]  }
 0x172   : > { %5478 = vmatprep.subr.bf16.mxu1 %v7864_v2  ;;  %v7954_v1 = vld [vmem:[%s8788_s4 + $0x32c] ss:$20 sps:$4 sm:$0xff]  }
 0x173   : > { %v7957_v2 = vld [vmem:[%s8788_s4 + $0x5ac] ss:$20 sps:$4 sm:$0xff]  }
 0x174   : > { %5436 = vmatpush1.bf16.msra.mxu0 %v7859_v3  ;;  %v7952_v3 = vld [vmem:[%s8788_s4 + $0x328] ss:$20 sps:$4 sm:$0xff]  }
 0x175   : > { %5479 = vmatpush1.bf16.msra.mxu1 %v7862_v4  ;;  %5437 = vmatprep.subr.bf16.mxu0 %v7867_v5  ;;  %v7955_v4 = vld [vmem:[%s8788_s4 + $0x5a8] ss:$20 sps:$4 sm:$0xff]   ;;  %v7960_v5 = vld [vmem:[%s8788_s4 + $0x304] ss:$20 sps:$4 sm:$0xff]  }
 0x176   : > { %5480 = vmatprep.subr.bf16.mxu1 %v7870_v6  ;;  %v7963_v6 = vld [vmem:[%s8788_s4 + $0x584] ss:$20 sps:$4 sm:$0xff]  }
 0x178   : > { %5438 = vmatpush1.bf16.msra.mxu0 %v7865_v7  ;;  %v7958_v7 = vld [vmem:[%s8788_s4 + $0x300] ss:$20 sps:$4 sm:$0xff]  }
 0x179   : > { %5481 = vmatpush1.bf16.msra.mxu1 %v7868_v8  ;;  %5439 = vmatprep.subr.bf16.mxu0 %v7873_v9  ;;  %v7961_v8 = vld [vmem:[%s8788_s4 + $0x580] ss:$20 sps:$4 sm:$0xff]   ;;  %v7966_v9 = vld [vmem:[%s8788_s4 + $0x2dc] ss:$20 sps:$4 sm:$0xff]  }
 0x17a   : > { %5482 = vmatprep.subr.bf16.mxu1 %v7876_v10  ;;  %v7969_v10 = vld [vmem:[%s8788_s4 + $0x55c] ss:$20 sps:$4 sm:$0xff]  }
 0x17c   : > { %5440 = vmatpush1.bf16.msra.mxu0 %v7871_v11  ;;  %v7964_v11 = vld [vmem:[%s8788_s4 + $0x2d8] ss:$20 sps:$4 sm:$0xff]  }
 0x17d   : > { %5483 = vmatpush1.bf16.msra.mxu1 %v7874_v12  ;;  %5441 = vmatprep.subr.bf16.mxu0 %v7879_v13  ;;  %v7967_v12 = vld [vmem:[%s8788_s4 + $0x558] ss:$20 sps:$4 sm:$0xff]   ;;  %v7972_v13 = vld [vmem:[%s8788_s4 + $0x2b4] ss:$20 sps:$4 sm:$0xff]  }
 0x17e   : > { %5484 = vmatprep.subr.bf16.mxu1 %v7882_v14  ;;  %v7975_v14 = vld [vmem:[%s8788_s4 + $0x534] ss:$20 sps:$4 sm:$0xff]  }
 0x180   : > { %5442 = vmatpush1.bf16.msra.mxu0 %v7877_v15  ;;  %v7970_v15 = vld [vmem:[%s8788_s4 + $0x2b0] ss:$20 sps:$4 sm:$0xff]  }
 0x181   : > { %5485 = vmatpush1.bf16.msra.mxu1 %v7880_v16  ;;  %5443 = vmatprep.subr.bf16.mxu0 %v7885_v17  ;;  %v7973_v16 = vld [vmem:[%s8788_s4 + $0x530] ss:$20 sps:$4 sm:$0xff]   ;;  %v7978_v17 = vld [vmem:[%s8788_s4 + $0x28c] ss:$20 sps:$4 sm:$0xff]  }
 0x182   : > { %5486 = vmatprep.subr.bf16.mxu1 %v7888_v18  ;;  %v7981_v18 = vld [vmem:[%s8788_s4 + $0x50c] ss:$20 sps:$4 sm:$0xff]  }
 0x184   : > { %5444 = vmatpush2.bf16.msra.mxu0 %v7883_v19  ;;  %v7976_v19 = vld [vmem:[%s8788_s4 + $0x288] ss:$20 sps:$4 sm:$0xff]  }
 0x185   : > { %5487 = vmatpush2.bf16.msra.mxu1 %v7886_v20  ;;  %5445 = vmatprep.subr.bf16.mxu0 %v7891_v21  ;;  %v7979_v20 = vld [vmem:[%s8788_s4 + $0x508] ss:$20 sps:$4 sm:$0xff]   ;;  %v7984_v21 = vld [vmem:[%s8788_s4 + $0x4e4] ss:$20 sps:$4 sm:$0xff]  }
 0x186   : > { %5488 = vmatprep.subr.bf16.mxu1 %v7894_v22  ;;  %v7987_v22 = vld [vmem:[%s8788_s4 + $0x764] ss:$20 sps:$4 sm:$0xff]  }
 0x188   : > { %5446 = vmatpush2.bf16.msra.mxu0 %v7889_v23  ;;  %v7982_v23 = vld [vmem:[%s8788_s4 + $0x4e0] ss:$20 sps:$4 sm:$0xff]  }
 0x189   : > { %5489 = vmatpush2.bf16.msra.mxu1 %v7892_v24  ;;  %5447 = vmatprep.subr.bf16.mxu0 %v7897_v25  ;;  %v7985_v24 = vld [vmem:[%s8788_s4 + $0x760] ss:$20 sps:$4 sm:$0xff]   ;;  %v7990_v25 = vld [vmem:[%s8788_s4 + $0x4bc] ss:$20 sps:$4 sm:$0xff]  }
 0x18a   : > { %5490 = vmatprep.subr.bf16.mxu1 %v7900_v26  ;;  %v7993_v26 = vld [vmem:[%s8788_s4 + $0x73c] ss:$20 sps:$4 sm:$0xff]  }
 0x18c   : > { %5448 = vmatpush2.bf16.msra.mxu0 %v7895_v27  ;;  %v7988_v27 = vld [vmem:[%s8788_s4 + $0x4b8] ss:$20 sps:$4 sm:$0xff]  }
 0x18d   : > { %5491 = vmatpush2.bf16.msra.mxu1 %v7898_v28  ;;  %5449 = vmatprep.subr.bf16.mxu0 %v7903_v29  ;;  %v7991_v28 = vld [vmem:[%s8788_s4 + $0x738] ss:$20 sps:$4 sm:$0xff]   ;;  %v7996_v29 = vld [vmem:[%s8788_s4 + $0x494] ss:$20 sps:$4 sm:$0xff]  }
 0x18e   : > { %5492 = vmatprep.subr.bf16.mxu1 %v7906_v30  ;;  %v7999_v30 = vld [vmem:[%s8788_s4 + $0x714] ss:$20 sps:$4 sm:$0xff]  }
 0x190   : > { %5450 = vmatpush2.bf16.msra.mxu0 %v7901_v31  ;;  %v7994_v31 = vld [vmem:[%s8788_s4 + $0x490] ss:$20 sps:$4 sm:$0xff]  }
 0x191   : > { %5493 = vmatpush2.bf16.msra.mxu1 %v7904_v32  ;;  %5451 = vmatprep.subr.bf16.mxu0 %v7909_v33  ;;  %v7997_v32 = vld [vmem:[%s8788_s4 + $0x710] ss:$20 sps:$4 sm:$0xff]   ;;  %v8002_v33 = vld [vmem:[%s8788_s4 + $0x46c] ss:$20 sps:$4 sm:$0xff]  }
 0x192   : > { %5494 = vmatprep.subr.bf16.mxu1 %v7912_v34  ;;  %v8005_v34 = vld [vmem:[%s8788_s4 + $0x6ec] ss:$20 sps:$4 sm:$0xff]  }
 0x194   : > { %5452 = vmatpush2.bf16.msra.mxu0 %v7907_v35  ;;  %v8000_v35 = vld [vmem:[%s8788_s4 + $0x468] ss:$20 sps:$4 sm:$0xff]  }
 0x195   : > { %5495 = vmatpush2.bf16.msra.mxu1 %v7910_v36  ;;  %5453 = vmatprep.subr.bf16.mxu0 %v7915_v37  ;;  %v8003_v36 = vld [vmem:[%s8788_s4 + $0x6e8] ss:$20 sps:$4 sm:$0xff]   ;;  %v8008_v37 = vld [vmem:[%s8788_s4 + $0x444] ss:$20 sps:$4 sm:$0xff]  }
 0x196   : > { %5496 = vmatprep.subr.bf16.mxu1 %v7918_v38  ;;  %v8011_v38 = vld [vmem:[%s8788_s4 + $0x6c4] ss:$20 sps:$4 sm:$0xff]  }
 0x198   : > { %5454 = vmatpush2.bf16.msra.mxu0 %v7913_v39  ;;  %v8006_v39 = vld [vmem:[%s8788_s4 + $0x440] ss:$20 sps:$4 sm:$0xff]  }
 0x199   : > { %5497 = vmatpush2.bf16.msra.mxu1 %v7916_v40  ;;  %5455 = vmatprep.subr.bf16.mxu0 %v7921_v41  ;;  %v8009_v40 = vld [vmem:[%s8788_s4 + $0x6c0] ss:$20 sps:$4 sm:$0xff]   ;;  %v8014_v41 = vld [vmem:[%s8788_s4 + $0x41c] ss:$20 sps:$4 sm:$0xff]  }
 0x19a   : > { %5498 = vmatprep.subr.bf16.mxu1 %v7924_v42  ;;  %v8017_v42 = vld [vmem:[%s8788_s4 + $0x69c] ss:$20 sps:$4 sm:$0xff]  }
 0x19c   : > { %5456 = vmatpush2.bf16.msra.mxu0 %v7919_v43  ;;  %v8012_v43 = vld [vmem:[%s8788_s4 + $0x418] ss:$20 sps:$4 sm:$0xff]  }
 0x19d   : > { %5499 = vmatpush2.bf16.msra.mxu1 %v7922_v44  ;;  %5457 = vmatprep.subr.bf16.mxu0 %v7927_v45  ;;  %v8015_v44 = vld [vmem:[%s8788_s4 + $0x698] ss:$20 sps:$4 sm:$0xff]   ;;  %v8020_v45 = vld [vmem:[%s8788_s4 + $0x3f4] ss:$20 sps:$4 sm:$0xff]  }
 0x19e   : > { %5500 = vmatprep.subr.bf16.mxu1 %v7930_v46  ;;  %v8023_v46 = vld [vmem:[%s8788_s4 + $0x674] ss:$20 sps:$4 sm:$0xff]  }
 0x1a0   : > { %5458 = vmatpush2.bf16.msra.mxu0 %v7925_v47  ;;  %v8018_v47 = vld [vmem:[%s8788_s4 + $0x3f0] ss:$20 sps:$4 sm:$0xff]  }
 0x1a1   : > { %5501 = vmatpush2.bf16.msra.mxu1 %v7928_v48  ;;  %5513 = vmatprep.subr.bf16.mxu0 %v7936_v50  ;;  %v8021_v48 = vld [vmem:[%s8788_s4 + $0x670] ss:$20 sps:$4 sm:$0xff]   ;;  %v8029_v50 = vld [vmem:[%s8788_s4 + $0x64c] ss:$20 sps:$4 sm:$0xff]  }
 0x1a2   : > { %5556 = vmatprep.subr.bf16.mxu1 %v7939_v51  ;;  %v8024_v51 = vld [vmem:[%s8788_s4 + $0x3c8] ss:$20 sps:$4 sm:$0xff]  }
 0x1a3   : > { %5460 = vmatmul.mubr.bf16.vlgmr.msra.gmra.mxu0 %v7931_v49  ;;  %v8026_v49 = vld [vmem:[%s8788_s4 + $0x3cc] ss:$20 sps:$4 sm:$0xff]  }
 0x1a4   : > { %5503 = vmatmul.mubr.bf16.vlgmr.msra.gmra.mxu1 %v8463_v58  ;;  %5514 = vmatpush1.bf16.msra.mxu0 %v7934_v52  ;;  %v8027_v52 = vld [vmem:[%s8788_s4 + $0x648] ss:$20 sps:$4 sm:$0xff]  }
 0x1a5   : > { %5557 = vmatpush1.bf16.msra.mxu1 %v7937_v53  ;;  %5515 = vmatprep.subr.bf16.mxu0 %v7942_v54  ;;  %v8032_v53 = vld [vmem:[%s8788_s4 + $0x8a4] ss:$20 sps:$4 sm:$0xff]   ;;  %v8041_v58 = vld [vmem:[%s8788_s4 + $0xafc] ss:$20 sps:$4 sm:$0xff]  }
 0x1a6   : > { %5558 = vmatprep.subr.bf16.mxu1 %v7945_v55  ;;  %5545 = vmatprep.mubr.bf16.mxu0 %v8464_v63  ;;  %v8035_v54 = vld [vmem:[%s8788_s4 + $0xb24] ss:$20 sps:$4 sm:$0xff]   ;;  %v8030_v55 = vld [vmem:[%s8788_s4 + $0x8a0] ss:$20 sps:$4 sm:$0xff]  }
 0x1a7   : > { %5588 = vmatprep.mubr.bf16.mxu1 %v8465_v0  ;;  %v8044_v63 = vld [vmem:[%s8788_s4 + $0x854] ss:$20 sps:$4 sm:$0xff]  }
 0x1a8   : > { %5516 = vmatpush1.bf16.msra.mxu0 %v7940_v56  ;;  %v8033_v56 = vld [vmem:[%s8788_s4 + $0xb20] ss:$20 sps:$4 sm:$0xff]  }
 0x1a9   : > { %5559 = vmatpush1.bf16.msra.mxu1 %v7943_v57  ;;  %5517 = vmatprep.subr.bf16.mxu0 %v7948_v59  ;;  %v8038_v57 = vld [vmem:[%s8788_s4 + $0x87c] ss:$20 sps:$4 sm:$0xff]   ;;  %v8036_v59 = vld [vmem:[%s8788_s4 + $0x878] ss:$20 sps:$4 sm:$0xff]   ;;  %v8047_v0 = vld [vmem:[%s8788_s4 + $0xad4] ss:$20 sps:$4 sm:$0xff]  }
 0x1aa   : > { %5560 = vmatprep.subr.bf16.mxu1 %v7951_v60  ;;  %v8039_v60 = vld [vmem:[%s8788_s4 + $0xaf8] ss:$20 sps:$4 sm:$0xff]  }
 0x1ac   : > { %5518 = vmatpush1.bf16.msra.mxu0 %v7946_v61  ;;  %v8466_v61 = vld [vmem:[%s8786_s28 + $0x8] ss:$72 sps:$4 sm:$0xff]  }
 0x1ad   : > { %5561 = vmatpush1.bf16.msra.mxu1 %v7949_v62  ;;  %5519 = vmatprep.subr.bf16.mxu0 %v7954_v1  ;;  %v8467_v62 = vld [vmem:[%s8786_s28 + $0x10] ss:$72 sps:$4 sm:$0xff]  }
 0x1ae   : > { %5562 = vmatprep.subr.bf16.mxu1 %v7957_v2  ;;  %v8042_v1 = vld [vmem:[%s8788_s4 + $0x850] ss:$20 sps:$4 sm:$0xff]  }
 0x1af   : > { %v8468_v2 = vld [vmem:[%s8786_s28 + $0x1c] ss:$72 sps:$4 sm:$0xff]  }
 0x1b0   : > { %5520 = vmatpush1.bf16.msra.mxu0 %v7952_v3  ;;  %v8469_v3 = vld [vmem:[%s8786_s28 + $0x24] ss:$72 sps:$4 sm:$0xff]  }
 0x1b1   : > { %5563 = vmatpush1.bf16.msra.mxu1 %v7955_v4  ;;  %5521 = vmatprep.subr.bf16.mxu0 %v7960_v5  ;;  %v8045_v4 = vld [vmem:[%s8788_s4 + $0xad0] ss:$20 sps:$4 sm:$0xff]   ;;  %v8050_v5 = vld [vmem:[%s8788_s4 + $0x82c] ss:$20 sps:$4 sm:$0xff]  }
 0x1b2   : > { %5564 = vmatprep.subr.bf16.mxu1 %v7963_v6  ;;  %v8053_v6 = vld [vmem:[%s8788_s4 + $0xaac] ss:$20 sps:$4 sm:$0xff]  }
 0x1b4   : > { %5522 = vmatpush1.bf16.msra.mxu0 %v7958_v7  ;;  %v8048_v7 = vld [vmem:[%s8788_s4 + $0x828] ss:$20 sps:$4 sm:$0xff]  }
 0x1b5   : > { %5565 = vmatpush1.bf16.msra.mxu1 %v7961_v8  ;;  %5523 = vmatprep.subr.bf16.mxu0 %v7966_v9  ;;  %v8051_v8 = vld [vmem:[%s8788_s4 + $0xaa8] ss:$20 sps:$4 sm:$0xff]   ;;  %v8056_v9 = vld [vmem:[%s8788_s4 + $0x804] ss:$20 sps:$4 sm:$0xff]  }
 0x1b6   : > { %5566 = vmatprep.subr.bf16.mxu1 %v7969_v10  ;;  %v8059_v10 = vld [vmem:[%s8788_s4 + $0xa84] ss:$20 sps:$4 sm:$0xff]  }
 0x1b8   : > { %5524 = vmatpush1.bf16.msra.mxu0 %v7964_v11  ;;  %v8054_v11 = vld [vmem:[%s8788_s4 + $0x800] ss:$20 sps:$4 sm:$0xff]  }
 0x1b9   : > { %5567 = vmatpush1.bf16.msra.mxu1 %v7967_v12  ;;  %5525 = vmatprep.subr.bf16.mxu0 %v7972_v13  ;;  %v8057_v12 = vld [vmem:[%s8788_s4 + $0xa80] ss:$20 sps:$4 sm:$0xff]   ;;  %v8062_v13 = vld [vmem:[%s8788_s4 + $0x7dc] ss:$20 sps:$4 sm:$0xff]  }
 0x1ba   : > { %5568 = vmatprep.subr.bf16.mxu1 %v7975_v14  ;;  %v8065_v14 = vld [vmem:[%s8788_s4 + $0xa5c] ss:$20 sps:$4 sm:$0xff]  }
 0x1bc   : > { %5526 = vmatpush1.bf16.msra.mxu0 %v7970_v15  ;;  %v8060_v15 = vld [vmem:[%s8788_s4 + $0x7d8] ss:$20 sps:$4 sm:$0xff]  }
 0x1bd   : > { %5569 = vmatpush1.bf16.msra.mxu1 %v7973_v16  ;;  %5527 = vmatprep.subr.bf16.mxu0 %v7978_v17  ;;  %v8063_v16 = vld [vmem:[%s8788_s4 + $0xa58] ss:$20 sps:$4 sm:$0xff]   ;;  %v8068_v17 = vld [vmem:[%s8788_s4 + $0x7b4] ss:$20 sps:$4 sm:$0xff]  }
 0x1be   : > { %5570 = vmatprep.subr.bf16.mxu1 %v7981_v18  ;;  %v8071_v18 = vld [vmem:[%s8788_s4 + $0xa34] ss:$20 sps:$4 sm:$0xff]  }
 0x1c0   : > { %5528 = vmatpush1.bf16.msra.mxu0 %v7976_v19  ;;  %v8066_v19 = vld [vmem:[%s8788_s4 + $0x7b0] ss:$20 sps:$4 sm:$0xff]  }
 0x1c1   : > { %5571 = vmatpush1.bf16.msra.mxu1 %v7979_v20  ;;  %5529 = vmatprep.subr.bf16.mxu0 %v7984_v21  ;;  %v8069_v20 = vld [vmem:[%s8788_s4 + $0xa30] ss:$20 sps:$4 sm:$0xff]   ;;  %v8074_v21 = vld [vmem:[%s8788_s4 + $0x78c] ss:$20 sps:$4 sm:$0xff]  }
 0x1c2   : > { %5572 = vmatprep.subr.bf16.mxu1 %v7987_v22  ;;  %v8077_v22 = vld [vmem:[%s8788_s4 + $0xa0c] ss:$20 sps:$4 sm:$0xff]  }
 0x1c4   : > { %5530 = vmatpush2.bf16.msra.mxu0 %v7982_v23  ;;  %v8072_v23 = vld [vmem:[%s8788_s4 + $0x788] ss:$20 sps:$4 sm:$0xff]  }
 0x1c5   : > { %5573 = vmatpush2.bf16.msra.mxu1 %v7985_v24  ;;  %5531 = vmatprep.subr.bf16.mxu0 %v7990_v25  ;;  %v8075_v24 = vld [vmem:[%s8788_s4 + $0xa08] ss:$20 sps:$4 sm:$0xff]   ;;  %v8080_v25 = vld [vmem:[%s8788_s4 + $0x9e4] ss:$20 sps:$4 sm:$0xff]  }
 0x1c6   : > { %5574 = vmatprep.subr.bf16.mxu1 %v7993_v26  ;;  %v8083_v26 = vld [vmem:[%s8788_s4 + $0xc64] ss:$20 sps:$4 sm:$0xff]  }
 0x1c8   : > { %5532 = vmatpush2.bf16.msra.mxu0 %v7988_v27  ;;  %v8078_v27 = vld [vmem:[%s8788_s4 + $0x9e0] ss:$20 sps:$4 sm:$0xff]  }
 0x1c9   : > { %5575 = vmatpush2.bf16.msra.mxu1 %v7991_v28  ;;  %5533 = vmatprep.subr.bf16.mxu0 %v7996_v29  ;;  %v8081_v28 = vld [vmem:[%s8788_s4 + $0xc60] ss:$20 sps:$4 sm:$0xff]   ;;  %v8086_v29 = vld [vmem:[%s8788_s4 + $0x9bc] ss:$20 sps:$4 sm:$0xff]  }
 0x1ca   : > { %5576 = vmatprep.subr.bf16.mxu1 %v7999_v30  ;;  %v8089_v30 = vld [vmem:[%s8788_s4 + $0xc3c] ss:$20 sps:$4 sm:$0xff]  }
 0x1cc   : > { %5534 = vmatpush2.bf16.msra.mxu0 %v7994_v31  ;;  %v8084_v31 = vld [vmem:[%s8788_s4 + $0x9b8] ss:$20 sps:$4 sm:$0xff]  }
 0x1cd   : > { %5577 = vmatpush2.bf16.msra.mxu1 %v7997_v32  ;;  %5535 = vmatprep.subr.bf16.mxu0 %v8002_v33  ;;  %v8087_v32 = vld [vmem:[%s8788_s4 + $0xc38] ss:$20 sps:$4 sm:$0xff]   ;;  %v8092_v33 = vld [vmem:[%s8788_s4 + $0x994] ss:$20 sps:$4 sm:$0xff]  }
 0x1ce   : > { %5578 = vmatprep.subr.bf16.mxu1 %v8005_v34  ;;  %v8095_v34 = vld [vmem:[%s8788_s4 + $0xc14] ss:$20 sps:$4 sm:$0xff]  }
 0x1d0   : > { %5536 = vmatpush2.bf16.msra.mxu0 %v8000_v35  ;;  %v8090_v35 = vld [vmem:[%s8788_s4 + $0x990] ss:$20 sps:$4 sm:$0xff]  }
 0x1d1   : > { %5579 = vmatpush2.bf16.msra.mxu1 %v8003_v36  ;;  %5537 = vmatprep.subr.bf16.mxu0 %v8008_v37  ;;  %v8093_v36 = vld [vmem:[%s8788_s4 + $0xc10] ss:$20 sps:$4 sm:$0xff]   ;;  %v8098_v37 = vld [vmem:[%s8788_s4 + $0x96c] ss:$20 sps:$4 sm:$0xff]  }
 0x1d2   : > { %5580 = vmatprep.subr.bf16.mxu1 %v8011_v38  ;;  %v8101_v38 = vld [vmem:[%s8788_s4 + $0xbec] ss:$20 sps:$4 sm:$0xff]  }
 0x1d4   : > { %5538 = vmatpush2.bf16.msra.mxu0 %v8006_v39  ;;  %v8096_v39 = vld [vmem:[%s8788_s4 + $0x968] ss:$20 sps:$4 sm:$0xff]  }
 0x1d5   : > { %5581 = vmatpush2.bf16.msra.mxu1 %v8009_v40  ;;  %5539 = vmatprep.subr.bf16.mxu0 %v8014_v41  ;;  %v8099_v40 = vld [vmem:[%s8788_s4 + $0xbe8] ss:$20 sps:$4 sm:$0xff]   ;;  %v8104_v41 = vld [vmem:[%s8788_s4 + $0x944] ss:$20 sps:$4 sm:$0xff]  }
 0x1d6   : > { %5582 = vmatprep.subr.bf16.mxu1 %v8017_v42  ;;  %v8107_v42 = vld [vmem:[%s8788_s4 + $0xbc4] ss:$20 sps:$4 sm:$0xff]  }
 0x1d8   : > { %5540 = vmatpush2.bf16.msra.mxu0 %v8012_v43  ;;  %v8102_v43 = vld [vmem:[%s8788_s4 + $0x940] ss:$20 sps:$4 sm:$0xff]  }
 0x1d9   : > { %5583 = vmatpush2.bf16.msra.mxu1 %v8015_v44  ;;  %5541 = vmatprep.subr.bf16.mxu0 %v8020_v45  ;;  %v8105_v44 = vld [vmem:[%s8788_s4 + $0xbc0] ss:$20 sps:$4 sm:$0xff]   ;;  %v8110_v45 = vld [vmem:[%s8788_s4 + $0x91c] ss:$20 sps:$4 sm:$0xff]  }
 0x1da   : > { %5584 = vmatprep.subr.bf16.mxu1 %v8023_v46  ;;  %v8113_v46 = vld [vmem:[%s8788_s4 + $0xb9c] ss:$20 sps:$4 sm:$0xff]  }
 0x1dc   : > { %5542 = vmatpush2.bf16.msra.mxu0 %v8018_v47  ;;  %v8108_v47 = vld [vmem:[%s8788_s4 + $0x918] ss:$20 sps:$4 sm:$0xff]  }
 0x1dd   : > { %5585 = vmatpush2.bf16.msra.mxu1 %v8021_v48  ;;  %5543 = vmatprep.subr.bf16.mxu0 %v8026_v49  ;;  %v8111_v48 = vld [vmem:[%s8788_s4 + $0xb98] ss:$20 sps:$4 sm:$0xff]   ;;  %v8116_v49 = vld [vmem:[%s8788_s4 + $0x8f4] ss:$20 sps:$4 sm:$0xff]  }
 0x1de   : > { %5586 = vmatprep.subr.bf16.mxu1 %v8029_v50  ;;  %v8119_v50 = vld [vmem:[%s8788_s4 + $0xb74] ss:$20 sps:$4 sm:$0xff]  }
 0x1e0   : > { %5544 = vmatpush2.bf16.msra.mxu0 %v8024_v51  ;;  %v8114_v51 = vld [vmem:[%s8788_s4 + $0x8f0] ss:$20 sps:$4 sm:$0xff]  }
 0x1e1   : > { %5587 = vmatpush2.bf16.msra.mxu1 %v8027_v52  ;;  %5599 = vmatprep.subr.bf16.mxu0 %v8032_v53  ;;  %v8117_v52 = vld [vmem:[%s8788_s4 + $0xb70] ss:$20 sps:$4 sm:$0xff]   ;;  %v8122_v53 = vld [vmem:[%s8788_s4 + $0x8cc] ss:$20 sps:$4 sm:$0xff]  }
 0x1e2   : > { %5642 = vmatprep.subr.bf16.mxu1 %v8035_v54  ;;  %v8125_v54 = vld [vmem:[%s8788_s4 + $0xb4c] ss:$20 sps:$4 sm:$0xff]  }
 0x1e3   : > { %5546 = vmatmul.mubr.bf16.vlgmr.msra.gmra.mxu0 %v8466_v61  ;;  %v8134_v61 = vld [vmem:[%s8788_s4 + $0xd7c] ss:$20 sps:$4 sm:$0xff]  }
 0x1e4   : > { %5589 = vmatmul.mubr.bf16.vlgmr.msra.gmra.mxu1 %v8467_v62  ;;  %5600 = vmatpush1.bf16.msra.mxu0 %v8030_v55  ;;  %v8120_v55 = vld [vmem:[%s8788_s4 + $0x8c8] ss:$20 sps:$4 sm:$0xff]  }
 0x1e5   : > { %5643 = vmatpush1.bf16.msra.mxu1 %v8033_v56  ;;  %5601 = vmatprep.subr.bf16.mxu0 %v8038_v57  ;;  %v8123_v56 = vld [vmem:[%s8788_s4 + $0xb48] ss:$20 sps:$4 sm:$0xff]   ;;  %v8128_v57 = vld [vmem:[%s8788_s4 + $0xda4] ss:$20 sps:$4 sm:$0xff]  }
 0x1e6   : > { %5644 = vmatprep.subr.bf16.mxu1 %v8041_v58  ;;  %5631 = vmatprep.mubr.bf16.mxu0 %v8468_v2  ;;  %v8131_v58 = vld [vmem:[%s8788_s4 + $0x1024] ss:$20 sps:$4 sm:$0xff]   ;;  %v8137_v62 = vld [vmem:[%s8788_s4 + $0xffc] ss:$20 sps:$4 sm:$0xff]  }
 0x1e7   : > { %5674 = vmatprep.mubr.bf16.mxu1 %v8469_v3  ;;  %v8471_v2 = vld [vmem:[%s8786_s28 + $0x20] ss:$72 sps:$4 sm:$0xff]  }
 0x1e8   : > { %5602 = vmatpush1.bf16.msra.mxu0 %v8036_v59  ;;  %v8126_v59 = vld [vmem:[%s8788_s4 + $0xda0] ss:$20 sps:$4 sm:$0xff]  }
 0x1e9   : > { %5645 = vmatpush1.bf16.msra.mxu1 %v8039_v60  ;;  %5603 = vmatprep.subr.bf16.mxu0 %v8044_v63  ;;  %v8129_v60 = vld [vmem:[%s8788_s4 + $0x1020] ss:$20 sps:$4 sm:$0xff]   ;;  %v8132_v63 = vld [vmem:[%s8788_s4 + $0xd78] ss:$20 sps:$4 sm:$0xff]  }
 0x1ea   : > { %5646 = vmatprep.subr.bf16.mxu1 %v8047_v0  ;;  %v8135_v0 = vld [vmem:[%s8788_s4 + $0xff8] ss:$20 sps:$4 sm:$0xff]   ;;  %v8140_v3 = vld [vmem:[%s8788_s4 + $0xd54] ss:$20 sps:$4 sm:$0xff]  }
 0x1ec   : > { %5604 = vmatpush1.bf16.msra.mxu0 %v8042_v1  ;;  %v8470_v1 = vld [vmem:[%s8786_s28 + $0x18] ss:$72 sps:$4 sm:$0xff]  }
 0x1ed   : > { %5647 = vmatpush1.bf16.msra.mxu1 %v8045_v4  ;;  %5605 = vmatprep.subr.bf16.mxu0 %v8050_v5  ;;  %v8143_v4 = vld [vmem:[%s8788_s4 + $0xfd4] ss:$20 sps:$4 sm:$0xff]   ;;  %v8138_v5 = vld [vmem:[%s8788_s4 + $0xd50] ss:$20 sps:$4 sm:$0xff]  }
 0x1ee   : > { %5648 = vmatprep.subr.bf16.mxu1 %v8053_v6  ;;  %v8141_v6 = vld [vmem:[%s8788_s4 + $0xfd0] ss:$20 sps:$4 sm:$0xff]  }
 0x1f0   : > { %5606 = vmatpush1.bf16.msra.mxu0 %v8048_v7  ;;  %v8472_v7 = vld [vmem:[%s8786_s28 + $0x2c] ss:$72 sps:$4 sm:$0xff]  }
 0x1f1   : > { %5649 = vmatpush1.bf16.msra.mxu1 %v8051_v8  ;;  %5607 = vmatprep.subr.bf16.mxu0 %v8056_v9  ;;  %v8473_v8 = vld [vmem:[%s8786_s28 + $0x34] ss:$72 sps:$4 sm:$0xff]  }
 0x1f2   : > { %5650 = vmatprep.subr.bf16.mxu1 %v8059_v10  ;;  %v8146_v9 = vld [vmem:[%s8788_s4 + $0xd2c] ss:$20 sps:$4 sm:$0xff]  }
 0x1f3   : > { %v8149_v10 = vld [vmem:[%s8788_s4 + $0xfac] ss:$20 sps:$4 sm:$0xff]  }
 0x1f4   : > { %5608 = vmatpush1.bf16.msra.mxu0 %v8054_v11  ;;  %v8144_v11 = vld [vmem:[%s8788_s4 + $0xd28] ss:$20 sps:$4 sm:$0xff]  }
 0x1f5   : > { %5651 = vmatpush1.bf16.msra.mxu1 %v8057_v12  ;;  %5609 = vmatprep.subr.bf16.mxu0 %v8062_v13  ;;  %v9292_v12 = vpop.f32.mrf.mxu0  ;;  %v8147_v13 = vld [vmem:[%s8788_s4 + $0xfa8] ss:$20 sps:$4 sm:$0xff]  }
 0x1f6   : > { %5652 = vmatprep.subr.bf16.mxu1 %v8065_v14  ;;  %v8152_v14 = vld [vmem:[%s8788_s4 + $0xd04] ss:$20 sps:$4 sm:$0xff]  }
 0x1f8   : > { %5610 = vmatpush1.bf16.msra.mxu0 %v8060_v15  ;;  %v8155_v15 = vld [vmem:[%s8788_s4 + $0xf84] ss:$20 sps:$4 sm:$0xff]  }
 0x1f9   : > { %5653 = vmatpush1.bf16.msra.mxu1 %v8063_v16  ;;  %5611 = vmatprep.subr.bf16.mxu0 %v8068_v17  ;;  %v8150_v16 = vld [vmem:[%s8788_s4 + $0xd00] ss:$20 sps:$4 sm:$0xff]   ;;  %v9298_v17 = vpop.f32.mrf.mxu1 }
 0x1fa   : > { %5654 = vmatprep.subr.bf16.mxu1 %v8071_v18  ;;  %v9300_v18 = vpop.f32.mrf.mxu0 }
 0x1fc   : > { %5612 = vmatpush1.bf16.msra.mxu0 %v8066_v19  ;;  %v8153_v19 = vld [vmem:[%s8788_s4 + $0xf80] ss:$20 sps:$4 sm:$0xff]  }
 0x1fd   : > { %5655 = vmatpush1.bf16.msra.mxu1 %v8069_v20  ;;  %5613 = vmatprep.subr.bf16.mxu0 %v8074_v21  ;;  %v8158_v20 = vld [vmem:[%s8788_s4 + $0xcdc] ss:$20 sps:$4 sm:$0xff]  }
 0x1fe   : > { %5656 = vmatprep.subr.bf16.mxu1 %v8077_v22  ;;  %v8161_v21 = vld [vmem:[%s8788_s4 + $0xf5c] ss:$20 sps:$4 sm:$0xff]   ;;  %v8156_v22 = vld [vmem:[%s8788_s4 + $0xcd8] ss:$20 sps:$4 sm:$0xff]  }
 0x200   : > { %5614 = vmatpush1.bf16.msra.mxu0 %v8072_v23  ;;  %v9306_v23 = vpop.f32.mrf.mxu1 }
 0x201   : > { %5657 = vmatpush1.bf16.msra.mxu1 %v8075_v24  ;;  %5615 = vmatprep.subr.bf16.mxu0 %v8080_v25  ;;  %v9308_v24 = vpop.f32.mrf.mxu0  ;;  %v8159_v25 = vld [vmem:[%s8788_s4 + $0xf58] ss:$20 sps:$4 sm:$0xff]  }
 0x202   : > { %5658 = vmatprep.subr.bf16.mxu1 %v8083_v26  ;;  %v8164_v26 = vld [vmem:[%s8788_s4 + $0xcb4] ss:$20 sps:$4 sm:$0xff]  }
 0x204   : > { %5616 = vmatpush2.bf16.msra.mxu0 %v8078_v27  ;;  %v8167_v27 = vld [vmem:[%s8788_s4 + $0xf34] ss:$20 sps:$4 sm:$0xff]  }
 0x205   : > { %5659 = vmatpush2.bf16.msra.mxu1 %v8081_v28  ;;  %5617 = vmatprep.subr.bf16.mxu0 %v8086_v29  ;;  %v8162_v28 = vld [vmem:[%s8788_s4 + $0xcb0] ss:$20 sps:$4 sm:$0xff]   ;;  %v9314_v29 = vpop.f32.mrf.mxu1 }
 0x206   : > { %5660 = vmatprep.subr.bf16.mxu1 %v8089_v30  ;;  %v9316_v30 = vpop.f32.mrf.mxu0 }
 0x208   : > { %5618 = vmatpush2.bf16.msra.mxu0 %v8084_v31  ;;  %v8165_v31 = vld [vmem:[%s8788_s4 + $0xf30] ss:$20 sps:$4 sm:$0xff]  }
 0x209   : > { %5661 = vmatpush2.bf16.msra.mxu1 %v8087_v32  ;;  %5619 = vmatprep.subr.bf16.mxu0 %v8092_v33  ;;  %v9319_v32 = vpop.f32.mrf.mxu0  ;;  %v8170_v33 = vld [vmem:[%s8788_s4 + $0xc8c] ss:$20 sps:$4 sm:$0xff]  }
 0x20a   : > { %5662 = vmatprep.subr.bf16.mxu1 %v8095_v34  ;;  %v8173_v34 = vld [vmem:[%s8788_s4 + $0xf0c] ss:$20 sps:$4 sm:$0xff]  }
 0x20c   : > { %5620 = vmatpush2.bf16.msra.mxu0 %v8090_v35  ;;  %v8168_v35 = vld [vmem:[%s8788_s4 + $0xc88] ss:$20 sps:$4 sm:$0xff]  }
 0x20d   : > { %5663 = vmatpush2.bf16.msra.mxu1 %v8093_v36  ;;  %5621 = vmatprep.subr.bf16.mxu0 %v8098_v37  ;;  %v9324_v36 = vpop.f32.mrf.mxu1  ;;  %v8171_v37 = vld [vmem:[%s8788_s4 + $0xf08] ss:$20 sps:$4 sm:$0xff]  }
 0x20e   : > { %5664 = vmatprep.subr.bf16.mxu1 %v8101_v38  ;;  %v9327_v38 = vpop.f32.mrf.mxu0 }
 0x210   : > { %5622 = vmatpush2.bf16.msra.mxu0 %v8096_v39  ;;  %v9329_v39 = vpop.f32.mrf.mxu1 }
 0x211   : > { %5665 = vmatpush2.bf16.msra.mxu1 %v8099_v40  ;;  %5623 = vmatprep.subr.bf16.mxu0 %v8104_v41  ;;  %v8176_v40 = vld [vmem:[%s8788_s4 + $0xee4] ss:$20 sps:$4 sm:$0xff]  }
 0x212   : > { %5666 = vmatprep.subr.bf16.mxu1 %v8107_v42  ;;  %v8179_v41 = vld [vmem:[%s8788_s4 + $0x1164] ss:$20 sps:$4 sm:$0xff]   ;;  %v8174_v42 = vld [vmem:[%s8788_s4 + $0xee0] ss:$20 sps:$4 sm:$0xff]  }
 0x214   : > { %5624 = vmatpush2.bf16.msra.mxu0 %v8102_v43  ;;  %v8177_v43 = vld [vmem:[%s8788_s4 + $0x1160] ss:$20 sps:$4 sm:$0xff]  }
 0x215   : > { %5667 = vmatpush2.bf16.msra.mxu1 %v8105_v44  ;;  %5625 = vmatprep.subr.bf16.mxu0 %v8110_v45  ;;  %v8182_v44 = vld [vmem:[%s8788_s4 + $0xebc] ss:$20 sps:$4 sm:$0xff]   ;;  %v9336_v45 = vpop.f32.mrf.mxu0 }
 0x216   : > { %5668 = vmatprep.subr.bf16.mxu1 %v8113_v46  ;;  %v9338_v46 = vpop.f32.mrf.mxu1 }
 0x218   : > { %5626 = vmatpush2.bf16.msra.mxu0 %v8108_v47  ;;  %v8185_v47 = vld [vmem:[%s8788_s4 + $0x113c] ss:$20 sps:$4 sm:$0xff]  }
 0x219   : > { %5669 = vmatpush2.bf16.msra.mxu1 %v8111_v48  ;;  %5627 = vmatprep.subr.bf16.mxu0 %v8116_v49  ;;  %v8180_v48 = vld [vmem:[%s8788_s4 + $0xeb8] ss:$20 sps:$4 sm:$0xff]  }
 0x21a   : > { %5670 = vmatprep.subr.bf16.mxu1 %v8119_v50  ;;  %v8183_v49 = vld [vmem:[%s8788_s4 + $0x1138] ss:$20 sps:$4 sm:$0xff]   ;;  %v8188_v50 = vld [vmem:[%s8788_s4 + $0xe94] ss:$20 sps:$4 sm:$0xff]  }
 0x21c   : > { %5628 = vmatpush2.bf16.msra.mxu0 %v8114_v51  ;;  %v5209_v51 = vpop.f32.mrf.mxu0 }
 0x21d   : > { %5671 = vmatpush2.bf16.msra.mxu1 %v8117_v52  ;;  %5629 = vmatprep.subr.bf16.mxu0 %v8122_v53  ;;  %v9344_v52 = vpop.f32.mrf.mxu1  ;;  %v8191_v53 = vld [vmem:[%s8788_s4 + $0x1114] ss:$20 sps:$4 sm:$0xff]  }
 0x21e   : > { %5672 = vmatprep.subr.bf16.mxu1 %v8125_v54  ;;  %v5289_v54 = vpop.f32.mrf.mxu0 }
 0x220   : > { %5630 = vmatpush2.bf16.msra.mxu0 %v8120_v55  ;;  %v8186_v55 = vld [vmem:[%s8788_s4 + $0xe90] ss:$20 sps:$4 sm:$0xff]  }
 0x221   : > { %5673 = vmatpush2.bf16.msra.mxu1 %v8123_v56  ;;  %5685 = vmatprep.subr.bf16.mxu0 %v8128_v57  ;;  %v8189_v56 = vld [vmem:[%s8788_s4 + $0x1110] ss:$20 sps:$4 sm:$0xff]   ;;  %v8194_v57 = vld [vmem:[%s8788_s4 + $0xe6c] ss:$20 sps:$4 sm:$0xff]  }
 0x222   : > { %5728 = vmatprep.subr.bf16.mxu1 %v8131_v58  ;;  %v5252_v58 = vpop.f32.mrf.mxu1 }
 0x223   : > { %5632 = vmatmul.mubr.bf16.vlgmr.msra.gmra.mxu0 %v8470_v1  ;;  %v8203_v1 = vld [vmem:[%s8788_s4 + $0x10c4] ss:$20 sps:$4 sm:$0xff]  }
 0x224   : > { %5675 = vmatmul.mubr.bf16.vlgmr.msra.gmra.mxu1 %v8471_v2  ;;  %5686 = vmatpush1.bf16.msra.mxu0 %v8126_v59  ;;  %v8197_v59 = vld [vmem:[%s8788_s4 + $0x10ec] ss:$20 sps:$4 sm:$0xff]  }
 0x225   : > { %5729 = vmatpush1.bf16.msra.mxu1 %v8129_v60  ;;  %5687 = vmatprep.subr.bf16.mxu0 %v8134_v61  ;;  %v5291_v60 = vpop.f32.mrf.mxu0  ;;  %v5332_v61 = vpop.f32.mrf.mxu1 }
 0x226   : > { %5730 = vmatprep.subr.bf16.mxu1 %v8137_v62  ;;  %5717 = vmatprep.mubr.bf16.mxu0 %v8472_v7  ;;  %v8192_v62 = vld [vmem:[%s8788_s4 + $0xe68] ss:$20 sps:$4 sm:$0xff]  }
 0x227   : > { %5760 = vmatprep.mubr.bf16.mxu1 %v8473_v8  ;;  %v5293_v2 = vpop.f32.mrf.mxu0  ;;  %v8206_v7 = vld [vmem:[%s8788_s4 + $0xe1c] ss:$20 sps:$4 sm:$0xff]  }
 0x228   : > { %5688 = vmatpush1.bf16.msra.mxu0 %v8132_v63  ;;  %v8195_v63 = vld [vmem:[%s8788_s4 + $0x10e8] ss:$20 sps:$4 sm:$0xff]  }
 0x229   : > { %5731 = vmatpush1.bf16.msra.mxu1 %v8135_v0  ;;  %5689 = vmatprep.subr.bf16.mxu0 %v8140_v3  ;;  %v8200_v0 = vld [vmem:[%s8788_s4 + $0xe44] ss:$20 sps:$4 sm:$0xff]   ;;  %v5334_v3 = vpop.f32.mrf.mxu1  ;;  %v8209_v8 = vld [vmem:[%s8788_s4 + $0x109c] ss:$20 sps:$4 sm:$0xff]  }
 0x22a   : > { %5732 = vmatprep.subr.bf16.mxu1 %v8143_v4  ;;  %v8198_v4 = vld [vmem:[%s8788_s4 + $0xe40] ss:$20 sps:$4 sm:$0xff]  }
 0x22c   : > { %5690 = vmatpush1.bf16.msra.mxu0 %v8138_v5  ;;  %v5161_v5 = vadd.f32 %v9298_v17, %v9292_v12  ;;  %v5165_v12 = vadd.f32 %v9314_v29, %v9308_v24  ;;  %v8212_v17 = vld [vmem:[%s8788_s4 + $0xdf4] ss:$20 sps:$4 sm:$0xff]   ;;  %v8210_v24 = vld [vmem:[%s8788_s4 + $0xdf0] ss:$20 sps:$4 sm:$0xff]   ;;  %v8218_v29 = vld [vmem:[%s8788_s4 + $0xdcc] ss:$20 sps:$4 sm:$0xff]  }
 0x22d   : > { %5733 = vmatpush1.bf16.msra.mxu1 %v8141_v6  ;;  %5691 = vmatprep.subr.bf16.mxu0 %v8146_v9  ;;  %v8201_v6 = vld [vmem:[%s8788_s4 + $0x10c0] ss:$20 sps:$4 sm:$0xff]   ;;  %v5163_v9 = vadd.f32 %v9306_v23, %v9300_v18 }
 0x22e   : > { %5734 = vmatprep.subr.bf16.mxu1 %v8149_v10  ;;  %v5204_v10 = vadd.f32 %v9319_v32, %v5161_v5  ;;  %v8215_v18 = vld [vmem:[%s8788_s4 + $0x1074] ss:$20 sps:$4 sm:$0xff]   ;;  %v8221_v32 = vld [vmem:[%s8788_s4 + $0x104c] ss:$20 sps:$4 sm:$0xff]  }
 0x230   : > { %5692 = vmatpush1.bf16.msra.mxu0 %v8144_v11  ;;  %v5295_v11 = vpop.f32.mrf.mxu0 }
 0x231   : > { %5735 = vmatpush1.bf16.msra.mxu1 %v8147_v13  ;;  %5693 = vmatprep.subr.bf16.mxu0 %v8152_v14  ;;  %v5336_v13 = vpop.f32.mrf.mxu1  ;;  %v8204_v14 = vld [vmem:[%s8788_s4 + $0xe18] ss:$20 sps:$4 sm:$0xff]  }
 0x232   : > { %5736 = vmatprep.subr.bf16.mxu1 %v8155_v15  ;;  %v5206_v15 = vadd.f32 %v9327_v38, %v5163_v9 }
 0x233   : > { %v5338_v23 = vpop.f32.mrf.mxu1 }
 0x234   : > { %5694 = vmatpush1.bf16.msra.mxu0 %v8150_v16  ;;  %v8207_v16 = vld [vmem:[%s8788_s4 + $0x1098] ss:$20 sps:$4 sm:$0xff]  }
 0x235   : > { %5737 = vmatpush1.bf16.msra.mxu1 %v8153_v19  ;;  %5695 = vmatprep.subr.bf16.mxu0 %v8158_v20  ;;  %v5375_v19 = vpop.f32.mrf.mxu0  ;;  %v5167_v20 = vadd.f32 %v9324_v36, %v9316_v30  ;;  %v5418_v30 = vpop.f32.mrf.mxu1 }
 0x236   : > { %5738 = vmatprep.subr.bf16.mxu1 %v8161_v21  ;;  %v5247_v21 = vadd.f32 %v9329_v39, %v5204_v10  ;;  %v8219_v39 = vld [vmem:[%s8788_s4 + $0x1048] ss:$20 sps:$4 sm:$0xff]  }
 0x238   : > { %5696 = vmatpush1.bf16.msra.mxu0 %v8156_v22  ;;  %v5208_v22 = vadd.f32 %v9336_v45, %v5165_v12 }
 0x239   : > { %5739 = vmatpush1.bf16.msra.mxu1 %v8159_v25  ;;  %5697 = vmatprep.subr.bf16.mxu0 %v8164_v26  ;;  %v5249_v25 = vadd.f32 %v9338_v46, %v5206_v15  ;;  %v5210_v26 = vadd.f32 %v5209_v51, %v5167_v20  ;;  %v8230_v51 = vld [vmem:[%s8788_s4 + $0x127c] ss:$20 sps:$4 sm:$0xff]  }
 0x23a   : > { %5740 = vmatprep.subr.bf16.mxu1 %v8167_v27  ;;  %v5290_v27 = vadd.f32 %v5289_v54, %v5247_v21  ;;  %v8233_v54 = vld [vmem:[%s8788_s4 + $0x14fc] ss:$20 sps:$4 sm:$0xff]  }
 0x23b   : > { %v5253_v36 = vadd.f32 %v5252_v58, %v5210_v26  ;;  %v357_v58 = vld [vmem:[#allocation8] sm:$0xff]  ;;  %v363_v20 = vld [vmem:[#allocation8 + $0x30] sm:$0xff] }
 0x23c   : > { %5698 = vmatpush1.bf16.msra.mxu0 %v8162_v28  ;;  %v8213_v28 = vld [vmem:[%s8788_s4 + $0x1070] ss:$20 sps:$4 sm:$0xff]  }
 0x23d   : > { %5741 = vmatpush1.bf16.msra.mxu1 %v8165_v31  ;;  %5699 = vmatprep.subr.bf16.mxu0 %v8170_v33  ;;  %v5377_v31 = vpop.f32.mrf.mxu0  ;;  %v5251_v33 = vadd.f32 %v9344_v52, %v5208_v22  ;;  %v5296_v45 = vadd.f32 %v5295_v11, %v5253_v36  ;;  %v9402_v11 = vld [vmem:[%s8786_s28 + $0x3c] ss:$72 sps:$4 sm:$0xff]  }
 0x23e   : > { %5742 = vmatprep.subr.bf16.mxu1 %v8173_v34  ;;  %v5292_v34 = vadd.f32 %v5291_v60, %v5249_v25  ;;  %v9390_v60 = vld [vmem:[%s8786_s28 + $0x28] ss:$72 sps:$4 sm:$0xff]  }
 0x23f   : > { %v5294_v38 = vadd.f32 %v5293_v2, %v5251_v33  ;;  %v8231_v2 = vld [vmem:[%s8788_s4 + $0x14f8] ss:$20 sps:$4 sm:$0xff]   ;;  %v8254_v33 = vld [vmem:[%s8788_s4 + $0x11dc] ss:$20 sps:$4 sm:$0xff]  }
 0x240   : > { %5700 = vmatpush1.bf16.msra.mxu0 %v8168_v35  ;;  %v8216_v35 = vld [vmem:[%s8788_s4 + $0xdc8] ss:$20 sps:$4 sm:$0xff]   ;;  %v8242_v22 = vld [vmem:[%s8788_s4 + $0x122c] ss:$20 sps:$4 sm:$0xff]  }
 0x241   : > { %5743 = vmatpush1.bf16.msra.mxu1 %v8171_v37  ;;  %5701 = vmatprep.subr.bf16.mxu0 %v8176_v40  ;;  %v5333_v37 = vadd.f32 %v5332_v61, %v5290_v27  ;;  %v8224_v40 = vld [vmem:[%s8788_s4 + $0x12a4] ss:$20 sps:$4 sm:$0xff]   ;;  %v8240_v27 = vld [vmem:[%s8788_s4 + $0x1228] ss:$20 sps:$4 sm:$0xff]  }
 0x242   : > { %5744 = vmatprep.subr.bf16.mxu1 %v8179_v41  ;;  %v5379_v41 = vpop.f32.mrf.mxu0  ;;  %v9394_v61 = vld [vmem:[%s8786_s28 + $0x30] ss:$72 sps:$4 sm:$0xff]  }
 0x243   : > { %v5376_v46 = vadd.f32 %v5375_v19, %v5333_v37  ;;  %v8234_v19 = vld [vmem:[%s8788_s4 + $0x1250] ss:$20 sps:$4 sm:$0xff]   ;;  %v8255_v36 = vld [vmem:[%s8788_s4 + $0x1458] ss:$20 sps:$4 sm:$0xff]   ;;  %v8260_v37 = vld [vmem:[%s8788_s4 + $0x11b4] ss:$20 sps:$4 sm:$0xff]  }
 0x244   : > { %5702 = vmatpush2.bf16.msra.mxu0 %v8174_v42  ;;  %v5420_v42 = vpop.f32.mrf.mxu1  ;;  %v5381_v52 = vpop.f32.mrf.mxu0 }
 0x245   : > { %5745 = vmatpush2.bf16.msra.mxu1 %v8177_v43  ;;  %5703 = vmatprep.subr.bf16.mxu0 %v8182_v44  ;;  %v8227_v43 = vld [vmem:[%s8788_s4 + $0x1524] ss:$20 sps:$4 sm:$0xff]   ;;  %v5335_v44 = vadd.f32 %v5334_v3, %v5292_v34  ;;  %v8257_v34 = vld [vmem:[%s8788_s4 + $0x145c] ss:$20 sps:$4 sm:$0xff]  }
 0x246   : > { %5746 = vmatprep.subr.bf16.mxu1 %v8185_v47  ;;  %v8222_v47 = vld [vmem:[%s8788_s4 + $0x12a0] ss:$20 sps:$4 sm:$0xff]  }
 0x248   : > { %5704 = vmatpush2.bf16.msra.mxu0 %v8180_v48  ;;  %v8225_v48 = vld [vmem:[%s8788_s4 + $0x1520] ss:$20 sps:$4 sm:$0xff]  }
 0x249   : > { %5747 = vmatpush2.bf16.msra.mxu1 %v8183_v49  ;;  %5705 = vmatprep.subr.bf16.mxu0 %v8188_v50  ;;  %v5337_v49 = vadd.f32 %v5336_v13, %v5294_v38  ;;  %v5378_v50 = vadd.f32 %v5377_v31, %v5335_v44  ;;  %v9406_v13 = vld [vmem:[%s8786_s28 + $0x44] ss:$72 sps:$4 sm:$0xff]  }
 0x24a   : > { %5748 = vmatprep.subr.bf16.mxu1 %v8191_v53  ;;  %v5422_v53 = vpop.f32.mrf.mxu1  ;;  %v8251_v31 = vld [vmem:[%s8788_s4 + $0x1484] ss:$20 sps:$4 sm:$0xff]   ;;  %v8263_v38 = vld [vmem:[%s8788_s4 + $0x1434] ss:$20 sps:$4 sm:$0xff]  }
 0x24b   : > { %v8267_v44 = vld [vmem:[%s8788_s4 + $0x1408] ss:$20 sps:$4 sm:$0xff]  }
 0x24c   : > { %5706 = vmatpush2.bf16.msra.mxu0 %v8186_v55  ;;  %v5339_v55 = vadd.f32 %v5338_v23, %v5296_v45  ;;  %v5424_v3 = vpop.f32.mrf.mxu1  ;;  %v8245_v23 = vld [vmem:[%s8788_s4 + $0x14ac] ss:$20 sps:$4 sm:$0xff]   ;;  %v8272_v45 = vld [vmem:[%s8788_s4 + $0x13e4] ss:$20 sps:$4 sm:$0xff]  }
 0x24d   : > { %5749 = vmatpush2.bf16.msra.mxu1 %v8189_v56  ;;  %5707 = vmatprep.subr.bf16.mxu0 %v8194_v57  ;;  %v5419_v56 = vadd.f32 %v5418_v30, %v5376_v46  ;;  %v5380_v57 = vadd.f32 %v5379_v41, %v5337_v49  ;;  %v8246_v30 = vld [vmem:[%s8788_s4 + $0x1200] ss:$20 sps:$4 sm:$0xff]   ;;  %v8275_v46 = vld [vmem:[%s8788_s4 + $0x1664] ss:$20 sps:$4 sm:$0xff]   ;;  %v8278_v49 = vld [vmem:[%s8788_s4 + $0x13bc] ss:$20 sps:$4 sm:$0xff]  }
 0x24e   : > { %5750 = vmatprep.subr.bf16.mxu1 %v8197_v59  ;;  %v8266_v41 = vld [vmem:[%s8788_s4 + $0x118c] ss:$20 sps:$4 sm:$0xff]  }
 0x250   : > { %5708 = vmatpush2.bf16.msra.mxu0 %v8192_v62  ;;  %v5421_v62 = vadd.f32 %v5420_v42, %v5378_v50  ;;  %v8269_v42 = vld [vmem:[%s8788_s4 + $0x140c] ss:$20 sps:$4 sm:$0xff]   ;;  %v8281_v50 = vld [vmem:[%s8788_s4 + $0x163c] ss:$20 sps:$4 sm:$0xff]  }
 0x251   : > { %5751 = vmatpush2.bf16.msra.mxu1 %v8195_v63  ;;  %5709 = vmatprep.subr.bf16.mxu0 %v8200_v0  ;;  %v5382_v63 = vadd.f32 %v5381_v52, %v5339_v55  ;;  %v8279_v52 = vld [vmem:[%s8788_s4 + $0x1638] ss:$20 sps:$4 sm:$0xff]   ;;  %v8282_v55 = vld [vmem:[%s8788_s4 + $0x1390] ss:$20 sps:$4 sm:$0xff]  }
 0x252   : > { %5752 = vmatprep.subr.bf16.mxu1 %v8203_v1  ;;  %v8228_v1 = vld [vmem:[%s8788_s4 + $0x1278] ss:$20 sps:$4 sm:$0xff]  }
 0x253   : > { %v5425_v15 = vadd.f32 %v5424_v3, %v5382_v63  ;;  %v8296_v63 = vld [vmem:[%s8788_s4 + $0x1344] ss:$20 sps:$4 sm:$0xff]   ;;  %v8302_v3 = vld [vmem:[%s8788_s4 + $0x131c] ss:$20 sps:$4 sm:$0xff]  }
 0x254   : > { %5710 = vmatpush2.bf16.msra.mxu0 %v8198_v4  ;;  %v358_v4 = vld [vmem:[#allocation8 + $0x8] sm:$0xff] }
 0x255   : > { %5753 = vmatpush2.bf16.msra.mxu1 %v8201_v6  ;;  %5711 = vmatprep.subr.bf16.mxu0 %v8206_v7  ;;  %v8236_v6 = vld [vmem:[%s8788_s4 + $0x1254] ss:$20 sps:$4 sm:$0xff]  }
 0x256   : > { %5754 = vmatprep.subr.bf16.mxu1 %v8209_v8  ;;  %v8239_v7 = vld [vmem:[%s8788_s4 + $0x14d4] ss:$20 sps:$4 sm:$0xff]   ;;  %v5423_v8 = vadd.f32 %v5422_v53, %v5380_v57  ;;  %v8290_v57 = vld [vmem:[%s8788_s4 + $0x136c] ss:$20 sps:$4 sm:$0xff]  }
 0x257   : > { %v8284_v53 = vld [vmem:[%s8788_s4 + $0x1394] ss:$20 sps:$4 sm:$0xff]  }
 0x258   : > { %5712 = vmatpush2.bf16.msra.mxu0 %v8204_v14  ;;  %v362_v14 = vld [vmem:[#allocation8 + $0x28] sm:$0xff] }
 0x259   : > { %5755 = vmatpush2.bf16.msra.mxu1 %v8207_v16  ;;  %5713 = vmatprep.subr.bf16.mxu0 %v8212_v17 }
 0x25a   : > { %5756 = vmatprep.subr.bf16.mxu1 %v8215_v18  ;;  %v8237_v18 = vld [vmem:[%s8788_s4 + $0x14d0] ss:$20 sps:$4 sm:$0xff]  }
 0x25c   : > { %5714 = vmatpush2.bf16.msra.mxu0 %v8210_v24 }
 0x25d   : > { %5757 = vmatpush2.bf16.msra.mxu1 %v8213_v28  ;;  %5715 = vmatprep.subr.bf16.mxu0 %v8218_v29  ;;  %v8243_v28 = vld [vmem:[%s8788_s4 + $0x14a8] ss:$20 sps:$4 sm:$0xff]   ;;  %v8248_v29 = vld [vmem:[%s8788_s4 + $0x1204] ss:$20 sps:$4 sm:$0xff]  }
 0x25e   : > { %5758 = vmatprep.subr.bf16.mxu1 %v8221_v32  ;;  %v8249_v32 = vld [vmem:[%s8788_s4 + $0x1480] ss:$20 sps:$4 sm:$0xff]  }
 0x260   : > { %5716 = vmatpush2.bf16.msra.mxu0 %v8216_v35  ;;  %v8252_v35 = vld [vmem:[%s8788_s4 + $0x11d8] ss:$20 sps:$4 sm:$0xff]  }
 0x261   : > { %5759 = vmatpush2.bf16.msra.mxu1 %v8219_v39  ;;  %5771 = vmatprep.subr.bf16.mxu0 %v8224_v40  ;;  %v8258_v39 = vld [vmem:[%s8788_s4 + $0x11b0] ss:$20 sps:$4 sm:$0xff]  }
 0x262   : > { %5814 = vmatprep.subr.bf16.mxu1 %v8227_v43  ;;  %v8261_v40 = vld [vmem:[%s8788_s4 + $0x1430] ss:$20 sps:$4 sm:$0xff]   ;;  %v8264_v43 = vld [vmem:[%s8788_s4 + $0x1188] ss:$20 sps:$4 sm:$0xff]  }
 0x263   : > { %v5461_v59 = vpop.f32.mrf.mxu0  ;;  %5718 = vmatmul.mubr.bf16.vlgmr.msra.gmra.mxu0 %v9390_v60 }
 0x264   : > { %5761 = vmatmul.mubr.bf16.vlgmr.msra.gmra.mxu1 %v9394_v61  ;;  %v5462_v0 = vadd.f32 %v5461_v59, %v5419_v56  ;;  %5772 = vmatpush1.bf16.msra.mxu0 %v8222_v47  ;;  %v8270_v47 = vld [vmem:[%s8788_s4 + $0x13e0] ss:$20 sps:$4 sm:$0xff]   ;;  %v8285_v56 = vld [vmem:[%s8788_s4 + $0x1610] ss:$20 sps:$4 sm:$0xff]   ;;  %v8288_v59 = vld [vmem:[%s8788_s4 + $0x1368] ss:$20 sps:$4 sm:$0xff]  }
 0x265   : > { %5815 = vmatpush1.bf16.msra.mxu1 %v8225_v48  ;;  %v5463_v5 = vpop.f32.mrf.mxu0  ;;  %5773 = vmatprep.subr.bf16.mxu0 %v8230_v51  ;;  %v8273_v48 = vld [vmem:[%s8788_s4 + $0x1660] ss:$20 sps:$4 sm:$0xff]   ;;  %v8276_v51 = vld [vmem:[%s8788_s4 + $0x13b8] ss:$20 sps:$4 sm:$0xff]  }
 0x266   : > { %5816 = vmatprep.subr.bf16.mxu1 %v8233_v54  ;;  %v6226_v9 = vadd.f32 %v5462_v0, %v357_v58  ;;  %v5464_v10 = vadd.f32 %v5463_v5, %v5421_v62  ;;  %5803 = vmatprep.mubr.bf16.mxu0 %v9402_v11  ;;  %v8287_v54 = vld [vmem:[%s8788_s4 + $0x1614] ss:$20 sps:$4 sm:$0xff]   ;;  %v8293_v58 = vld [vmem:[%s8788_s4 + $0x15ec] ss:$20 sps:$4 sm:$0xff]   ;;  %v8299_v0 = vld [vmem:[%s8788_s4 + $0x15c4] ss:$20 sps:$4 sm:$0xff]  }
 0x267   : > { %5846 = vmatprep.mubr.bf16.mxu1 %v9406_v13  ;;  %v5465_v12 = vpop.f32.mrf.mxu0  ;;  %v8291_v62 = vld [vmem:[%s8788_s4 + $0x15e8] ss:$20 sps:$4 sm:$0xff]   ;;  %v8300_v5 = vld [vmem:[%s8788_s4 + $0x1318] ss:$20 sps:$4 sm:$0xff]  }
 0x268   : > { %6236 = vst [vmem:[#allocation8] sm:$0xff] %v6226_v9  ;;  %v6227_v16 = vadd.f32 %v5464_v10, %v358_v4  ;;  %v5466_v17 = vadd.f32 %v5465_v12, %v5423_v8  ;;  %5774 = vmatpush1.bf16.msra.mxu0 %v8228_v1  ;;  %v8294_v1 = vld [vmem:[%s8788_s4 + $0x1340] ss:$20 sps:$4 sm:$0xff]   ;;  %v8305_v4 = vld [vmem:[%s8788_s4 + $0x159c] ss:$20 sps:$4 sm:$0xff]  }
 0x269   : > { %5817 = vmatpush1.bf16.msra.mxu1 %v8231_v2  ;;  %v5467_v21 = vpop.f32.mrf.mxu0  ;;  %5775 = vmatprep.subr.bf16.mxu0 %v8236_v6  ;;  %v8297_v2 = vld [vmem:[%s8788_s4 + $0x15c0] ss:$20 sps:$4 sm:$0xff]   ;;  %v8303_v6 = vld [vmem:[%s8788_s4 + $0x1598] ss:$20 sps:$4 sm:$0xff]   ;;  %v8306_v9 = vld [vmem:[%s8788_s4 + $0x12f0] ss:$20 sps:$4 sm:$0xff]  }
 0x26a   : > { %5818 = vmatprep.subr.bf16.mxu1 %v8239_v7  ;;  %6237 = vst [vmem:[#allocation8 + $0x8] sm:$0xff] %v6227_v16  ;;  %v6231_v24 = vadd.f32 %v5466_v17, %v362_v14  ;;  %v5468_v25 = vadd.f32 %v5467_v21, %v5425_v15  ;;  %v8308_v7 = vld [vmem:[%s8788_s4 + $0x12f4] ss:$20 sps:$4 sm:$0xff]   ;;  %v8309_v10 = vld [vmem:[%s8788_s4 + $0x1570] ss:$20 sps:$4 sm:$0xff]  }
 0x26b   : > { %v8311_v8 = vld [vmem:[%s8788_s4 + $0x1574] ss:$20 sps:$4 sm:$0xff]   ;;  %v8314_v14 = vld [vmem:[%s8788_s4 + $0x12cc] ss:$20 sps:$4 sm:$0xff]  }
 0x26c   : > { %6241 = vst [vmem:[#allocation8 + $0x28] sm:$0xff] %v6231_v24  ;;  %v6232_v26 = vadd.f32 %v5468_v25, %v363_v20  ;;  %5776 = vmatpush1.bf16.msra.mxu0 %v8234_v19  ;;  %v8317_v12 = vld [vmem:[%s8788_s4 + $0x154c] ss:$20 sps:$4 sm:$0xff]   ;;  %v8312_v15 = vld [vmem:[%s8788_s4 + $0x12c8] ss:$20 sps:$4 sm:$0xff]  }
 0x26d   : > { %5819 = vmatpush1.bf16.msra.mxu1 %v8237_v18  ;;  %5777 = vmatprep.subr.bf16.mxu0 %v8242_v22  ;;  %v8315_v16 = vld [vmem:[%s8788_s4 + $0x1548] ss:$20 sps:$4 sm:$0xff]   ;;  %v8322_v21 = vld [vmem:[%s8788_s4 + $0x240] ss:$20 sps:$4 sm:$0xff]  }
 0x26e   : > { %5820 = vmatprep.subr.bf16.mxu1 %v8245_v23  ;;  %6242 = vst [vmem:[#allocation8 + $0x30] sm:$0xff] %v6232_v26  ;;  %v8318_v17 = vld [vmem:[%s8788_s4 + $0x268] ss:$20 sps:$4 sm:$0xff]   ;;  %v8323_v22 = vld [vmem:[%s8788_s4 + $0x4c0] ss:$20 sps:$4 sm:$0xff]  }
 0x26f   : > { %v8319_v19 = vld [vmem:[%s8788_s4 + $0x4e8] ss:$20 sps:$4 sm:$0xff]   ;;  %v8324_v25 = vld [vmem:[%s8788_s4 + $0x100] ss:$20 sps:$4 sm:$0xff]  }
 0x270   : > { %5778 = vmatpush1.bf16.msra.mxu0 %v8240_v27  ;;  %v8320_v18 = vld [vmem:[%s8788_s4 + $0x128] ss:$20 sps:$4 sm:$0xff]   ;;  %v8325_v26 = vld [vmem:[%s8788_s4 + $0x380] ss:$20 sps:$4 sm:$0xff]   ;;  %v8326_v27 = vld [vmem:[%s8788_s4 + $0x218] ss:$20 sps:$4 sm:$0xff]  }
 0x271   : > { %5821 = vmatpush1.bf16.msra.mxu1 %v8243_v28  ;;  %5779 = vmatprep.subr.bf16.mxu0 %v8248_v29  ;;  %v8321_v20 = vld [vmem:[%s8788_s4 + $0x3a8] ss:$20 sps:$4 sm:$0xff]   ;;  %v8327_v28 = vld [vmem:[%s8788_s4 + $0x498] ss:$20 sps:$4 sm:$0xff]  }
 0x272   : > { %5822 = vmatprep.subr.bf16.mxu1 %v8251_v31  ;;  %v9470_v23 = vld [vmem:[%s8786_s28 + $0x38] ss:$72 sps:$4 sm:$0xff]   ;;  %v8480_v29 = vld [vmem:[%s8786_s28 + $0x4] ss:$72 sps:$4 sm:$0xff]  }
 0x273   : > { %v9474_v24 = vld [vmem:[%s8786_s28 + $0x40] ss:$72 sps:$4 sm:$0xff]   ;;  %v8481_v31 = vld [vmem:[%s8786_s28 + $0xc] ss:$72 sps:$4 sm:$0xff]  }
 0x274   : > { %5780 = vmatpush1.bf16.msra.mxu0 %v8246_v30  ;;  %v8328_v30 = vld [vmem:[%s8788_s4 + $0xd8] ss:$20 sps:$4 sm:$0xff]  }
 0x275   : > { %5823 = vmatpush1.bf16.msra.mxu1 %v8249_v32  ;;  %5781 = vmatprep.subr.bf16.mxu0 %v8254_v33  ;;  %v8329_v32 = vld [vmem:[%s8788_s4 + $0x358] ss:$20 sps:$4 sm:$0xff]   ;;  %v8330_v33 = vld [vmem:[%s8788_s4 + $0x1f0] ss:$20 sps:$4 sm:$0xff]  }
 0x276   : > { %5824 = vmatprep.subr.bf16.mxu1 %v8257_v34  ;;  %v8331_v34 = vld [vmem:[%s8788_s4 + $0x470] ss:$20 sps:$4 sm:$0xff]  }
 0x278   : > { %5782 = vmatpush1.bf16.msra.mxu0 %v8252_v35  ;;  %v8332_v35 = vld [vmem:[%s8788_s4 + $0xb0] ss:$20 sps:$4 sm:$0xff]  }
 0x279   : > { %5825 = vmatpush1.bf16.msra.mxu1 %v8255_v36  ;;  %5783 = vmatprep.subr.bf16.mxu0 %v8260_v37  ;;  %v8333_v36 = vld [vmem:[%s8788_s4 + $0x330] ss:$20 sps:$4 sm:$0xff]   ;;  %v8334_v37 = vld [vmem:[%s8788_s4 + $0x1c8] ss:$20 sps:$4 sm:$0xff]  }
 0x27a   : > { %5826 = vmatprep.subr.bf16.mxu1 %v8263_v38  ;;  %v8335_v38 = vld [vmem:[%s8788_s4 + $0x448] ss:$20 sps:$4 sm:$0xff]  }
 0x27c   : > { %5784 = vmatpush1.bf16.msra.mxu0 %v8258_v39  ;;  %v8336_v39 = vld [vmem:[%s8788_s4 + $0x88] ss:$20 sps:$4 sm:$0xff]  }
 0x27d   : > { %5827 = vmatpush1.bf16.msra.mxu1 %v8261_v40  ;;  %5785 = vmatprep.subr.bf16.mxu0 %v8266_v41  ;;  %v8337_v40 = vld [vmem:[%s8788_s4 + $0x308] ss:$20 sps:$4 sm:$0xff]   ;;  %v8338_v41 = vld [vmem:[%s8788_s4 + $0x1a0] ss:$20 sps:$4 sm:$0xff]  }
 0x27e   : > { %5828 = vmatprep.subr.bf16.mxu1 %v8269_v42  ;;  %v8339_v42 = vld [vmem:[%s8788_s4 + $0x420] ss:$20 sps:$4 sm:$0xff]  }
 0x280   : > { %5786 = vmatpush1.bf16.msra.mxu0 %v8264_v43  ;;  %v8340_v43 = vld [vmem:[%s8788_s4 + $0x60] ss:$20 sps:$4 sm:$0xff]  }
 0x281   : > { %5829 = vmatpush1.bf16.msra.mxu1 %v8267_v44  ;;  %5787 = vmatprep.subr.bf16.mxu0 %v8272_v45  ;;  %v8341_v44 = vld [vmem:[%s8788_s4 + $0x2e0] ss:$20 sps:$4 sm:$0xff]   ;;  %v8342_v45 = vld [vmem:[%s8788_s4 + $0x178] ss:$20 sps:$4 sm:$0xff]  }
 0x282   : > { %5830 = vmatprep.subr.bf16.mxu1 %v8275_v46  ;;  %v8343_v46 = vld [vmem:[%s8788_s4 + $0x3f8] ss:$20 sps:$4 sm:$0xff]  }
 0x284   : > { %5788 = vmatpush2.bf16.msra.mxu0 %v8270_v47  ;;  %v8344_v47 = vld [vmem:[%s8788_s4 + $0x38] ss:$20 sps:$4 sm:$0xff]  }
 0x285   : > { %5831 = vmatpush2.bf16.msra.mxu1 %v8273_v48  ;;  %5789 = vmatprep.subr.bf16.mxu0 %v8278_v49  ;;  %v8345_v48 = vld [vmem:[%s8788_s4 + $0x2b8] ss:$20 sps:$4 sm:$0xff]   ;;  %v8346_v49 = vld [vmem:[%s8788_s4 + $0x150] ss:$20 sps:$4 sm:$0xff]  }
 0x286   : > { %5832 = vmatprep.subr.bf16.mxu1 %v8281_v50  ;;  %v8347_v50 = vld [vmem:[%s8788_s4 + $0x3d0] ss:$20 sps:$4 sm:$0xff]  }
 0x288   : > { %5790 = vmatpush2.bf16.msra.mxu0 %v8276_v51  ;;  %v8348_v51 = vld [vmem:[%s8788_s4 + $0x10] ss:$20 sps:$4 sm:$0xff]  }
 0x289   : > { %5833 = vmatpush2.bf16.msra.mxu1 %v8279_v52  ;;  %5791 = vmatprep.subr.bf16.mxu0 %v8284_v53  ;;  %v8349_v52 = vld [vmem:[%s8788_s4 + $0x290] ss:$20 sps:$4 sm:$0xff]   ;;  %v8350_v53 = vld [vmem:[%s8788_s4 + $0x768] ss:$20 sps:$4 sm:$0xff]  }
 0x28a   : > { %5834 = vmatprep.subr.bf16.mxu1 %v8287_v54  ;;  %v8352_v54 = vld [vmem:[%s8788_s4 + $0x9e8] ss:$20 sps:$4 sm:$0xff]  }
 0x28c   : > { %5792 = vmatpush2.bf16.msra.mxu0 %v8282_v55  ;;  %v8351_v55 = vld [vmem:[%s8788_s4 + $0x628] ss:$20 sps:$4 sm:$0xff]  }
 0x28d   : > { %5835 = vmatpush2.bf16.msra.mxu1 %v8285_v56  ;;  %5793 = vmatprep.subr.bf16.mxu0 %v8290_v57  ;;  %v8353_v56 = vld [vmem:[%s8788_s4 + $0x8a8] ss:$20 sps:$4 sm:$0xff]   ;;  %v8354_v57 = vld [vmem:[%s8788_s4 + $0x740] ss:$20 sps:$4 sm:$0xff]  }
 0x28e   : > { %5836 = vmatprep.subr.bf16.mxu1 %v8293_v58  ;;  %v8356_v58 = vld [vmem:[%s8788_s4 + $0x9c0] ss:$20 sps:$4 sm:$0xff]  }
 0x290   : > { %5794 = vmatpush2.bf16.msra.mxu0 %v8288_v59  ;;  %v8482_v59 = vld [vmem:[%s8786_s28] ss:$72 sps:$4 sm:$0xff]  }
 0x291   : > { %5837 = vmatpush2.bf16.msra.mxu1 %v8291_v62  ;;  %5795 = vmatprep.subr.bf16.mxu0 %v8296_v63  ;;  %v8483_v62 = vld [vmem:[%s8786_s28 + $0x8] ss:$72 sps:$4 sm:$0xff]  }
 0x292   : > { %5838 = vmatprep.subr.bf16.mxu1 %v8299_v0  ;;  %v8355_v63 = vld [vmem:[%s8788_s4 + $0x600] ss:$20 sps:$4 sm:$0xff]  }
 0x293   : > { %v8357_v0 = vld [vmem:[%s8788_s4 + $0x880] ss:$20 sps:$4 sm:$0xff]  }
 0x294   : > { %5796 = vmatpush2.bf16.msra.mxu0 %v8294_v1  ;;  %v8358_v1 = vld [vmem:[%s8788_s4 + $0x718] ss:$20 sps:$4 sm:$0xff]  }
 0x295   : > { %5839 = vmatpush2.bf16.msra.mxu1 %v8297_v2  ;;  %5797 = vmatprep.subr.bf16.mxu0 %v8302_v3  ;;  %v8360_v2 = vld [vmem:[%s8788_s4 + $0x998] ss:$20 sps:$4 sm:$0xff]  }
 0x296   : > { %5840 = vmatprep.subr.bf16.mxu1 %v8305_v4  ;;  %v8484_v3 = vld [vmem:[%s8786_s28 + $0x14] ss:$72 sps:$4 sm:$0xff]  }
 0x297   : > { %v8485_v4 = vld [vmem:[%s8786_s28 + $0x1c] ss:$72 sps:$4 sm:$0xff]  }
 0x298   : > { %5798 = vmatpush2.bf16.msra.mxu0 %v8300_v5  ;;  %v8359_v5 = vld [vmem:[%s8788_s4 + $0x5d8] ss:$20 sps:$4 sm:$0xff]  }
 0x299   : > { %5841 = vmatpush2.bf16.msra.mxu1 %v8303_v6  ;;  %5799 = vmatprep.subr.bf16.mxu0 %v8308_v7  ;;  %v8361_v6 = vld [vmem:[%s8788_s4 + $0x858] ss:$20 sps:$4 sm:$0xff]   ;;  %v8362_v7 = vld [vmem:[%s8788_s4 + $0x6f0] ss:$20 sps:$4 sm:$0xff]  }
 0x29a   : > { %5842 = vmatprep.subr.bf16.mxu1 %v8311_v8  ;;  %v8364_v8 = vld [vmem:[%s8788_s4 + $0x970] ss:$20 sps:$4 sm:$0xff]  }
 0x29c   : > { %5800 = vmatpush2.bf16.msra.mxu0 %v8306_v9  ;;  %v8363_v9 = vld [vmem:[%s8788_s4 + $0x5b0] ss:$20 sps:$4 sm:$0xff]  }
 0x29d   : > { %5843 = vmatpush2.bf16.msra.mxu1 %v8309_v10  ;;  %5801 = vmatprep.subr.bf16.mxu0 %v8314_v14  ;;  %v8365_v10 = vld [vmem:[%s8788_s4 + $0x830] ss:$20 sps:$4 sm:$0xff]   ;;  %v8366_v14 = vld [vmem:[%s8788_s4 + $0x6c8] ss:$20 sps:$4 sm:$0xff]  }
 0x29e   : > { %5844 = vmatprep.subr.bf16.mxu1 %v8317_v12  ;;  %v8368_v12 = vld [vmem:[%s8788_s4 + $0x948] ss:$20 sps:$4 sm:$0xff]  }
 0x2a0   : > { %5802 = vmatpush2.bf16.msra.mxu0 %v8312_v15  ;;  %v8367_v15 = vld [vmem:[%s8788_s4 + $0x588] ss:$20 sps:$4 sm:$0xff]  }
 0x2a1   : > { %5845 = vmatpush2.bf16.msra.mxu1 %v8315_v16  ;;  %7151 = vmatprep.subr.bf16.mxu0 %v8318_v17  ;;  %v8369_v16 = vld [vmem:[%s8788_s4 + $0x808] ss:$20 sps:$4 sm:$0xff]   ;;  %v8370_v17 = vld [vmem:[%s8788_s4 + $0x6a0] ss:$20 sps:$4 sm:$0xff]  }
 0x2a2   : > { %7173 = vmatprep.subr.bf16.mxu1 %v8319_v19  ;;  %v8372_v19 = vld [vmem:[%s8788_s4 + $0x920] ss:$20 sps:$4 sm:$0xff]  }
 0x2a3   : > { %5804 = vmatmul.mubr.bf16.vlgmr.msra.gmra.mxu0 %v9470_v23 }
 0x2a4   : > { %5847 = vmatmul.mubr.bf16.vlgmr.msra.gmra.mxu1 %v9474_v24  ;;  %7152 = vmatpush3.bf16.msra.mxu0 %v8320_v18  ;;  %v8371_v18 = vld [vmem:[%s8788_s4 + $0x560] ss:$20 sps:$4 sm:$0xff]  }
 0x2a5   : > { %7174 = vmatpush3.bf16.msra.mxu1 %v8321_v20  ;;  %7153 = vmatprep.subr.bf16.mxu0 %v8322_v21  ;;  %v8373_v20 = vld [vmem:[%s8788_s4 + $0x7e0] ss:$20 sps:$4 sm:$0xff]   ;;  %v8374_v21 = vld [vmem:[%s8788_s4 + $0x678] ss:$20 sps:$4 sm:$0xff]  }
 0x2a6   : > { %7175 = vmatprep.subr.bf16.mxu1 %v8323_v22  ;;  %5889 = vmatprep.mubr.bf16.mxu0 %v8480_v29  ;;  %v8376_v22 = vld [vmem:[%s8788_s4 + $0x8f8] ss:$20 sps:$4 sm:$0xff]   ;;  %v8379_v29 = vld [vmem:[%s8788_s4 + $0x510] ss:$20 sps:$4 sm:$0xff]  }
 0x2a7   : > { %5930 = vmatprep.mubr.bf16.mxu1 %v8481_v31  ;;  %v8381_v31 = vld [vmem:[%s8788_s4 + $0x790] ss:$20 sps:$4 sm:$0xff]  }
 0x2a8   : > { %7154 = vmatpush3.bf16.msra.mxu0 %v8324_v25  ;;  %v8375_v25 = vld [vmem:[%s8788_s4 + $0x538] ss:$20 sps:$4 sm:$0xff]  }
 0x2a9   : > { %7176 = vmatpush3.bf16.msra.mxu1 %v8325_v26  ;;  %7155 = vmatprep.subr.bf16.mxu0 %v8326_v27  ;;  %v8377_v26 = vld [vmem:[%s8788_s4 + $0x7b8] ss:$20 sps:$4 sm:$0xff]   ;;  %v8378_v27 = vld [vmem:[%s8788_s4 + $0x650] ss:$20 sps:$4 sm:$0xff]  }
 0x2aa   : > { %7177 = vmatprep.subr.bf16.mxu1 %v8327_v28  ;;  %v8380_v28 = vld [vmem:[%s8788_s4 + $0x8d0] ss:$20 sps:$4 sm:$0xff]  }
 0x2ac   : > { %7156 = vmatpush3.bf16.msra.mxu0 %v8328_v30  ;;  %v8382_v30 = vld [vmem:[%s8788_s4 + $0xc68] ss:$20 sps:$4 sm:$0xff]  }
 0x2ad   : > { %7178 = vmatpush3.bf16.msra.mxu1 %v8329_v32  ;;  %7157 = vmatprep.subr.bf16.mxu0 %v8330_v33  ;;  %v8384_v32 = vld [vmem:[%s8788_s4 + $0xee8] ss:$20 sps:$4 sm:$0xff]  }
 0x2ae   : > { %7179 = vmatprep.subr.bf16.mxu1 %v8331_v34  ;;  %v8383_v33 = vld [vmem:[%s8788_s4 + $0xb28] ss:$20 sps:$4 sm:$0xff]  }
 0x2af   : > { %v8385_v34 = vld [vmem:[%s8788_s4 + $0xda8] ss:$20 sps:$4 sm:$0xff]  }
 0x2b0   : > { %7158 = vmatpush3.bf16.msra.mxu0 %v8332_v35  ;;  %v8386_v35 = vld [vmem:[%s8788_s4 + $0xc40] ss:$20 sps:$4 sm:$0xff]  }
 0x2b1   : > { %7180 = vmatpush3.bf16.msra.mxu1 %v8333_v36  ;;  %7159 = vmatprep.subr.bf16.mxu0 %v8334_v37  ;;  %v8388_v36 = vld [vmem:[%s8788_s4 + $0xec0] ss:$20 sps:$4 sm:$0xff]  }
 0x2b2   : > { %7181 = vmatprep.subr.bf16.mxu1 %v8335_v38  ;;  %v8486_v37 = vld [vmem:[%s8786_s28 + $0x10] ss:$72 sps:$4 sm:$0xff]  }
 0x2b3   : > { %v8487_v38 = vld [vmem:[%s8786_s28 + $0x18] ss:$72 sps:$4 sm:$0xff]  }
 0x2b4   : > { %7160 = vmatpush3.bf16.msra.mxu0 %v8336_v39  ;;  %v8387_v39 = vld [vmem:[%s8788_s4 + $0xb00] ss:$20 sps:$4 sm:$0xff]  }
 0x2b5   : > { %7182 = vmatpush3.bf16.msra.mxu1 %v8337_v40  ;;  %7161 = vmatprep.subr.bf16.mxu0 %v8338_v41  ;;  %v8389_v40 = vld [vmem:[%s8788_s4 + $0xd80] ss:$20 sps:$4 sm:$0xff]   ;;  %v8390_v41 = vld [vmem:[%s8788_s4 + $0xc18] ss:$20 sps:$4 sm:$0xff]  }
 0x2b6   : > { %7183 = vmatprep.subr.bf16.mxu1 %v8339_v42  ;;  %v8392_v42 = vld [vmem:[%s8788_s4 + $0xe98] ss:$20 sps:$4 sm:$0xff]  }
 0x2b8   : > { %7162 = vmatpush3.bf16.msra.mxu0 %v8340_v43  ;;  %v8488_v43 = vld [vmem:[%s8786_s28 + $0x24] ss:$72 sps:$4 sm:$0xff]  }
 0x2b9   : > { %7184 = vmatpush3.bf16.msra.mxu1 %v8341_v44  ;;  %7163 = vmatprep.subr.bf16.mxu0 %v8342_v45  ;;  %v8489_v44 = vld [vmem:[%s8786_s28 + $0x2c] ss:$72 sps:$4 sm:$0xff]  }
 0x2ba   : > { %7185 = vmatprep.subr.bf16.mxu1 %v8343_v46  ;;  %v8391_v45 = vld [vmem:[%s8788_s4 + $0xad8] ss:$20 sps:$4 sm:$0xff]  }
 0x2bb   : > { %v8393_v46 = vld [vmem:[%s8788_s4 + $0xd58] ss:$20 sps:$4 sm:$0xff]  }
 0x2bc   : > { %7164 = vmatpush3.bf16.msra.mxu0 %v8344_v47  ;;  %v8394_v47 = vld [vmem:[%s8788_s4 + $0xbf0] ss:$20 sps:$4 sm:$0xff]  }
 0x2bd   : > { %7186 = vmatpush3.bf16.msra.mxu1 %v8345_v48  ;;  %7165 = vmatprep.subr.bf16.mxu0 %v8346_v49  ;;  %v8396_v48 = vld [vmem:[%s8788_s4 + $0xe70] ss:$20 sps:$4 sm:$0xff]  }
 0x2be   : > { %7187 = vmatprep.subr.bf16.mxu1 %v8347_v50  ;;  %v8395_v49 = vld [vmem:[%s8788_s4 + $0xab0] ss:$20 sps:$4 sm:$0xff]  }
 0x2bf   : > { %v8397_v50 = vld [vmem:[%s8788_s4 + $0xd30] ss:$20 sps:$4 sm:$0xff]  }
 0x2c0   : > { %7166 = vmatpush3.bf16.msra.mxu0 %v8348_v51  ;;  %v8398_v51 = vld [vmem:[%s8788_s4 + $0xbc8] ss:$20 sps:$4 sm:$0xff]  }
 0x2c1   : > { %7188 = vmatpush3.bf16.msra.mxu1 %v8349_v52  ;;  %7195 = vmatprep.subr.bf16.mxu0 %v8350_v53  ;;  %v8400_v52 = vld [vmem:[%s8788_s4 + $0xe48] ss:$20 sps:$4 sm:$0xff]  }
 0x2c2   : > { %7217 = vmatprep.subr.bf16.mxu1 %v8352_v54  ;;  %v8399_v53 = vld [vmem:[%s8788_s4 + $0xa88] ss:$20 sps:$4 sm:$0xff]  }
 0x2c3   : > { %5890 = vmatmul.mubr.bf16.vlgmr.msra.gmra.mxu0 %v8482_v59  ;;  %v8401_v54 = vld [vmem:[%s8788_s4 + $0xd08] ss:$20 sps:$4 sm:$0xff]   ;;  %v8406_v59 = vld [vmem:[%s8788_s4 + $0xb78] ss:$20 sps:$4 sm:$0xff]  }
 0x2c4   : > { %5931 = vmatmul.mubr.bf16.vlgmr.msra.gmra.mxu1 %v8483_v62  ;;  %7196 = vmatpush3.bf16.msra.mxu0 %v8351_v55  ;;  %v8402_v55 = vld [vmem:[%s8788_s4 + $0xba0] ss:$20 sps:$4 sm:$0xff]   ;;  %v8408_v62 = vld [vmem:[%s8788_s4 + $0xdf8] ss:$20 sps:$4 sm:$0xff]  }
 0x2c5   : > { %7218 = vmatpush3.bf16.msra.mxu1 %v8353_v56  ;;  %7197 = vmatprep.subr.bf16.mxu0 %v8354_v57  ;;  %v8404_v56 = vld [vmem:[%s8788_s4 + $0xe20] ss:$20 sps:$4 sm:$0xff]  }
 0x2c6   : > { %7219 = vmatprep.subr.bf16.mxu1 %v8356_v58  ;;  %5971 = vmatprep.mubr.bf16.mxu0 %v8484_v3  ;;  %v8403_v57 = vld [vmem:[%s8788_s4 + $0xa60] ss:$20 sps:$4 sm:$0xff]   ;;  %v8411_v3 = vld [vmem:[%s8788_s4 + $0xa10] ss:$20 sps:$4 sm:$0xff]  }
 0x2c7   : > { %6012 = vmatprep.mubr.bf16.mxu1 %v8485_v4  ;;  %v8405_v58 = vld [vmem:[%s8788_s4 + $0xce0] ss:$20 sps:$4 sm:$0xff]   ;;  %v8413_v4 = vld [vmem:[%s8788_s4 + $0xc90] ss:$20 sps:$4 sm:$0xff]  }
 0x2c8   : > { %7198 = vmatpush3.bf16.msra.mxu0 %v8355_v63  ;;  %v8407_v63 = vld [vmem:[%s8788_s4 + $0xa38] ss:$20 sps:$4 sm:$0xff]  }
 0x2c9   : > { %7220 = vmatpush3.bf16.msra.mxu1 %v8357_v0  ;;  %7199 = vmatprep.subr.bf16.mxu0 %v8358_v1  ;;  %v8409_v0 = vld [vmem:[%s8788_s4 + $0xcb8] ss:$20 sps:$4 sm:$0xff]   ;;  %v8410_v1 = vld [vmem:[%s8788_s4 + $0xb50] ss:$20 sps:$4 sm:$0xff]  }
 0x2ca   : > { %7221 = vmatprep.subr.bf16.mxu1 %v8360_v2  ;;  %v8412_v2 = vld [vmem:[%s8788_s4 + $0xdd0] ss:$20 sps:$4 sm:$0xff]  }
 0x2cc   : > { %7200 = vmatpush3.bf16.msra.mxu0 %v8359_v5  ;;  %v8414_v5 = vld [vmem:[%s8788_s4 + $0x1168] ss:$20 sps:$4 sm:$0xff]  }
 0x2cd   : > { %7222 = vmatpush3.bf16.msra.mxu1 %v8361_v6  ;;  %7201 = vmatprep.subr.bf16.mxu0 %v8362_v7  ;;  %v8416_v6 = vld [vmem:[%s8788_s4 + $0x13e8] ss:$20 sps:$4 sm:$0xff]  }
 0x2ce   : > { %7223 = vmatprep.subr.bf16.mxu1 %v8364_v8  ;;  %v8415_v7 = vld [vmem:[%s8788_s4 + $0x1028] ss:$20 sps:$4 sm:$0xff]  }
 0x2cf   : > { %v8417_v8 = vld [vmem:[%s8788_s4 + $0x12a8] ss:$20 sps:$4 sm:$0xff]  }
 0x2d0   : > { %7202 = vmatpush3.bf16.msra.mxu0 %v8363_v9  ;;  %v8418_v9 = vld [vmem:[%s8788_s4 + $0x1140] ss:$20 sps:$4 sm:$0xff]  }
 0x2d1   : > { %7224 = vmatpush3.bf16.msra.mxu1 %v8365_v10  ;;  %7203 = vmatprep.subr.bf16.mxu0 %v8366_v14  ;;  %v8420_v10 = vld [vmem:[%s8788_s4 + $0x13c0] ss:$20 sps:$4 sm:$0xff]  }
 0x2d2   : > { %7225 = vmatprep.subr.bf16.mxu1 %v8368_v12  ;;  %v8490_v14 = vld [vmem:[%s8786_s28 + $0x20] ss:$72 sps:$4 sm:$0xff]  }
 0x2d3   : > { %v8419_v12 = vld [vmem:[%s8788_s4 + $0x1000] ss:$20 sps:$4 sm:$0xff]  }
 0x2d4   : > { %7204 = vmatpush3.bf16.msra.mxu0 %v8367_v15  ;;  %v8421_v15 = vld [vmem:[%s8788_s4 + $0x1280] ss:$20 sps:$4 sm:$0xff]  }
 0x2d5   : > { %7226 = vmatpush3.bf16.msra.mxu1 %v8369_v16  ;;  %7205 = vmatprep.subr.bf16.mxu0 %v8370_v17  ;;  %v8422_v16 = vld [vmem:[%s8788_s4 + $0x1118] ss:$20 sps:$4 sm:$0xff]  }
 0x2d6   : > { %7227 = vmatprep.subr.bf16.mxu1 %v8372_v19  ;;  %v8424_v17 = vld [vmem:[%s8788_s4 + $0x1398] ss:$20 sps:$4 sm:$0xff]  }
 0x2d7   : > { %v8491_v19 = vld [vmem:[%s8786_s28 + $0x34] ss:$72 sps:$4 sm:$0xff]  }
 0x2d8   : > { %7206 = vmatpush3.bf16.msra.mxu0 %v8371_v18  ;;  %v8425_v18 = vld [vmem:[%s8788_s4 + $0x1258] ss:$20 sps:$4 sm:$0xff]  }
 0x2d9   : > { %7228 = vmatpush3.bf16.msra.mxu1 %v8373_v20  ;;  %7207 = vmatprep.subr.bf16.mxu0 %v8374_v21  ;;  %v8426_v20 = vld [vmem:[%s8788_s4 + $0x10f0] ss:$20 sps:$4 sm:$0xff]  }
 0x2da   : > { %7229 = vmatprep.subr.bf16.mxu1 %v8376_v22  ;;  %v8428_v21 = vld [vmem:[%s8788_s4 + $0x1370] ss:$20 sps:$4 sm:$0xff]  }
 0x2db   : > { %v8427_v22 = vld [vmem:[%s8788_s4 + $0xfb0] ss:$20 sps:$4 sm:$0xff]  }
 0x2dc   : > { %7208 = vmatpush3.bf16.msra.mxu0 %v8375_v25  ;;  %v8429_v25 = vld [vmem:[%s8788_s4 + $0x1230] ss:$20 sps:$4 sm:$0xff]  }
 0x2dd   : > { %7230 = vmatpush3.bf16.msra.mxu1 %v8377_v26  ;;  %7209 = vmatprep.subr.bf16.mxu0 %v8378_v27  ;;  %v8432_v26 = vld [vmem:[%s8788_s4 + $0x1348] ss:$20 sps:$4 sm:$0xff]  }
 0x2de   : > { %7231 = vmatprep.subr.bf16.mxu1 %v8380_v28  ;;  %v8431_v27 = vld [vmem:[%s8788_s4 + $0xf88] ss:$20 sps:$4 sm:$0xff]  }
 0x2df   : > { %v8433_v28 = vld [vmem:[%s8788_s4 + $0x1208] ss:$20 sps:$4 sm:$0xff]  }
 0x2e0   : > { %7210 = vmatpush3.bf16.msra.mxu0 %v8379_v29  ;;  %v8434_v29 = vld [vmem:[%s8788_s4 + $0x10a0] ss:$20 sps:$4 sm:$0xff]  }
 0x2e1   : > { %7232 = vmatpush3.bf16.msra.mxu1 %v8381_v31  ;;  %7239 = vmatprep.subr.bf16.mxu0 %v8382_v30  ;;  %v8436_v31 = vld [vmem:[%s8788_s4 + $0x1320] ss:$20 sps:$4 sm:$0xff]  }
 0x2e2   : > { %7261 = vmatprep.subr.bf16.mxu1 %v8384_v32  ;;  %v8435_v30 = vld [vmem:[%s8788_s4 + $0xf60] ss:$20 sps:$4 sm:$0xff]  }
 0x2e3   : > { %5972 = vmatmul.mubr.bf16.vlgmr.msra.gmra.mxu0 %v8486_v37  ;;  %v8437_v32 = vld [vmem:[%s8788_s4 + $0x11e0] ss:$20 sps:$4 sm:$0xff]   ;;  %v8442_v37 = vld [vmem:[%s8788_s4 + $0x1050] ss:$20 sps:$4 sm:$0xff]  }
 0x2e4   : > { %6013 = vmatmul.mubr.bf16.vlgmr.msra.gmra.mxu1 %v8487_v38  ;;  %7240 = vmatpush3.bf16.msra.mxu0 %v8383_v33  ;;  %v8438_v33 = vld [vmem:[%s8788_s4 + $0x1078] ss:$20 sps:$4 sm:$0xff]   ;;  %v8444_v38 = vld [vmem:[%s8788_s4 + $0x12d0] ss:$20 sps:$4 sm:$0xff]  }
 0x2e5   : > { %7262 = vmatpush3.bf16.msra.mxu1 %v8385_v34  ;;  %7241 = vmatprep.subr.bf16.mxu0 %v8386_v35  ;;  %v8440_v34 = vld [vmem:[%s8788_s4 + $0x12f8] ss:$20 sps:$4 sm:$0xff]  }
 0x2e6   : > { %7263 = vmatprep.subr.bf16.mxu1 %v8388_v36  ;;  %6053 = vmatprep.mubr.bf16.mxu0 %v8488_v43  ;;  %v8439_v35 = vld [vmem:[%s8788_s4 + $0xf38] ss:$20 sps:$4 sm:$0xff]   ;;  %v8448_v43 = vld [vmem:[%s8788_s4 + $0x1640] ss:$20 sps:$4 sm:$0xff]  }
 0x2e7   : > { %6094 = vmatprep.mubr.bf16.mxu1 %v8489_v44  ;;  %v8441_v36 = vld [vmem:[%s8788_s4 + $0x11b8] ss:$20 sps:$4 sm:$0xff]   ;;  %v8449_v44 = vld [vmem:[%s8788_s4 + $0x1500] ss:$20 sps:$4 sm:$0xff]  }
 0x2e8   : > { %7242 = vmatpush3.bf16.msra.mxu0 %v8387_v39  ;;  %v8443_v39 = vld [vmem:[%s8788_s4 + $0xf10] ss:$20 sps:$4 sm:$0xff]  }
 0x2e9   : > { %7264 = vmatpush3.bf16.msra.mxu1 %v8389_v40  ;;  %7243 = vmatprep.subr.bf16.mxu0 %v8390_v41  ;;  %v8445_v40 = vld [vmem:[%s8788_s4 + $0x1190] ss:$20 sps:$4 sm:$0xff]   ;;  %v8446_v41 = vld [vmem:[%s8788_s4 + $0x1668] ss:$20 sps:$4 sm:$0xff]  }
 0x2ea   : > { %7265 = vmatprep.subr.bf16.mxu1 %v8392_v42  ;;  %v8447_v42 = vld [vmem:[%s8788_s4 + $0x1528] ss:$20 sps:$4 sm:$0xff]  }
 0x2ec   : > { %7244 = vmatpush3.bf16.msra.mxu0 %v8391_v45  ;;  %v8450_v45 = vld [vmem:[%s8788_s4 + $0x1618] ss:$20 sps:$4 sm:$0xff]  }
 0x2ed   : > { %7266 = vmatpush3.bf16.msra.mxu1 %v8393_v46  ;;  %7245 = vmatprep.subr.bf16.mxu0 %v8394_v47  ;;  %v8451_v46 = vld [vmem:[%s8788_s4 + $0x14d8] ss:$20 sps:$4 sm:$0xff]   ;;  %v8452_v47 = vld [vmem:[%s8788_s4 + $0x15f0] ss:$20 sps:$4 sm:$0xff]  }
 0x2ee   : > { %7267 = vmatprep.subr.bf16.mxu1 %v8396_v48  ;;  %v5504_v48 = vpop.f32.mrf.mxu1 }
 0x2f0   : > { %7246 = vmatpush3.bf16.msra.mxu0 %v8395_v49  ;;  %v5506_v49 = vpop.f32.mrf.mxu1 }
 0x2f1   : > { %7268 = vmatpush3.bf16.msra.mxu1 %v8397_v50  ;;  %7247 = vmatprep.subr.bf16.mxu0 %v8398_v51  ;;  %v8455_v50 = vld [vmem:[%s8788_s4 + $0x1488] ss:$20 sps:$4 sm:$0xff]  }
 0x2f2   : > { %7269 = vmatprep.subr.bf16.mxu1 %v8400_v52  ;;  %v5508_v51 = vpop.f32.mrf.mxu1  ;;  %v8457_v52 = vld [vmem:[%s8788_s4 + $0x1460] ss:$20 sps:$4 sm:$0xff]  }
 0x2f4   : > { %7248 = vmatpush3.bf16.msra.mxu0 %v8399_v53  ;;  %v8458_v53 = vld [vmem:[%s8788_s4 + $0x1578] ss:$20 sps:$4 sm:$0xff]  }
 0x2f5   : > { %7270 = vmatpush3.bf16.msra.mxu1 %v8401_v54  ;;  %7249 = vmatprep.subr.bf16.mxu0 %v8402_v55  ;;  %v5510_v54 = vpop.f32.mrf.mxu1  ;;  %v8459_v55 = vld [vmem:[%s8788_s4 + $0x1438] ss:$20 sps:$4 sm:$0xff]  }
 0x2f6   : > { %7271 = vmatprep.subr.bf16.mxu1 %v8404_v56  ;;  %v5547_v56 = vpop.f32.mrf.mxu0 }
 0x2f8   : > { %7250 = vmatpush3.bf16.msra.mxu0 %v8403_v57  ;;  %v5590_v57 = vpop.f32.mrf.mxu1 }
 0x2f9   : > { %7272 = vmatpush3.bf16.msra.mxu1 %v8405_v58  ;;  %7251 = vmatprep.subr.bf16.mxu0 %v8406_v59  ;;  %v8460_v58 = vld [vmem:[%s8788_s4 + $0x1550] ss:$20 sps:$4 sm:$0xff]  }
 0x2fa   : > { %7273 = vmatprep.subr.bf16.mxu1 %v8408_v62  ;;  %v8461_v59 = vld [vmem:[%s8788_s4 + $0x1410] ss:$20 sps:$4 sm:$0xff]   ;;  %v5549_v62 = vpop.f32.mrf.mxu0 }
 0x2fc   : > { %7252 = vmatpush3.bf16.msra.mxu0 %v8407_v63  ;;  %v5592_v63 = vpop.f32.mrf.mxu1 }
 0x2fd   : > { %7274 = vmatpush3.bf16.msra.mxu1 %v8409_v0  ;;  %7253 = vmatprep.subr.bf16.mxu0 %v8410_v1  ;;  %v5551_v0 = vpop.f32.mrf.mxu0 }
 0x2fe   : > { %7275 = vmatprep.subr.bf16.mxu1 %v8412_v2  ;;  %v5594_v1 = vpop.f32.mrf.mxu1 }
 0x2ff   : > { %v5553_v2 = vpop.f32.mrf.mxu0 }
 0x300   : > { %7254 = vmatpush3.bf16.msra.mxu0 %v8411_v3  ;;  %v5596_v3 = vpop.f32.mrf.mxu1 }
 0x301   : > { %7276 = vmatpush3.bf16.msra.mxu1 %v8413_v4  ;;  %7283 = vmatprep.subr.bf16.mxu0 %v8414_v5  ;;  %v5633_v4 = vpop.f32.mrf.mxu0 }
 0x302   : > { %7305 = vmatprep.subr.bf16.mxu1 %v8416_v6  ;;  %v5676_v5 = vpop.f32.mrf.mxu1 }
 0x303   : > { %6054 = vmatmul.mubr.bf16.vlgmr.msra.gmra.mxu0 %v8490_v14  ;;  %v5635_v6 = vpop.f32.mrf.mxu0 }
 0x304   : > { %6095 = vmatmul.mubr.bf16.vlgmr.msra.gmra.mxu1 %v9390_v60  ;;  %7284 = vmatpush3.bf16.msra.mxu0 %v8415_v7  ;;  %v8423_v60 = vld [vmem:[%s8788_s4 + $0xfd8] ss:$20 sps:$4 sm:$0xff]   ;;  %v5678_v7 = vpop.f32.mrf.mxu1 }
 0x305   : > { %7306 = vmatpush3.bf16.msra.mxu1 %v8417_v8  ;;  %7285 = vmatprep.subr.bf16.mxu0 %v8418_v9  ;;  %v5637_v8 = vpop.f32.mrf.mxu0 }
 0x306   : > { %7307 = vmatprep.subr.bf16.mxu1 %v8420_v10  ;;  %6135 = vmatprep.mubr.bf16.mxu0 %v8491_v19  ;;  %v5680_v9 = vpop.f32.mrf.mxu1  ;;  %v5548_v10 = vadd.f32 %v5547_v56, %v5504_v48 }
 0x307   : > { %6176 = vmatprep.mubr.bf16.mxu1 %v9402_v11  ;;  %v8430_v11 = vld [vmem:[%s8788_s4 + $0x10c8] ss:$20 sps:$4 sm:$0xff]   ;;  %v5639_v14 = vpop.f32.mrf.mxu0 }
 0x308   : > { %7286 = vmatpush3.bf16.msra.mxu0 %v8419_v12  ;;  %v5682_v12 = vpop.f32.mrf.mxu1  ;;  %v5591_v19 = vadd.f32 %v5590_v57, %v5548_v10  ;;  %v364_v57 = vld [vmem:[#allocation8 + $0x38] sm:$0xff] }
 0x309   : > { %7308 = vmatpush3.bf16.msra.mxu1 %v8421_v15  ;;  %7287 = vmatprep.subr.bf16.mxu0 %v8422_v16  ;;  %v5550_v15 = vadd.f32 %v5549_v62, %v5506_v49 }
 0x30a   : > { %7309 = vmatprep.subr.bf16.mxu1 %v8424_v17 }
 0x30c   : > { %7288 = vmatpush3.bf16.msra.mxu0 %v8423_v60  ;;  %v5552_v60 = vadd.f32 %v5551_v0, %v5508_v51  ;;  %v365_v0 = vld [vmem:[#allocation8 + $0x40] sm:$0xff] }
 0x30d   : > { %7310 = vmatpush3.bf16.msra.mxu1 %v8425_v18  ;;  %7289 = vmatprep.subr.bf16.mxu0 %v8426_v20  ;;  %v5593_v18 = vadd.f32 %v5592_v63, %v5550_v15  ;;  %v5554_v20 = vadd.f32 %v5553_v2, %v5510_v54 }
 0x30e   : > { %7311 = vmatprep.subr.bf16.mxu1 %v8428_v21  ;;  %v5634_v21 = vadd.f32 %v5633_v4, %v5591_v19 }
 0x310   : > { %7290 = vmatpush3.bf16.msra.mxu0 %v8427_v22 }
 0x311   : > { %7312 = vmatpush3.bf16.msra.mxu1 %v8429_v25  ;;  %7291 = vmatprep.subr.bf16.mxu0 %v8430_v11  ;;  %v5595_v25 = vadd.f32 %v5594_v1, %v5552_v60  ;;  %v5636_v11 = vadd.f32 %v5635_v6, %v5593_v18 }
 0x312   : > { %7313 = vmatprep.subr.bf16.mxu1 %v8432_v26  ;;  %v5597_v26 = vadd.f32 %v5596_v3, %v5554_v20 }
 0x314   : > { %7292 = vmatpush3.bf16.msra.mxu0 %v8431_v27  ;;  %v5677_v27 = vadd.f32 %v5676_v5, %v5634_v21 }
 0x315   : > { %7314 = vmatpush3.bf16.msra.mxu1 %v8433_v28  ;;  %7293 = vmatprep.subr.bf16.mxu0 %v8434_v29  ;;  %v5638_v28 = vadd.f32 %v5637_v8, %v5595_v25 }
 0x316   : > { %7315 = vmatprep.subr.bf16.mxu1 %v8436_v31 }
 0x318   : > { %7294 = vmatpush3.bf16.msra.mxu0 %v8435_v30  ;;  %v5679_v30 = vadd.f32 %v5678_v7, %v5636_v11 }
 0x319   : > { %7316 = vmatpush3.bf16.msra.mxu1 %v8437_v32  ;;  %7295 = vmatprep.subr.bf16.mxu0 %v8438_v33  ;;  %v5640_v32 = vadd.f32 %v5639_v14, %v5597_v26 }
 0x31a   : > { %7317 = vmatprep.subr.bf16.mxu1 %v8440_v34  ;;  %v5681_v34 = vadd.f32 %v5680_v9, %v5638_v28 }
 0x31c   : > { %7296 = vmatpush3.bf16.msra.mxu0 %v8439_v35 }
 0x31d   : > { %7318 = vmatpush3.bf16.msra.mxu1 %v8441_v36  ;;  %7297 = vmatprep.subr.bf16.mxu0 %v8442_v37 }
 0x31e   : > { %7319 = vmatprep.subr.bf16.mxu1 %v8444_v38  ;;  %v5683_v38 = vadd.f32 %v5682_v12, %v5640_v32 }
 0x320   : > { %7298 = vmatpush3.bf16.msra.mxu0 %v8443_v39 }
 0x321   : > { %7320 = vmatpush3.bf16.msra.mxu1 %v8445_v40  ;;  %7327 = vmatprep.subr.bf16.mxu0 %v8446_v41 }
 0x323   : > { %6136 = vmatmul.mubr.bf16.vlgmr.msra.gmra.mxu0 %v9394_v61  ;;  %v8453_v61 = vld [vmem:[%s8788_s4 + $0x14b0] ss:$20 sps:$4 sm:$0xff]   ;;  %v5719_v16 = vpop.f32.mrf.mxu0 }
 0x324   : > { %6177 = vmatmul.mubr.bf16.vlgmr.msra.gmra.mxu1 %v9470_v23  ;;  %7328 = vmatpush3.bf16.msra.mxu0 %v8447_v42  ;;  %v8454_v23 = vld [vmem:[%s8788_s4 + $0x15c8] ss:$20 sps:$4 sm:$0xff]   ;;  %v5762_v17 = vpop.f32.mrf.mxu1  ;;  %v5720_v33 = vadd.f32 %v5719_v16, %v5677_v27 }
 0x325   : > { %6217 = vmatprep.mubr.bf16.mxu0 %v9406_v13  ;;  %7329 = vmatprep.subr.bf16.mxu0 %v8448_v43  ;;  %v8456_v13 = vld [vmem:[%s8788_s4 + $0x15a0] ss:$20 sps:$4 sm:$0xff]  }
 0x326   : > { %v5764_v22 = vpop.f32.mrf.mxu1  ;;  %v5763_v39 = vadd.f32 %v5762_v17, %v5720_v33 }
 0x328   : > { %7330 = vmatpush3.bf16.msra.mxu0 %v8449_v44  ;;  %v5766_v31 = vpop.f32.mrf.mxu1 }
 0x329   : > { %7331 = vmatprep.subr.bf16.mxu0 %v8450_v45 }
 0x32a   : > { %v5768_v37 = vpop.f32.mrf.mxu1 }
 0x32c   : > { %7332 = vmatpush3.bf16.msra.mxu0 %v8451_v46 }
 0x32d   : > { %7333 = vmatprep.subr.bf16.mxu0 %v8452_v47  ;;  %v359_v47 = vld [vmem:[#allocation8 + $0x10] sm:$0xff] }
 0x330   : > { %7334 = vmatpush3.bf16.msra.mxu0 %v8453_v61 }
 0x331   : > { %7335 = vmatprep.subr.bf16.mxu0 %v8454_v23 }
 0x334   : > { %7336 = vmatpush3.bf16.msra.mxu0 %v8455_v50 }
 0x335   : > { %7337 = vmatprep.subr.bf16.mxu0 %v8456_v13  ;;  %v360_v13 = vld [vmem:[#allocation8 + $0x18] sm:$0xff] }
 0x338   : > { %7338 = vmatpush3.bf16.msra.mxu0 %v8457_v52 }
 0x339   : > { %7339 = vmatprep.subr.bf16.mxu0 %v8458_v53 }
 0x33c   : > { %7340 = vmatpush3.bf16.msra.mxu0 %v8459_v55 }
 0x33d   : > { %7341 = vmatprep.subr.bf16.mxu0 %v8460_v58 }
 0x340   : > { %7342 = vmatpush3.bf16.msra.mxu0 %v8461_v59 }
 0x343   : > { %6218 = vmatmul.mubr.bf16.vlgmr.msra.gmra.mxu0 %v9474_v24  ;;  %v5721_v24 = vpop.f32.mrf.mxu0 }
 0x344   : > { %v5722_v35 = vadd.f32 %v5721_v24, %v5679_v30 }
 0x345   : > { %v5723_v29 = vpop.f32.mrf.mxu0 }
 0x346   : > { %v5724_v40 = vadd.f32 %v5723_v29, %v5681_v34  ;;  %v5765_v43 = vadd.f32 %v5764_v22, %v5722_v35 }
 0x347   : > { %v5725_v36 = vpop.f32.mrf.mxu0 }
 0x348   : > { %v5726_v44 = vadd.f32 %v5725_v36, %v5683_v38  ;;  %v5767_v61 = vadd.f32 %v5766_v31, %v5724_v40 }
 0x34a   : > { %v5769_v52 = vadd.f32 %v5768_v37, %v5726_v44 }
 0x363   : > { %v5805_v41 = vpop.f32.mrf.mxu0 }
 0x364   : > { %v5848_v42 = vpop.f32.mrf.mxu1  ;;  %v5806_v45 = vadd.f32 %v5805_v41, %v5763_v39 }
 0x365   : > { %v5807_v46 = vpop.f32.mrf.mxu0 }
 0x366   : > { %v5850_v48 = vpop.f32.mrf.mxu1  ;;  %v5808_v23 = vadd.f32 %v5807_v46, %v5765_v43  ;;  %v5849_v49 = vadd.f32 %v5848_v42, %v5806_v45 }
 0x367   : > { %v5809_v50 = vpop.f32.mrf.mxu0 }
 0x368   : > { %v5852_v51 = vpop.f32.mrf.mxu1  ;;  %v6228_v53 = vadd.f32 %v5849_v49, %v359_v47  ;;  %v5810_v54 = vadd.f32 %v5809_v50, %v5767_v61  ;;  %v5851_v55 = vadd.f32 %v5850_v48, %v5808_v23 }
 0x369   : > { %v5811_v56 = vpop.f32.mrf.mxu0 }
 0x36a   : > { %v5854_v58 = vpop.f32.mrf.mxu1  ;;  %6238 = vst [vmem:[#allocation8 + $0x10] sm:$0xff] %v6228_v53  ;;  %v6229_v59 = vadd.f32 %v5851_v55, %v360_v13  ;;  %v5812_v62 = vadd.f32 %v5811_v56, %v5769_v52  ;;  %v5853_v63 = vadd.f32 %v5852_v51, %v5810_v54 }
 0x36c   : > { %6239 = vst [vmem:[#allocation8 + $0x18] sm:$0xff] %v6229_v59  ;;  %v6233_v1 = vadd.f32 %v5853_v63, %v364_v57  ;;  %v5855_v2 = vadd.f32 %v5854_v58, %v5812_v62 }
 0x36e   : > { %6243 = vst [vmem:[#allocation8 + $0x38] sm:$0xff] %v6233_v1  ;;  %v6234_v3 = vadd.f32 %v5855_v2, %v365_v0 }
 0x370   : > { %6244 = vst [vmem:[#allocation8 + $0x40] sm:$0xff] %v6234_v3 }
 0x383   : > { %v7167_v4 = vpop.f32.mrf.mxu0 }
 0x384   : > { %v7189_v5 = vpop.f32.mrf.mxu1 }
 0x385   : > { %v7168_v6 = vpop.f32.mrf.mxu0 }
 0x386   : > { %v7190_v7 = vpop.f32.mrf.mxu1  ;;  %v7169_v26 = vadd.f32 %v7168_v6, %v7167_v4  ;;  %v361_v4 = vld [vmem:[#allocation8 + $0x20] sm:$0xff] }
 0x387   : > { %v7170_v8 = vpop.f32.mrf.mxu0  ;;  %v7191_v27 = vadd.f32 %v7190_v7, %v7189_v5 }
 0x388   : > { %v7192_v9 = vpop.f32.mrf.mxu1 }
 0x389   : > { %v7171_v10 = vpop.f32.mrf.mxu0  ;;  %v5933_v32 = vadd.f32 %v7191_v27, %v7169_v26 }
 0x38a   : > { %v7193_v12 = vpop.f32.mrf.mxu1  ;;  %v7172_v33 = vadd.f32 %v7171_v10, %v7170_v8 }
 0x38b   : > { %v7194_v34 = vadd.f32 %v7193_v12, %v7192_v9 }
 0x38d   : > { %v5936_v41 = vadd.f32 %v7194_v34, %v7172_v33 }
 0x3a3   : > { %v7211_v14 = vpop.f32.mrf.mxu0 }
 0x3a4   : > { %v7233_v16 = vpop.f32.mrf.mxu1 }
 0x3a5   : > { %v7212_v15 = vpop.f32.mrf.mxu0 }
 0x3a6   : > { %v7234_v19 = vpop.f32.mrf.mxu1  ;;  %v7213_v31 = vadd.f32 %v7212_v15, %v7211_v14  ;;  %v366_v14 = vld [vmem:[#allocation8 + $0x48] sm:$0xff] }
 0x3a7   : > { %v7214_v17 = vpop.f32.mrf.mxu0  ;;  %v7235_v37 = vadd.f32 %v7234_v19, %v7233_v16 }
 0x3a8   : > { %v7236_v18 = vpop.f32.mrf.mxu1  ;;  %v5974_v36 = vadd.f32 %v7213_v31, %v5933_v32 }
 0x3a9   : > { %v7215_v60 = vpop.f32.mrf.mxu0 }
 0x3aa   : > { %v7237_v21 = vpop.f32.mrf.mxu1  ;;  %v7216_v38 = vadd.f32 %v7215_v60, %v7214_v17  ;;  %v6015_v43 = vadd.f32 %v7235_v37, %v5974_v36 }
 0x3ab   : > { %v7238_v45 = vadd.f32 %v7237_v21, %v7236_v18 }
 0x3ac   : > { %v5977_v44 = vadd.f32 %v7216_v38, %v5936_v41 }
 0x3ae   : > { %v6018_v49 = vadd.f32 %v7238_v45, %v5977_v44 }
 0x3c3   : > { %v7255_v20 = vpop.f32.mrf.mxu0 }
 0x3c4   : > { %v7277_v22 = vpop.f32.mrf.mxu1 }
 0x3c5   : > { %v7256_v24 = vpop.f32.mrf.mxu0 }
 0x3c6   : > { %v7278_v11 = vpop.f32.mrf.mxu1  ;;  %v7257_v42 = vadd.f32 %v7256_v24, %v7255_v20 }
 0x3c7   : > { %v7258_v25 = vpop.f32.mrf.mxu0  ;;  %v7279_v61 = vadd.f32 %v7278_v11, %v7277_v22 }
 0x3c8   : > { %v7280_v29 = vpop.f32.mrf.mxu1  ;;  %v6056_v48 = vadd.f32 %v7257_v42, %v6015_v43 }
 0x3c9   : > { %v7259_v28 = vpop.f32.mrf.mxu0 }
 0x3ca   : > { %v7281_v35 = vpop.f32.mrf.mxu1  ;;  %v7260_v23 = vadd.f32 %v7259_v28, %v7258_v25  ;;  %v6097_v52 = vadd.f32 %v7279_v61, %v6056_v48 }
 0x3cb   : > { %v7282_v54 = vadd.f32 %v7281_v35, %v7280_v29 }
 0x3cc   : > { %v6059_v53 = vadd.f32 %v7260_v23, %v6018_v49 }
 0x3ce   : > { %v6100_v62 = vadd.f32 %v7282_v54, %v6059_v53 }
 0x3e3   : > { %v7299_v30 = vpop.f32.mrf.mxu0 }
 0x3e4   : > { %v7321_v40 = vpop.f32.mrf.mxu1 }
 0x3e5   : > { %v7300_v39 = vpop.f32.mrf.mxu0 }
 0x3e6   : > { %v7322_v47 = vpop.f32.mrf.mxu1  ;;  %v7301_v50 = vadd.f32 %v7300_v39, %v7299_v30 }
 0x3e7   : > { %v7302_v46 = vpop.f32.mrf.mxu0  ;;  %v7323_v56 = vadd.f32 %v7322_v47, %v7321_v40 }
 0x3e8   : > { %v7324_v51 = vpop.f32.mrf.mxu1  ;;  %v6138_v55 = vadd.f32 %v7301_v50, %v6097_v52 }
 0x3e9   : > { %v7303_v13 = vpop.f32.mrf.mxu0 }
 0x3ea   : > { %v7304_v57 = vadd.f32 %v7303_v13, %v7302_v46  ;;  %v7325_v58 = vpop.f32.mrf.mxu1  ;;  %v6179_v0 = vadd.f32 %v7323_v56, %v6138_v55 }
 0x3eb   : > { %v7326_v2 = vadd.f32 %v7325_v58, %v7324_v51 }
 0x3ec   : > { %v6141_v1 = vadd.f32 %v7304_v57, %v6100_v62 }
 0x3ee   : > { %v6182_v8 = vadd.f32 %v7326_v2, %v6141_v1 }
 0x403   : > { %v7343_v59 = vpop.f32.mrf.mxu0 }
 0x405   : > { %v7344_v63 = vpop.f32.mrf.mxu0 }
 0x406   : > { %v7345_v3 = vadd.f32 %v7344_v63, %v7343_v59 }
 0x407   : > { %v7346_v5 = vpop.f32.mrf.mxu0 }
 0x408   : > { %v6220_v6 = vadd.f32 %v7345_v3, %v6179_v0 }
 0x409   : > { %v7347_v7 = vpop.f32.mrf.mxu0 }
 0x40a   : > { %v6230_v9 = vadd.f32 %v6220_v6, %v361_v4  ;;  %v7348_v10 = vadd.f32 %v7347_v7, %v7346_v5 }
 0x40c   : > { %6240 = vst [vmem:[#allocation8 + $0x20] sm:$0xff] %v6230_v9  ;;  %v6223_v12 = vadd.f32 %v7348_v10, %v6182_v8  ;;  %6249 = sbr.rel (%p7145_p5) target bundleno = 1051 (0x41b), region = 71 }
 0x40e   : > { %v6235_v15 = vadd.f32 %v6223_v12, %v366_v14 }
 0x410   : > { %6245 = vst [vmem:[#allocation8 + $0x48] sm:$0xff] %v6235_v15 }
 0x411   : > { %v6250_v16 = vld [vmem:[#allocation8] sm:$0xff]  ;;  %v6251_v17 = vld [vmem:[#allocation8 + $0x8] sm:$0xff]  ;;  %v6252_v19 = vld [vmem:[#allocation8 + $0x10] sm:$0xff] }
 0x412   : > { %v6260_v60 = vmax.f32 %v6250_v16, 0.0  ;;  %v6261_v18 = vmax.f32 %v6251_v17, 0.0  ;;  %v6262_v20 = vmax.f32 %v6252_v19, 0.0  ;;  %v6253_v21 = vld [vmem:[#allocation8 + $0x18] sm:$0xff]  ;;  %v6255_v22 = vld [vmem:[#allocation8 + $0x28] sm:$0xff]  ;;  %v6256_v27 = vld [vmem:[#allocation8 + $0x30] sm:$0xff] }
 0x413   : > { %v6254_v24 = vld [vmem:[#allocation8 + $0x20] sm:$0xff]  ;;  %v6263_v25 = vmax.f32 %v6253_v21, 0.0  ;;  %v6265_v26 = vmax.f32 %v6255_v22, 0.0  ;;  %v6257_v28 = vld [vmem:[#allocation8 + $0x38] sm:$0xff]  ;;  %v6266_v31 = vmax.f32 %v6256_v27, 0.0 }
 0x414   : > { %v6264_v11 = vmax.f32 %v6254_v24, 0.0  ;;  %v6258_v29 = vld [vmem:[#allocation8 + $0x40] sm:$0xff]  ;;  %6270 = vst [vmem:[#allocation8] sm:$0xff] %v6260_v60  ;;  %6271 = vst [vmem:[#allocation8 + $0x8] sm:$0xff] %v6261_v18  ;;  %v6267_v30 = vmax.f32 %v6257_v28, 0.0 }
 0x415   : > { %6272 = vst [vmem:[#allocation8 + $0x10] sm:$0xff] %v6262_v20  ;;  %v6268_v32 = vmax.f32 %v6258_v29, 0.0  ;;  %6273 = vst [vmem:[#allocation8 + $0x18] sm:$0xff] %v6263_v25 }
 0x416   : > { %6274 = vst [vmem:[#allocation8 + $0x20] sm:$0xff] %v6264_v11  ;;  %6275 = vst [vmem:[#allocation8 + $0x28] sm:$0xff] %v6265_v26 }
 0x417   : > { %v6259_v33 = vld [vmem:[#allocation8 + $0x48] sm:$0xff]  ;;  %6276 = vst [vmem:[#allocation8 + $0x30] sm:$0xff] %v6266_v31  ;;  %6277 = vst [vmem:[#allocation8 + $0x38] sm:$0xff] %v6267_v30 }
 0x418   : > { %v6269_v34 = vmax.f32 %v6259_v33, 0.0  ;;  %6278 = vst [vmem:[#allocation8 + $0x40] sm:$0xff] %v6268_v32 }
 0x41a   : > { %6279 = vst [vmem:[#allocation8 + $0x48] sm:$0xff] %v6269_v34 }
 0x41b PF: > { %p9636_p10 = scmp.eq.s32.totalorder %s6398_s18, 1  ;;  %s8632_s21 = smov [#allocation8]  }
 0x41c   : > { %s6292_s23 = sshll.u32 %s8632_s21, 4  ;;  %s6293_s23 = int_to_ptr.vmem [resolvable:$true] %s6292_s23 }
 0x41d   : > { %s8544_s24 = scalar_lea.vmem %s6293_s23, 1280  ;;  %p8551_p8 = scmp.lt.s32.totalorder %s6293_s23, %s6293_s23 }
 0x41e   : > { %p8545_p6 = scmp.ne.s32.totalorder %s6293_s23, %s8544_s24  ;;  %p8552_p11 = scmp.lt.s32.totalorder %s8544_s24, %s8544_s24 }
 0x420   : > { %p8546_p7 = pnand %p8545_p6, %p9636_p10  ;;  %p8553_p12 = por %p8552_p11, %p8551_p8 }
 0x422   : > { %p8547_p9 = pneg %p8546_p7 }
 0x424   : > { %p8554_p13 = pnand %p8553_p12, %p8547_p9 }
 0x426   : > { %8557 = shalt.err (!%p8554_p13)
}
 0x427   : > { %s8633_s26 = smov 640   ;;  %s8634_s18 = smov 40  }
 0x428   : > { %7361 = dma.vmem_to_hbm [thread:$0]  (%p9636_p10), %s6293_s23, 1280, %s9672_s3, [#allocation5], %s8633_s26, %s8633_s26, %s8634_s18  }
 0x429   : > { %8601 = dma.done.wait (%p9636_p10), [#allocation5], 1280  }
 0x42a   : > { %8603 = vsyncadd (%p9636_p10), [#allocation5], 4294966016 }
 0x42b PF: > { %s18_s17 = sadd.s32 1, %s8626_s17   ;;  %s9680_s12 = smov %s8610_s13 }
 0x42c   : > { %p15_p0 = scmp.ge.s32.totalorder %s18_s17, 4   ;;  %s9681_s13 = smov %s8614_s14 }
 0x42d   : > { %s9682_s14 = smov %s8713_s25  ;;  %s9683_s15 = smov %s8622_s16 }
 0x42e   : > { %s9684_s16 = smov %s9686_s19  ;;  %17 = sbr.rel (!%p15_p0) target bundleno = 6 (0x6), region = 114 }
 0x433   :  { %6308 = vsyncpa [#allocation4], 1 }
 0x434   :  { %6310 = vsyncpa [#allocation4 + $0x1], 1 }
 0x435   :  { %6311 = vsyncpa [#allocation7], 1 }
 0x436   :  { %6312 = vsyncpa [#allocation5], 1 }
 0x437   :  { %6314 = vsyncpa [#allocation5 + $0x1], 1 }

</bundles_post_ra>
